<compile_context>
chip_gen: v7x
topology: tpu7x:2x2x1
jax: 0.10.0
libtpu: 0.0.40
codegen_flags: <defaults>
</compile_context>

<pallas_src>
import functools
import math

import numpy as np

import jax
import jax.numpy as jnp
from jax.experimental import pallas as pl
from jax.experimental.pallas import tpu as pltpu


_SQRT_HALF = 0.7071067811865476
_VMEM_LIMIT = 48 * 1024 * 1024  # explicit scoped-VMEM limit (safe on v5e/v6e/v7x)


def _erf(v):
    # Abramowitz & Stegun 7.1.26 rational approximation (max abs err ~1.5e-7),
    # built only from ops with guaranteed Mosaic lowerings (abs/exp/where).
    # (The exp lands on the EUP; ~10 VALU mul/adds remain -- acceptable here
    # since the kernel is matmul/memory bound at real sizes.)
    a1, a2, a3, a4, a5 = (0.254829592, -0.284496736, 1.421413741,
                          -1.453152027, 1.061405429)
    p = 0.3275911
    av = jnp.abs(v)
    t = 1.0 / (1.0 + p * av)
    poly = ((((a5 * t + a4) * t + a3) * t + a2) * t + a1) * t
    y = 1.0 - poly * jnp.exp(-av * av)
    return jnp.where(v >= 0, y, -y)


def _gelu_exact(g):
    # F.gelu default (exact, erf-based).
    return 0.5 * g * (1.0 + _erf(g * _SQRT_HALF))


# --------------------------------------------------------------------------
# Pass 1: GroupNorm statistics, tiled reduction over HW (accumulator pattern)
# --------------------------------------------------------------------------
def _gn_stats_kernel(x_ref, gnw_ref, gnb_ref, c2g_ref, g2c_ref, o_ref):
    t = pl.program_id(1)

    @pl.when(t == 0)
    def _():
        o_ref[...] = jnp.zeros_like(o_ref)

    x = x_ref[...]                                             # (TH, C) f32
    # One-pass stats: accumulate [sum(x); sum(x*x)] together (single sweep
    # over the big tile instead of two centered reductions).
    part = jnp.concatenate(
        [jnp.sum(x, axis=0, keepdims=True),
         jnp.sum(x * x, axis=0, keepdims=True)], axis=0)       # (2, C)
    o_ref[...] += part

    @pl.when(t == pl.num_programs(1) - 1)
    def _():
        sums = o_ref[...]                                      # (2, C)
        # Group-average + broadcast back with a tiny (C,G)/(G,C) pair
        # (replaces the old dense (C,C) averaging matrix).
        g = jnp.dot(jnp.dot(sums, c2g_ref[...],
                            preferred_element_type=jnp.float32),
                    g2c_ref[...], preferred_element_type=jnp.float32)
        gmu = g[0:1, :]                                        # E[x]   per group
        gvar = g[1:2, :] - gmu * gmu                           # E[x^2] - mu^2
        scale = gnw_ref[...] * jax.lax.rsqrt(gvar + 1e-6)
        shift = gnb_ref[...] - gmu * scale
        o_ref[...] = jnp.concatenate([scale, shift], axis=0)   # (2, C) affine


# --------------------------------------------------------------------------
# Pass 2: GroupNorm affine + conv_input + layernorms + GeGLU + conv_output
# --------------------------------------------------------------------------
def _attn_block_kernel(x_ref, ss_ref, prow_ref, bg1_ref,
                       win_ref, wg1_ref, wg2_ref, wout_ref, o_ref):
    x_in = x_ref[...]                                          # (TH, C) f32
    scale = ss_ref[0:1, :]
    shift = ss_ref[1:2, :]
    xg = x_in * scale + shift                                  # GroupNorm (folded affine)

    bin_ = prow_ref[0:1, :]
    ln1w, ln1b = prow_ref[1:2, :], prow_ref[2:3, :]
    ln2w, ln2b = prow_ref[3:4, :], prow_ref[4:5, :]
    ln3w, ln3b = prow_ref[5:6, :], prow_ref[6:7, :]
    bg2, bout = prow_ref[7:8, :], prow_ref[8:9, :]

    def bf16(v):
        return v.astype(jnp.bfloat16)       # bf16 MXU operands, f32 accumulate

    # conv_input: 1x1 conv == per-token matmul
    x0 = jnp.dot(bf16(xg), win_ref[...],
                 preferred_element_type=jnp.float32) + bin_

    def layer_norm(v, w, b):
        m = jnp.mean(v, axis=-1, keepdims=True)
        c = v - m
        var = jnp.mean(c * c, axis=-1, keepdims=True)
        return c * jax.lax.rsqrt(var + 1e-5) * w + b

    # attention_1 / attention_2 outputs are discarded in the reference forward,
    # so only layernorm + residual adds remain on the live path.
    x1 = layer_norm(x0, ln1w, ln1b) + x0
    x2 = layer_norm(x1, ln2w, ln2b) + x0
    x3 = layer_norm(x2, ln3w, ln3b)

    # GeGLU: single merged (C, 8C) projection, sliced at the 4C lane boundary.
    h12 = jnp.dot(bf16(x3), wg1_ref[...],
                  preferred_element_type=jnp.float32) + bg1_ref[...]
    four_c = wg2_ref.shape[0]
    h = h12[:, :four_c]
    g = h12[:, four_c:]
    hg = h * _gelu_exact(g)

    x4 = jnp.dot(bf16(hg), wg2_ref[...],
                 preferred_element_type=jnp.float32) + bg2 + x2

    # conv_output (1x1) + long residual
    o_ref[...] = (jnp.dot(bf16(x4), wout_ref[...],
                          preferred_element_type=jnp.float32) + bout + x_in)


def _pick_tile(hw, target):
    """Largest HW tile <= target that divides HW and is a multiple of 8."""
    for th in range(min(hw, max(target, 8)), 7, -1):
        if hw % th == 0 and th % 8 == 0:
            return th
    return hw  # full extent is always a legal block dim


@functools.partial(jax.jit, static_argnames=("tile_hw",))
def unet_attention_block(x_nchw, context, params, tile_hw=None):
    """Pallas implementation of UNET_AttentionBlock.forward(x, context)."""
    del context  # attention_2 result is discarded by the reference forward
    n, c, h, w = x_nchw.shape
    hw = h * w
    x_tok = jnp.transpose(jnp.reshape(x_nchw, (n, c, hw)), (0, 2, 1)).astype(jnp.float32)

    th = _pick_tile(hw, 512 if tile_hw is None else tile_hw)
    n_t = hw // th

    num_groups = 32
    cg = c // num_groups
    gid = np.repeat(np.arange(num_groups), cg)                       # (C,)
    onehot = (gid[:, None] == np.arange(num_groups)[None, :])        # (C, G)
    c2g = jnp.asarray(onehot.astype(np.float32) / (cg * hw))         # channel -> group mean
    g2c = jnp.asarray(onehot.T.astype(np.float32))                   # group   -> channel bcast

    row = lambda v: jnp.reshape(v, (1, -1)).astype(jnp.float32)
    p = params
    gnw, gnb = row(p["gn_w"]), row(p["gn_b"])

    x_spec = pl.BlockSpec((None, th, c), lambda b, t: (b, t, 0))
    full2d = lambda a: pl.BlockSpec(a.shape, lambda b, t: (0, 0))
    # TODO(synk): at real SD sizes, give the constant weight/param specs
    # pipeline_mode=pl.Buffered(1) (single-buffered) so they are not
    # double-buffered in VMEM; left at the default here for portability.
    # TODO(synk): C=32 in the test config keeps the lane dim at 1/4
    # utilization (masked stores); real SD channel counts (640/1280) are
    # lane-dense.  On v7x, fp8 weight storage would halve VMEM/DMA again.

    # ---- pass 1: per-batch folded GroupNorm scale/shift ----
    ss = pl.pallas_call(
        _gn_stats_kernel,
        out_shape=jax.ShapeDtypeStruct((n, 2, c), jnp.float32),
        grid=(n, n_t),
        in_specs=[x_spec, full2d(gnw), full2d(gnb), full2d(c2g), full2d(g2c)],
        out_specs=pl.BlockSpec((None, 2, c), lambda b, t: (b, 0, 0)),
        compiler_params=pltpu.CompilerParams(
            dimension_semantics=("parallel", "arbitrary"),
            vmem_limit_bytes=_VMEM_LIMIT),
    )(x_tok, gnw, gnb, c2g, g2c)

    # ---- pass 2: the rest of the block, fully parallel over (batch, HW) ----
    four_c = 4 * c
    prow = jnp.concatenate(
        [row(p["conv_in_b"]),
         row(p["ln1_w"]), row(p["ln1_b"]),
         row(p["ln2_w"]), row(p["ln2_b"]),
         row(p["ln3_w"]), row(p["ln3_b"]),
         row(p["geglu2_b"]), row(p["conv_out_b"])], axis=0)          # (9, C) f32
    bg1 = row(p["geglu1_b"])                                         # (1, 8C) f32
    wbf = lambda a: a.astype(jnp.float32).astype(jnp.bfloat16)
    win = wbf(jnp.transpose(p["conv_in_w"][:, :, 0, 0]))             # (C, C)
    wg1 = wbf(jnp.transpose(p["geglu1_w"]))                          # (C, 8C) value|gate merged
    wg2 = wbf(jnp.transpose(p["geglu2_w"]))                          # (4C, C)
    wout = wbf(jnp.transpose(p["conv_out_w"][:, :, 0, 0]))           # (C, C)
    assert wg1.shape[1] == 2 * four_c

    out_tok = pl.pallas_call(
        _attn_block_kernel,
        out_shape=jax.ShapeDtypeStruct((n, hw, c), jnp.float32),
        grid=(n, n_t),
        in_specs=[x_spec,
                  pl.BlockSpec((None, 2, c), lambda b, t: (b, 0, 0)),
                  full2d(prow), full2d(bg1),
                  full2d(win), full2d(wg1), full2d(wg2), full2d(wout)],
        out_specs=x_spec,
        compiler_params=pltpu.CompilerParams(
            dimension_semantics=("parallel", "parallel"),
            vmem_limit_bytes=_VMEM_LIMIT),
    )(x_tok, ss, prow, bg1, win, wg1, wg2, wout)

    return jnp.reshape(jnp.transpose(out_tok, (0, 2, 1)), (n, c, h, w))


def init_params(key, n_head, n_embd):
    """Deterministic synthetic parameters, shapes as in the module __init__."""
    C = n_head * n_embd
    ks = jax.random.split(key, 16)
    nrm = lambda k, shape, s: s * jax.random.normal(k, shape, dtype=jnp.float32)
    # TODO(synk): SelfAttention / CrossAttention weights exist in __init__ but
    # their forward results are discarded, so they are not materialized here.
    return {
        "gn_w": 1.0 + 0.1 * nrm(ks[0], (C,), 1.0),
        "gn_b": 0.1 * nrm(ks[1], (C,), 1.0),
        "conv_in_w": nrm(ks[2], (C, C, 1, 1), 1.0 / math.sqrt(C)),
        "conv_in_b": 0.1 * nrm(ks[3], (C,), 1.0),
        "ln1_w": 1.0 + 0.1 * nrm(ks[4], (C,), 1.0),
        "ln1_b": 0.1 * nrm(ks[5], (C,), 1.0),
        "ln2_w": 1.0 + 0.1 * nrm(ks[6], (C,), 1.0),
        "ln2_b": 0.1 * nrm(ks[7], (C,), 1.0),
        "ln3_w": 1.0 + 0.1 * nrm(ks[8], (C,), 1.0),
        "ln3_b": 0.1 * nrm(ks[9], (C,), 1.0),
        "geglu1_w": nrm(ks[10], (8 * C, C), 1.0 / math.sqrt(C)),
        "geglu1_b": 0.1 * nrm(ks[11], (8 * C,), 1.0),
        "geglu2_w": nrm(ks[12], (C, 4 * C), 1.0 / math.sqrt(4 * C)),
        "geglu2_b": 0.1 * nrm(ks[13], (C,), 1.0),
        "conv_out_w": nrm(ks[14], (C, C, 1, 1), 1.0 / math.sqrt(C)),
        "conv_out_b": 0.1 * nrm(ks[15], (C,), 1.0),
    }


def _bf16_round(a):
    """Round-to-nearest-even bf16 quantization (matches in-kernel .astype)."""
    return np.asarray(
        jnp.asarray(np.asarray(a, np.float32)).astype(jnp.bfloat16).astype(jnp.float32))


def reference_forward(x, context, p, round_fn=None):
    """NumPy float64 reference mirroring the PyTorch forward exactly.

    `round_fn`, if given, is applied to every matmul operand to model the
    kernel's bf16 MXU inputs (element-wise / norm math stays high precision,
    matching the kernel's f32 path)."""
    del context
    q = (lambda a: a) if round_fn is None else round_fn
    x = np.asarray(x, np.float64)
    n, c, h, w = x.shape
    xg_ = x.reshape(n, 32, c // 32, h, w)
    mu = xg_.mean(axis=(2, 3, 4), keepdims=True)
    var = ((xg_ - mu) ** 2).mean(axis=(2, 3, 4), keepdims=True)
    xn = ((xg_ - mu) / np.sqrt(var + 1e-6)).reshape(n, c, h, w)
    xn = xn * p["gn_w"][None, :, None, None] + p["gn_b"][None, :, None, None]
    y = (np.einsum("oc,nchw->nohw", q(p["conv_in_w"][:, :, 0, 0]), q(xn))
         + p["conv_in_b"][None, :, None, None])
    x0 = y.reshape(n, c, h * w).transpose(0, 2, 1)

    def ln(v, wt, b):
        m = v.mean(-1, keepdims=True)
        d = v - m
        va = (d * d).mean(-1, keepdims=True)
        return d / np.sqrt(va + 1e-5) * wt + b

    x1 = ln(x0, p["ln1_w"], p["ln1_b"]) + x0
    x2 = ln(x1, p["ln2_w"], p["ln2_b"]) + x0
    r = x2
    x3 = ln(x2, p["ln3_w"], p["ln3_b"])
    h12 = q(x3) @ q(p["geglu1_w"]).T + p["geglu1_b"]
    a, gate = np.split(h12, 2, axis=-1)
    erf = np.vectorize(math.erf)
    gelu = 0.5 * gate * (1.0 + erf(gate * _SQRT_HALF))
    hg = a * gelu
    x4 = q(hg) @ q(p["geglu2_w"]).T + p["geglu2_b"] + r
    xo = x4.transpose(0, 2, 1).reshape(n, c, h, w)
    out = (np.einsum("oc,nchw->nohw", q(p["conv_out_w"][:, :, 0, 0]), q(xo))
           + p["conv_out_b"][None, :, None, None] + x)
    return out


if __name__ == "__main__":
    n_head, n_embd = 4, 8            # channels = 32 (must be a multiple of 32 for GroupNorm)
    batch, height, width = 2, 16, 16
    seq, d_context = 8, 64

    key = jax.random.PRNGKey(0)
    kx, kc, kp = jax.random.split(key, 3)
    params = init_params(kp, n_head, n_embd)
    x = jax.random.normal(kx, (batch, n_head * n_embd, height, width), dtype=jnp.float32)
    context = jax.random.normal(kc, (batch, seq, d_context), dtype=jnp.float32)

    # tile_hw=128 -> grid (N=2, T=2): exercises the tiled GroupNorm reduction
    # and the parallel HW tiling on the small test shapes.
    out = unet_attention_block(x, context, params, tile_hw=128)
    out = jax.block_until_ready(out)
    out_np = np.asarray(out)

    np_params = {k: np.asarray(v) for k, v in params.items()}
    # Reference with matmul operands quantized to bf16 exactly as the kernel
    # feeds the MXU; remaining differences are only accumulation-order level,
    # so the tolerance can be tight (vs. 5e-2 previously for pure f32).
    ref = reference_forward(np.asarray(x), np.asarray(context), np_params,
                            round_fn=_bf16_round)
    diff = np.max(np.abs(out_np - ref))
    if not np.allclose(out_np, ref, atol=1e-2, rtol=1e-2):
        raise AssertionError(
            f"Pallas output mismatch vs bf16-matmul reference (max abs diff {diff})")
    print("KERNEL_OK")
</pallas_src>

<mosaic_0001>
module attributes {stable_mosaic.version = 11 : i64} {
  func.func @_gn_stats_kernel(%arg0: i32, %arg1: i32, %arg2: memref<1x128x32xf32, #tpu.memory_space<vmem>>, %arg3: memref<1x32xf32, #tpu.memory_space<vmem>>, %arg4: memref<1x32xf32, #tpu.memory_space<vmem>>, %arg5: memref<32x32xf32, #tpu.memory_space<vmem>>, %arg6: memref<32x32xf32, #tpu.memory_space<vmem>>, %arg7: memref<1x2x32xf32, #tpu.memory_space<vmem>>) attributes {dimension_semantics = [#tpu.dimension_semantics<parallel>, #tpu.dimension_semantics<arbitrary>], iteration_bounds = array<i64: 2, 2>, scalar_prefetch = 0 : i64, scratch_operands = 0 : i64, tpu.core_type = #tpu.core_type<tc>, window_params = [{transform_indices = @transform_0, window_bounds = array<i64: 1, 128, 32>}, {pipeline_mode = #tpu.pipeline_mode<synchronous>, transform_indices = @transform_1, window_bounds = array<i64: 1, 32>}, {pipeline_mode = #tpu.pipeline_mode<synchronous>, transform_indices = @transform_2, window_bounds = array<i64: 1, 32>}, {pipeline_mode = #tpu.pipeline_mode<synchronous>, transform_indices = @transform_3, window_bounds = array<i64: 32, 32>}, {pipeline_mode = #tpu.pipeline_mode<synchronous>, transform_indices = @transform_4, window_bounds = array<i64: 32, 32>}, {transform_indices = @transform_5, window_bounds = array<i64: 1, 2, 32>}]} {
    %c0_i32 = arith.constant 0 : i32
    %0 = arith.cmpi eq, %arg1, %c0_i32 : i32
    %1 = arith.extui %0 : i1 to i32
    %c0_i32_0 = arith.constant 0 : i32
    %2 = arith.cmpi ne, %1, %c0_i32_0 : i32
    scf.if %2 {
      %cst_11 = arith.constant 0.000000e+00 : f32
      %20 = vector.broadcast %cst_11 : f32 to vector<2x32xf32>
      %c0_12 = arith.constant 0 : index
      %c0_13 = arith.constant 0 : index
      %c0_14 = arith.constant 0 : index
      %21 = vector.load %arg7[%c0_12, %c0_13, %c0_14] : memref<1x2x32xf32, #tpu.memory_space<vmem>>, vector<1x2x32xf32>
      %22 = vector.shape_cast %21 : vector<1x2x32xf32> to vector<2x32xf32>
      %23 = vector.shape_cast %20 : vector<2x32xf32> to vector<1x2x32xf32>
      tpu.vector_store %arg7[%c0_12, %c0_13, %c0_14], %23 {strides = array<i32>} : memref<1x2x32xf32, #tpu.memory_space<vmem>>, vector<1x2x32xf32>,
    } else {
    }
    %c0 = arith.constant 0 : index
    %c0_1 = arith.constant 0 : index
    %c0_2 = arith.constant 0 : index
    %3 = vector.load %arg2[%c0, %c0_1, %c0_2] : memref<1x128x32xf32, #tpu.memory_space<vmem>>, vector<1x128x32xf32>
    %4 = vector.shape_cast %3 : vector<1x128x32xf32> to vector<128x32xf32>
    %cst = arith.constant dense<0.000000e+00> : vector<32xf32>
    %5 = vector.multi_reduction <add>, %4, %cst [0] : vector<128x32xf32> to vector<32xf32>
    %6 = vector.shape_cast %5 : vector<32xf32> to vector<1x32xf32>
    %7 = arith.mulf %4, %4 : vector<128x32xf32>
    %cst_3 = arith.constant dense<0.000000e+00> : vector<32xf32>
    %8 = vector.multi_reduction <add>, %7, %cst_3 [0] : vector<128x32xf32> to vector<32xf32>
    %9 = vector.shape_cast %8 : vector<32xf32> to vector<1x32xf32>
    %10 = tpu.concatenate %6, %9 in 0 : vector<1x32xf32>, vector<1x32xf32> -> vector<2x32xf32>
    %c0_4 = arith.constant 0 : index
    %c0_5 = arith.constant 0 : index
    %c0_6 = arith.constant 0 : index
    %11 = vector.load %arg7[%c0_4, %c0_5, %c0_6] : memref<1x2x32xf32, #tpu.memory_space<vmem>>, vector<1x2x32xf32>
    %12 = vector.shape_cast %11 : vector<1x2x32xf32> to vector<2x32xf32>
    %13 = arith.addf %12, %10 : vector<2x32xf32>
    %c0_7 = arith.constant 0 : index
    %c0_8 = arith.constant 0 : index
    %c0_9 = arith.constant 0 : index
    %14 = vector.load %arg7[%c0_7, %c0_8, %c0_9] : memref<1x2x32xf32, #tpu.memory_space<vmem>>, vector<1x2x32xf32>
    %15 = vector.shape_cast %14 : vector<1x2x32xf32> to vector<2x32xf32>
    %16 = vector.shape_cast %13 : vector<2x32xf32> to vector<1x2x32xf32>
    tpu.vector_store %arg7[%c0_7, %c0_8, %c0_9], %16 {strides = array<i32>} : memref<1x2x32xf32, #tpu.memory_space<vmem>>, vector<1x2x32xf32>,
    %c1_i32 = arith.constant 1 : i32
    %17 = arith.cmpi eq, %arg1, %c1_i32 : i32
    %18 = arith.extui %17 : i1 to i32
    %c0_i32_10 = arith.constant 0 : i32
    %19 = arith.cmpi ne, %18, %c0_i32_10 : i32
    scf.if %19 {
      %c0_11 = arith.constant 0 : index
      %c0_12 = arith.constant 0 : index
      %c0_13 = arith.constant 0 : index
      %20 = vector.load %arg7[%c0_11, %c0_12, %c0_13] : memref<1x2x32xf32, #tpu.memory_space<vmem>>, vector<1x2x32xf32>
      %21 = vector.shape_cast %20 : vector<1x2x32xf32> to vector<2x32xf32>
      %c0_14 = arith.constant 0 : index
      %c0_15 = arith.constant 0 : index
      %22 = vector.load %arg5[%c0_14, %c0_15] : memref<32x32xf32, #tpu.memory_space<vmem>>, vector<32x32xf32>
      %cst_16 = arith.constant dense<0.000000e+00> : vector<2x32xf32>
      %23 = tpu.matmul %21, %22, %cst_16 {dimension_numbers = #tpu.dot_dimension_numbers<[1], [0], [0], [1], [0, 0, 1, 1], [], []>} : vector<2x32xf32>, vector<32x32xf32>, vector<2x32xf32> -> vector<2x32xf32>
      %c0_17 = arith.constant 0 : index
      %c0_18 = arith.constant 0 : index
      %24 = vector.load %arg6[%c0_17, %c0_18] : memref<32x32xf32, #tpu.memory_space<vmem>>, vector<32x32xf32>
      %cst_19 = arith.constant dense<0.000000e+00> : vector<2x32xf32>
      %25 = tpu.matmul %23, %24, %cst_19 {dimension_numbers = #tpu.dot_dimension_numbers<[1], [0], [0], [1], [0, 0, 1, 1], [], []>} : vector<2x32xf32>, vector<32x32xf32>, vector<2x32xf32> -> vector<2x32xf32>
      %26 = vector.extract_strided_slice %25 {offsets = [0, 0], sizes = [1, 32], strides = [1, 1]} : vector<2x32xf32> to vector<1x32xf32>
      %27 = vector.extract_strided_slice %25 {offsets = [1, 0], sizes = [1, 32], strides = [1, 1]} : vector<2x32xf32> to vector<1x32xf32>
      %28 = arith.mulf %26, %26 : vector<1x32xf32>
      %29 = arith.subf %27, %28 : vector<1x32xf32>
      %c0_20 = arith.constant 0 : index
      %c0_21 = arith.constant 0 : index
      %30 = vector.load %arg3[%c0_20, %c0_21] : memref<1x32xf32, #tpu.memory_space<vmem>>, vector<1x32xf32>
      %cst_22 = arith.constant 9.99999997E-7 : f32
      %31 = vector.broadcast %cst_22 : f32 to vector<1x32xf32>
      %32 = arith.addf %29, %31 : vector<1x32xf32>
      %33 = math.rsqrt %32 : vector<1x32xf32>
      %34 = arith.mulf %30, %33 : vector<1x32xf32>
      %c0_23 = arith.constant 0 : index
      %c0_24 = arith.constant 0 : index
      %35 = vector.load %arg4[%c0_23, %c0_24] : memref<1x32xf32, #tpu.memory_space<vmem>>, vector<1x32xf32>
      %36 = arith.mulf %26, %34 : vector<1x32xf32>
      %37 = arith.subf %35, %36 : vector<1x32xf32>
      %38 = tpu.concatenate %34, %37 in 0 : vector<1x32xf32>, vector<1x32xf32> -> vector<2x32xf32>
      %c0_25 = arith.constant 0 : index
      %c0_26 = arith.constant 0 : index
      %c0_27 = arith.constant 0 : index
      %39 = vector.load %arg7[%c0_25, %c0_26, %c0_27] : memref<1x2x32xf32, #tpu.memory_space<vmem>>, vector<1x2x32xf32>
      %40 = vector.shape_cast %39 : vector<1x2x32xf32> to vector<2x32xf32>
      %41 = vector.shape_cast %38 : vector<2x32xf32> to vector<1x2x32xf32>
      tpu.vector_store %arg7[%c0_25, %c0_26, %c0_27], %41 {strides = array<i32>} : memref<1x2x32xf32, #tpu.memory_space<vmem>>, vector<1x2x32xf32>,
    } else {
    }
    return
  }
  func.func @transform_0(%arg0: i32, %arg1: i32) -> (i32, i32, i32) {
    %c0_i32 = arith.constant 0 : i32
    %c0_i32_0 = arith.constant 0 : i32
    return %arg0, %arg1, %c0_i32 : i32, i32, i32
  }
  func.func @transform_1(%arg0: i32, %arg1: i32) -> (i32, i32) {
    %c0_i32 = arith.constant 0 : i32
    %c0_i32_0 = arith.constant 0 : i32
    %c0_i32_1 = arith.constant 0 : i32
    return %c0_i32, %c0_i32_0 : i32, i32
  }
  func.func @transform_2(%arg0: i32, %arg1: i32) -> (i32, i32) {
    %c0_i32 = arith.constant 0 : i32
    %c0_i32_0 = arith.constant 0 : i32
    %c0_i32_1 = arith.constant 0 : i32
    return %c0_i32, %c0_i32_0 : i32, i32
  }
  func.func @transform_3(%arg0: i32, %arg1: i32) -> (i32, i32) {
    %c0_i32 = arith.constant 0 : i32
    %c0_i32_0 = arith.constant 0 : i32
    %c0_i32_1 = arith.constant 0 : i32
    return %c0_i32, %c0_i32_0 : i32, i32
  }
  func.func @transform_4(%arg0: i32, %arg1: i32) -> (i32, i32) {
    %c0_i32 = arith.constant 0 : i32
    %c0_i32_0 = arith.constant 0 : i32
    %c0_i32_1 = arith.constant 0 : i32
    return %c0_i32, %c0_i32_0 : i32, i32
  }
  func.func @transform_5(%arg0: i32, %arg1: i32) -> (i32, i32, i32) {
    %c0_i32 = arith.constant 0 : i32
    %c0_i32_0 = arith.constant 0 : i32
    %c0_i32_1 = arith.constant 0 : i32
    return %arg0, %c0_i32, %c0_i32_0 : i32, i32, i32
  }
}

module attributes {stable_mosaic.version = 11 : i64} {
  func.func @_attn_block_kernel(%arg0: i32, %arg1: i32, %arg2: memref<1x128x32xf32, #tpu.memory_space<vmem>>, %arg3: memref<1x2x32xf32, #tpu.memory_space<vmem>>, %arg4: memref<9x32xf32, #tpu.memory_space<vmem>>, %arg5: memref<1x256xf32, #tpu.memory_space<vmem>>, %arg6: memref<32x32xbf16, #tpu.memory_space<vmem>>, %arg7: memref<32x256xbf16, #tpu.memory_space<vmem>>, %arg8: memref<128x32xbf16, #tpu.memory_space<vmem>>, %arg9: memref<32x32xbf16, #tpu.memory_space<vmem>>, %arg10: memref<1x128x32xf32, #tpu.memory_space<vmem>>) attributes {dimension_semantics = [#tpu.dimension_semantics<parallel>, #tpu.dimension_semantics<parallel>], iteration_bounds = array<i64: 2, 2>, scalar_prefetch = 0 : i64, scratch_operands = 0 : i64, tpu.core_type = #tpu.core_type<tc>, window_params = [{transform_indices = @transform_0, window_bounds = array<i64: 1, 128, 32>}, {transform_indices = @transform_1, window_bounds = array<i64: 1, 2, 32>}, {pipeline_mode = #tpu.pipeline_mode<synchronous>, transform_indices = @transform_2, window_bounds = array<i64: 9, 32>}, {pipeline_mode = #tpu.pipeline_mode<synchronous>, transform_indices = @transform_3, window_bounds = array<i64: 1, 256>}, {pipeline_mode = #tpu.pipeline_mode<synchronous>, transform_indices = @transform_4, window_bounds = array<i64: 32, 32>}, {pipeline_mode = #tpu.pipeline_mode<synchronous>, transform_indices = @transform_5, window_bounds = array<i64: 32, 256>}, {pipeline_mode = #tpu.pipeline_mode<synchronous>, transform_indices = @transform_6, window_bounds = array<i64: 128, 32>}, {pipeline_mode = #tpu.pipeline_mode<synchronous>, transform_indices = @transform_7, window_bounds = array<i64: 32, 32>}, {transform_indices = @transform_8, window_bounds = array<i64: 1, 128, 32>}]} {
    %c0 = arith.constant 0 : index
    %c0_0 = arith.constant 0 : index
    %c0_1 = arith.constant 0 : index
    %0 = vector.load %arg2[%c0, %c0_0, %c0_1] : memref<1x128x32xf32, #tpu.memory_space<vmem>>, vector<1x128x32xf32>
    %1 = vector.shape_cast %0 : vector<1x128x32xf32> to vector<128x32xf32>
    %c0_2 = arith.constant 0 : index
    %c0_3 = arith.constant 0 : index
    %c0_4 = arith.constant 0 : index
    %2 = vector.load %arg3[%c0_2, %c0_3, %c0_4] : memref<1x2x32xf32, #tpu.memory_space<vmem>>, vector<1x1x32xf32>
    %3 = vector.shape_cast %2 : vector<1x1x32xf32> to vector<1x32xf32>
    %c0_5 = arith.constant 0 : index
    %c1 = arith.constant 1 : index
    %c0_6 = arith.constant 0 : index
    %4 = vector.load %arg3[%c0_5, %c1, %c0_6] : memref<1x2x32xf32, #tpu.memory_space<vmem>>, vector<1x1x32xf32>
    %5 = vector.shape_cast %4 : vector<1x1x32xf32> to vector<1x32xf32>
    %6 = vector.broadcast %3 : vector<1x32xf32> to vector<128x32xf32>
    %7 = arith.mulf %1, %6 : vector<128x32xf32>
    %8 = vector.broadcast %5 : vector<1x32xf32> to vector<128x32xf32>
    %9 = arith.addf %7, %8 : vector<128x32xf32>
    %c0_7 = arith.constant 0 : index
    %c0_8 = arith.constant 0 : index
    %10 = vector.load %arg4[%c0_7, %c0_8] : memref<9x32xf32, #tpu.memory_space<vmem>>, vector<1x32xf32>
    %c1_9 = arith.constant 1 : index
    %c0_10 = arith.constant 0 : index
    %11 = vector.load %arg4[%c1_9, %c0_10] : memref<9x32xf32, #tpu.memory_space<vmem>>, vector<1x32xf32>
    %c2 = arith.constant 2 : index
    %c0_11 = arith.constant 0 : index
    %12 = vector.load %arg4[%c2, %c0_11] : memref<9x32xf32, #tpu.memory_space<vmem>>, vector<1x32xf32>
    %c3 = arith.constant 3 : index
    %c0_12 = arith.constant 0 : index
    %13 = vector.load %arg4[%c3, %c0_12] : memref<9x32xf32, #tpu.memory_space<vmem>>, vector<1x32xf32>
    %c4 = arith.constant 4 : index
    %c0_13 = arith.constant 0 : index
    %14 = vector.load %arg4[%c4, %c0_13] : memref<9x32xf32, #tpu.memory_space<vmem>>, vector<1x32xf32>
    %c5 = arith.constant 5 : index
    %c0_14 = arith.constant 0 : index
    %15 = vector.load %arg4[%c5, %c0_14] : memref<9x32xf32, #tpu.memory_space<vmem>>, vector<1x32xf32>
    %c6 = arith.constant 6 : index
    %c0_15 = arith.constant 0 : index
    %16 = vector.load %arg4[%c6, %c0_15] : memref<9x32xf32, #tpu.memory_space<vmem>>, vector<1x32xf32>
    %c7 = arith.constant 7 : index
    %c0_16 = arith.constant 0 : index
    %17 = vector.load %arg4[%c7, %c0_16] : memref<9x32xf32, #tpu.memory_space<vmem>>, vector<1x32xf32>
    %c8 = arith.constant 8 : index
    %c0_17 = arith.constant 0 : index
    %18 = vector.load %arg4[%c8, %c0_17] : memref<9x32xf32, #tpu.memory_space<vmem>>, vector<1x32xf32>
    %19 = arith.truncf %9 : vector<128x32xf32> to vector<128x32xbf16>
    %c0_18 = arith.constant 0 : index
    %c0_19 = arith.constant 0 : index
    %20 = vector.load %arg6[%c0_18, %c0_19] : memref<32x32xbf16, #tpu.memory_space<vmem>>, vector<32x32xbf16>
    %cst = arith.constant dense<0.000000e+00> : vector<128x32xf32>
    %21 = tpu.matmul %19, %20, %cst {dimension_numbers = #tpu.dot_dimension_numbers<[1], [0], [0], [1], [0, 0, 1, 1], [], []>} : vector<128x32xbf16>, vector<32x32xbf16>, vector<128x32xf32> -> vector<128x32xf32>
    %22 = vector.broadcast %10 : vector<1x32xf32> to vector<128x32xf32>
    %23 = arith.addf %21, %22 : vector<128x32xf32>
    %cst_20 = arith.constant dense<0.000000e+00> : vector<128xf32>
    %24 = vector.multi_reduction <add>, %23, %cst_20 [1] : vector<128x32xf32> to vector<128xf32>
    %25 = vector.shape_cast %24 : vector<128xf32> to vector<128x1xf32>
    %cst_21 = arith.constant 3.200000e+01 : f32
    %26 = vector.broadcast %cst_21 : f32 to vector<128x1xf32>
    %27 = arith.divf %25, %26 : vector<128x1xf32>
    %28 = vector.broadcast %27 : vector<128x1xf32> to vector<128x32xf32>
    %29 = arith.subf %23, %28 : vector<128x32xf32>
    %30 = arith.mulf %29, %29 : vector<128x32xf32>
    %cst_22 = arith.constant dense<0.000000e+00> : vector<128xf32>
    %31 = vector.multi_reduction <add>, %30, %cst_22 [1] : vector<128x32xf32> to vector<128xf32>
    %32 = vector.shape_cast %31 : vector<128xf32> to vector<128x1xf32>
    %cst_23 = arith.constant 3.200000e+01 : f32
    %33 = vector.broadcast %cst_23 : f32 to vector<128x1xf32>
    %34 = arith.divf %32, %33 : vector<128x1xf32>
    %cst_24 = arith.constant 9.99999974E-6 : f32
    %35 = vector.broadcast %cst_24 : f32 to vector<128x1xf32>
    %36 = arith.addf %34, %35 : vector<128x1xf32>
    %37 = math.rsqrt %36 : vector<128x1xf32>
    %38 = vector.broadcast %37 : vector<128x1xf32> to vector<128x32xf32>
    %39 = arith.mulf %29, %38 : vector<128x32xf32>
    %40 = vector.broadcast %11 : vector<1x32xf32> to vector<128x32xf32>
    %41 = arith.mulf %39, %40 : vector<128x32xf32>
    %42 = vector.broadcast %12 : vector<1x32xf32> to vector<128x32xf32>
    %43 = arith.addf %41, %42 : vector<128x32xf32>
    %44 = arith.addf %43, %23 : vector<128x32xf32>
    %cst_25 = arith.constant dense<0.000000e+00> : vector<128xf32>
    %45 = vector.multi_reduction <add>, %44, %cst_25 [1] : vector<128x32xf32> to vector<128xf32>
    %46 = vector.shape_cast %45 : vector<128xf32> to vector<128x1xf32>
    %cst_26 = arith.constant 3.200000e+01 : f32
    %47 = vector.broadcast %cst_26 : f32 to vector<128x1xf32>
    %48 = arith.divf %46, %47 : vector<128x1xf32>
    %49 = vector.broadcast %48 : vector<128x1xf32> to vector<128x32xf32>
    %50 = arith.subf %44, %49 : vector<128x32xf32>
    %51 = arith.mulf %50, %50 : vector<128x32xf32>
    %cst_27 = arith.constant dense<0.000000e+00> : vector<128xf32>
    %52 = vector.multi_reduction <add>, %51, %cst_27 [1] : vector<128x32xf32> to vector<128xf32>
    %53 = vector.shape_cast %52 : vector<128xf32> to vector<128x1xf32>
    %cst_28 = arith.constant 3.200000e+01 : f32
    %54 = vector.broadcast %cst_28 : f32 to vector<128x1xf32>
    %55 = arith.divf %53, %54 : vector<128x1xf32>
    %cst_29 = arith.constant 9.99999974E-6 : f32
    %56 = vector.broadcast %cst_29 : f32 to vector<128x1xf32>
    %57 = arith.addf %55, %56 : vector<128x1xf32>
    %58 = math.rsqrt %57 : vector<128x1xf32>
    %59 = vector.broadcast %58 : vector<128x1xf32> to vector<128x32xf32>
    %60 = arith.mulf %50, %59 : vector<128x32xf32>
    %61 = vector.broadcast %13 : vector<1x32xf32> to vector<128x32xf32>
    %62 = arith.mulf %60, %61 : vector<128x32xf32>
    %63 = vector.broadcast %14 : vector<1x32xf32> to vector<128x32xf32>
    %64 = arith.addf %62, %63 : vector<128x32xf32>
    %65 = arith.addf %64, %23 : vector<128x32xf32>
    %cst_30 = arith.constant dense<0.000000e+00> : vector<128xf32>
    %66 = vector.multi_reduction <add>, %65, %cst_30 [1] : vector<128x32xf32> to vector<128xf32>
    %67 = vector.shape_cast %66 : vector<128xf32> to vector<128x1xf32>
    %cst_31 = arith.constant 3.200000e+01 : f32
    %68 = vector.broadcast %cst_31 : f32 to vector<128x1xf32>
    %69 = arith.divf %67, %68 : vector<128x1xf32>
    %70 = vector.broadcast %69 : vector<128x1xf32> to vector<128x32xf32>
    %71 = arith.subf %65, %70 : vector<128x32xf32>
    %72 = arith.mulf %71, %71 : vector<128x32xf32>
    %cst_32 = arith.constant dense<0.000000e+00> : vector<128xf32>
    %73 = vector.multi_reduction <add>, %72, %cst_32 [1] : vector<128x32xf32> to vector<128xf32>
    %74 = vector.shape_cast %73 : vector<128xf32> to vector<128x1xf32>
    %cst_33 = arith.constant 3.200000e+01 : f32
    %75 = vector.broadcast %cst_33 : f32 to vector<128x1xf32>
    %76 = arith.divf %74, %75 : vector<128x1xf32>
    %cst_34 = arith.constant 9.99999974E-6 : f32
    %77 = vector.broadcast %cst_34 : f32 to vector<128x1xf32>
    %78 = arith.addf %76, %77 : vector<128x1xf32>
    %79 = math.rsqrt %78 : vector<128x1xf32>
    %80 = vector.broadcast %79 : vector<128x1xf32> to vector<128x32xf32>
    %81 = arith.mulf %71, %80 : vector<128x32xf32>
    %82 = vector.broadcast %15 : vector<1x32xf32> to vector<128x32xf32>
    %83 = arith.mulf %81, %82 : vector<128x32xf32>
    %84 = vector.broadcast %16 : vector<1x32xf32> to vector<128x32xf32>
    %85 = arith.addf %83, %84 : vector<128x32xf32>
    %86 = arith.truncf %85 : vector<128x32xf32> to vector<128x32xbf16>
    %c0_35 = arith.constant 0 : index
    %c0_36 = arith.constant 0 : index
    %87 = vector.load %arg7[%c0_35, %c0_36] : memref<32x256xbf16, #tpu.memory_space<vmem>>, vector<32x256xbf16>
    %cst_37 = arith.constant dense<0.000000e+00> : vector<128x256xf32>
    %88 = tpu.matmul %86, %87, %cst_37 {dimension_numbers = #tpu.dot_dimension_numbers<[1], [0], [0], [1], [0, 0, 1, 1], [], []>} : vector<128x32xbf16>, vector<32x256xbf16>, vector<128x256xf32> -> vector<128x256xf32>
    %c0_38 = arith.constant 0 : index
    %c0_39 = arith.constant 0 : index
    %89 = vector.load %arg5[%c0_38, %c0_39] : memref<1x256xf32, #tpu.memory_space<vmem>>, vector<1x256xf32>
    %90 = vector.broadcast %89 : vector<1x256xf32> to vector<128x256xf32>
    %91 = arith.addf %88, %90 : vector<128x256xf32>
    %92 = vector.extract_strided_slice %91 {offsets = [0, 0], sizes = [128, 128], strides = [1, 1]} : vector<128x256xf32> to vector<128x128xf32>
    %93 = vector.extract_strided_slice %91 {offsets = [0, 128], sizes = [128, 128], strides = [1, 1]} : vector<128x256xf32> to vector<128x128xf32>
    %cst_40 = arith.constant 5.000000e-01 : f32
    %94 = vector.broadcast %cst_40 : f32 to vector<128x128xf32>
    %95 = arith.mulf %94, %93 : vector<128x128xf32>
    %cst_41 = arith.constant 0.707106769 : f32
    %96 = vector.broadcast %cst_41 : f32 to vector<128x128xf32>
    %97 = arith.mulf %93, %96 : vector<128x128xf32>
    %98 = math.absf %97 : vector<128x128xf32>
    %cst_42 = arith.constant 0.327591091 : f32
    %99 = vector.broadcast %cst_42 : f32 to vector<128x128xf32>
    %100 = arith.mulf %99, %98 : vector<128x128xf32>
    %cst_43 = arith.constant 1.000000e+00 : f32
    %101 = vector.broadcast %cst_43 : f32 to vector<128x128xf32>
    %102 = arith.addf %101, %100 : vector<128x128xf32>
    %cst_44 = arith.constant 1.000000e+00 : f32
    %103 = vector.broadcast %cst_44 : f32 to vector<128x128xf32>
    %104 = arith.divf %103, %102 : vector<128x128xf32>
    %cst_45 = arith.constant 1.06140542 : f32
    %105 = vector.broadcast %cst_45 : f32 to vector<128x128xf32>
    %106 = arith.mulf %105, %104 : vector<128x128xf32>
    %cst_46 = arith.constant -1.45315206 : f32
    %107 = vector.broadcast %cst_46 : f32 to vector<128x128xf32>
    %108 = arith.addf %106, %107 : vector<128x128xf32>
    %109 = arith.mulf %108, %104 : vector<128x128xf32>
    %cst_47 = arith.constant 1.42141378 : f32
    %110 = vector.broadcast %cst_47 : f32 to vector<128x128xf32>
    %111 = arith.addf %109, %110 : vector<128x128xf32>
    %112 = arith.mulf %111, %104 : vector<128x128xf32>
    %cst_48 = arith.constant -0.284496725 : f32
    %113 = vector.broadcast %cst_48 : f32 to vector<128x128xf32>
    %114 = arith.addf %112, %113 : vector<128x128xf32>
    %115 = arith.mulf %114, %104 : vector<128x128xf32>
    %cst_49 = arith.constant 0.254829586 : f32
    %116 = vector.broadcast %cst_49 : f32 to vector<128x128xf32>
    %117 = arith.addf %115, %116 : vector<128x128xf32>
    %118 = arith.mulf %117, %104 : vector<128x128xf32>
    %cst_50 = arith.constant 0.000000e+00 : f32
    %119 = vector.broadcast %cst_50 : f32 to vector<128x128xf32>
    %120 = arith.subf %119, %98 : vector<128x128xf32>
    %121 = arith.mulf %120, %98 : vector<128x128xf32>
    %122 = math.exp %121 : vector<128x128xf32>
    %123 = arith.mulf %118, %122 : vector<128x128xf32>
    %cst_51 = arith.constant 1.000000e+00 : f32
    %124 = vector.broadcast %cst_51 : f32 to vector<128x128xf32>
    %125 = arith.subf %124, %123 : vector<128x128xf32>
    %cst_52 = arith.constant 0.000000e+00 : f32
    %126 = vector.broadcast %cst_52 : f32 to vector<128x128xf32>
    %127 = arith.cmpf oge, %97, %126 : vector<128x128xf32>
    %cst_53 = arith.constant 0.000000e+00 : f32
    %128 = vector.broadcast %cst_53 : f32 to vector<128x128xf32>
    %129 = arith.subf %128, %125 : vector<128x128xf32>
    %130 = arith.select %127, %125, %129 : vector<128x128xi1>, vector<128x128xf32>
    %cst_54 = arith.constant 1.000000e+00 : f32
    %131 = vector.broadcast %cst_54 : f32 to vector<128x128xf32>
    %132 = arith.addf %131, %130 : vector<128x128xf32>
    %133 = arith.mulf %95, %132 : vector<128x128xf32>
    %134 = arith.mulf %92, %133 : vector<128x128xf32>
    %135 = arith.truncf %134 : vector<128x128xf32> to vector<128x128xbf16>
    %c0_55 = arith.constant 0 : index
    %c0_56 = arith.constant 0 : index
    %136 = vector.load %arg8[%c0_55, %c0_56] : memref<128x32xbf16, #tpu.memory_space<vmem>>, vector<128x32xbf16>
    %cst_57 = arith.constant dense<0.000000e+00> : vector<128x32xf32>
    %137 = tpu.matmul %135, %136, %cst_57 {dimension_numbers = #tpu.dot_dimension_numbers<[1], [0], [0], [1], [0, 0, 1, 1], [], []>} : vector<128x128xbf16>, vector<128x32xbf16>, vector<128x32xf32> -> vector<128x32xf32>
    %138 = vector.broadcast %17 : vector<1x32xf32> to vector<128x32xf32>
    %139 = arith.addf %137, %138 : vector<128x32xf32>
    %140 = arith.addf %139, %65 : vector<128x32xf32>
    %141 = arith.truncf %140 : vector<128x32xf32> to vector<128x32xbf16>
    %c0_58 = arith.constant 0 : index
    %c0_59 = arith.constant 0 : index
    %142 = vector.load %arg9[%c0_58, %c0_59] : memref<32x32xbf16, #tpu.memory_space<vmem>>, vector<32x32xbf16>
    %cst_60 = arith.constant dense<0.000000e+00> : vector<128x32xf32>
    %143 = tpu.matmul %141, %142, %cst_60 {dimension_numbers = #tpu.dot_dimension_numbers<[1], [0], [0], [1], [0, 0, 1, 1], [], []>} : vector<128x32xbf16>, vector<32x32xbf16>, vector<128x32xf32> -> vector<128x32xf32>
    %144 = vector.broadcast %18 : vector<1x32xf32> to vector<128x32xf32>
    %145 = arith.addf %143, %144 : vector<128x32xf32>
    %146 = arith.addf %145, %1 : vector<128x32xf32>
    %c0_61 = arith.constant 0 : index
    %c0_62 = arith.constant 0 : index
    %c0_63 = arith.constant 0 : index
    %147 = vector.load %arg10[%c0_61, %c0_62, %c0_63] : memref<1x128x32xf32, #tpu.memory_space<vmem>>, vector<1x128x32xf32>
    %148 = vector.shape_cast %147 : vector<1x128x32xf32> to vector<128x32xf32>
    %149 = vector.shape_cast %146 : vector<128x32xf32> to vector<1x128x32xf32>
    tpu.vector_store %arg10[%c0_61, %c0_62, %c0_63], %149 {strides = array<i32>} : memref<1x128x32xf32, #tpu.memory_space<vmem>>, vector<1x128x32xf32>,
    return
  }
  func.func @transform_0(%arg0: i32, %arg1: i32) -> (i32, i32, i32) {
    %c0_i32 = arith.constant 0 : i32
    %c0_i32_0 = arith.constant 0 : i32
    return %arg0, %arg1, %c0_i32 : i32, i32, i32
  }
  func.func @transform_1(%arg0: i32, %arg1: i32) -> (i32, i32, i32) {
    %c0_i32 = arith.constant 0 : i32
    %c0_i32_0 = arith.constant 0 : i32
    %c0_i32_1 = arith.constant 0 : i32
    return %arg0, %c0_i32, %c0_i32_0 : i32, i32, i32
  }
  func.func @transform_2(%arg0: i32, %arg1: i32) -> (i32, i32) {
    %c0_i32 = arith.constant 0 : i32
    %c0_i32_0 = arith.constant 0 : i32
    %c0_i32_1 = arith.constant 0 : i32
    return %c0_i32, %c0_i32_0 : i32, i32
  }
  func.func @transform_3(%arg0: i32, %arg1: i32) -> (i32, i32) {
    %c0_i32 = arith.constant 0 : i32
    %c0_i32_0 = arith.constant 0 : i32
    %c0_i32_1 = arith.constant 0 : i32
    return %c0_i32, %c0_i32_0 : i32, i32
  }
  func.func @transform_4(%arg0: i32, %arg1: i32) -> (i32, i32) {
    %c0_i32 = arith.constant 0 : i32
    %c0_i32_0 = arith.constant 0 : i32
    %c0_i32_1 = arith.constant 0 : i32
    return %c0_i32, %c0_i32_0 : i32, i32
  }
  func.func @transform_5(%arg0: i32, %arg1: i32) -> (i32, i32) {
    %c0_i32 = arith.constant 0 : i32
    %c0_i32_0 = arith.constant 0 : i32
    %c0_i32_1 = arith.constant 0 : i32
    return %c0_i32, %c0_i32_0 : i32, i32
  }
  func.func @transform_6(%arg0: i32, %arg1: i32) -> (i32, i32) {
    %c0_i32 = arith.constant 0 : i32
    %c0_i32_0 = arith.constant 0 : i32
    %c0_i32_1 = arith.constant 0 : i32
    return %c0_i32, %c0_i32_0 : i32, i32
  }
  func.func @transform_7(%arg0: i32, %arg1: i32) -> (i32, i32) {
    %c0_i32 = arith.constant 0 : i32
    %c0_i32_0 = arith.constant 0 : i32
    %c0_i32_1 = arith.constant 0 : i32
    return %c0_i32, %c0_i32_0 : i32, i32
  }
  func.func @transform_8(%arg0: i32, %arg1: i32) -> (i32, i32, i32) {
    %c0_i32 = arith.constant 0 : i32
    %c0_i32_0 = arith.constant 0 : i32
    return %arg0, %arg1, %c0_i32 : i32, i32, i32
  }
}

</mosaic_0001>

<bundles_post_ra>
// kernel: unet_attention_block.2
= control target key start
LH: loop header
LB: loop body
LE: loop exit
PB: predicated region body
PF: predicated region fallthrough
CT: control target
= control target key end

     0   :  { %10 = vsyncpa [#allocation3], 0  ;;  %s1177_s0 = inlined_call_operand.hbm [shape: f32[2,256,32], index: 0, kind: input, shape index: {}]   ;;  %s1178_s1 = inlined_call_operand.vmem [shape: f32[1,32], index: 1, kind: input, shape index: {}]   ;;  %s1179_s2 = inlined_call_operand.vmem [shape: f32[1,32], index: 2, kind: input, shape index: {}]   ;;  %s1180_s3 = inlined_call_operand.vmem [shape: f32[32,32], index: 3, kind: input, shape index: {}]   ;;  %s1181_s4 = inlined_call_operand.vmem [shape: f32[32,32], index: 4, kind: input, shape index: {}]   ;;  %s1182_s5 = inlined_call_operand.vmem [shape: f32[2,2,32], index: 5, kind: output, shape index: {}]  }
   0x1   :  { %12 = vsyncpa [#allocation3 + $0x1], 0  ;;  %s931_s18 = smov 0   ;;  %s933_s19 = smov 0  }
   0x2   :  { %s935_s20 = smov 0   ;;  %s937_s21 = smov 0  }
   0x3   :  { %s939_s22 = smov 0   ;;  %s941_s23 = smov 0  }
   0x4   :  { %s943_s24 = smov 0   ;;  %s945_s25 = smov 0  }
   0x5 LB: > { %s654_s26 = sadd.s32 4294967295, %s891_s25   ;;  %s27_s27 = sadd.s32 1, %s883_s23  ;;  %s891_s25 = sphi %s945_s25, %s18_s25   ;;  %s887_s24 = sphi %s943_s24, %s1199_s24   ;;  %s883_s23 = sphi %s941_s23, %s1198_s23   ;;  %s879_s22 = sphi %s939_s22, %s1197_s22   ;;  %s875_s21 = sphi %s937_s21, %s1196_s21   ;;  %s871_s20 = sphi %s935_s20, %s1195_s20   ;;  %s867_s19 = sphi %s933_s19, %s1194_s19   ;;  %s863_s18 = sphi %s931_s18, %s1193_s18  }
   0x6   : > { %p28_p0 = scmp.ge.s32.totalorder %s27_s27, 2  ;;  %s30_s28 = sadd.s32 1, %s887_s24 }
   0x7   : > { %s39_s29 = sadd.s32 1, %s871_s20  ;;  %p46_p1 = scmp.ne.s32.totalorder %s871_s20, %s867_s19 }
   0x8   : > { %s1201_s27 = smov (%p28_p0, %s27_s27), 0  ;;  %s1203_s28 = smov (!%p28_p0, %s30_s28), %s887_s24 }
   0x9   : > { %1185 = sst [smem:[#allocation5_spill]] %s1201_s27  ;;  %s35_s30 = ssub.s32 %s883_s23, %s1201_s27 }
   0xa   : > { %p47_p2 = scmp.eq.s32.totalorder %s891_s25, 0  ;;  %p32_p3 = scmp.ge.s32.totalorder %s1203_s28, 2 }
   0xb   : > { %p52_p4 = scmp.ne.s32.totalorder %s867_s19, %s863_s18  ;;  %p53_p6 = scmp.eq.s32.totalorder %s654_s26, 0 }
   0xc   : > { %p982_p5 = por %p47_p2, %p46_p1  ;;  %s1205_s28 = smov (%p32_p3, %s1203_s28), 0 }
   0xd   : > { %1187 = sst [smem:[#allocation6_spill]] %s1205_s28  ;;  %p988_p7 = por %p53_p6, %p52_p4 }
   0xe   : > { %s34_s8 = ssub.s32 %s887_s24, %s1205_s28  ;;  %p721_p8 = scmp.lt.s32.totalorder %s891_s25, 4 }
   0xf   : > { %s36_s9 = sor.u32 %s35_s30, %s34_s8  ;;  %s198_s10 = sand.u32 1, %s871_s20  }
  0x10   : > { %p37_p9 = scmp.eq.s32.totalorder %s36_s9, 0  ;;  %s658_s11 = sshll.u32 %s198_s10, 7 }
  0x11   : > { %s659_s12 = sshll.u32 %s883_s23, 4  ;;  %s660_s14 = sshll.u32 %s887_s24, 5 }
  0x12   : > { %s998_s13 = scalar_select %p37_p9, %s871_s20, %s39_s29  }
  0x13   : > { %s208_s15 = sadd.s32 %s660_s14, %s659_s12  ;;  %s202_s16 = scalar_lea.vmem [#allocation2], %s658_s11 }
  0x14   : > { %s211_s17 = sshll.u32 %s202_s16, 4  ;;  %s661_s18 = sshll.u32 %s208_s15, 7  ;;  %s1001_s17 = int_to_ptr.vmem [resolvable:$true] %s211_s17 }
  0x15   : > { %s1006_s28 = scalar_lea.hbm %s1177_s0, %s661_s18  ;;  %p1012_p10 = pnand %p721_p8, %p982_p5 }
  0x16   : > { %s1017_s30 = scalar_lea.sflag [#allocation3], %s198_s10  ;;  %s795_s8 = scalar_lea.hbm %s1006_s28, 2048 }
  0x17   : > { %p796_p12 = scmp.ne.s32.totalorder %s1006_s28, %s795_s8  ;;  %p797_p13 = pneg %p1012_p10 }
  0x18   : > { %s800_s9 = scalar_lea.hbm %s1177_s0, 8192  ;;  %p801_p2 = scmp.lt.u32.totalorder %s1006_s28, %s1177_s0 }
  0x19   : > { %p798_p0 = pnand %p797_p13, %p796_p12  ;;  %p802_p3 = scmp.lt.u32.totalorder %s800_s9, %s795_s8 }
  0x1a   : > { %p804_p5 = scmp.lt.u32.totalorder %s795_s8, %s1006_s28 }
  0x1b   : > { %p799_p1 = pneg %p798_p0  ;;  %p803_p4 = por %p802_p3, %p801_p2 }
  0x1d   : > { %p805_p6 = por %p804_p5, %p803_p4 }
  0x1f   : > { %p806_p8 = pnand %p805_p6, %p799_p1 }
  0x21   : > { %809 = shalt.err (!%p806_p8)
}
  0x22   : > { %s810_s10 = scalar_lea.vmem %s1001_s17, 2048  ;;  %s893_s14 = smov [#allocation2]  }
  0x23   : > { %p811_p9 = scmp.ne.s32.totalorder %s1001_s17, %s810_s10  ;;  %s815_s15 = sshll.u32 %s893_s14, 4  ;;  %s816_s15 = int_to_ptr.vmem [resolvable:$false] %s815_s15 }
  0x24   : > { %s817_s16 = scalar_lea.vmem %s816_s15, 4096  ;;  %p818_p11 = scmp.lt.s32.totalorder %s1001_s17, %s816_s15 }
  0x25   : > { %p813_p12 = pnand %p811_p9, %p797_p13  ;;  %p819_p2 = scmp.lt.s32.totalorder %s817_s16, %s810_s10 }
  0x27   : > { %p814_p0 = pneg %p813_p12  ;;  %p820_p3 = por %p819_p2, %p818_p11 }
  0x29   : > { %p821_p4 = pnand %p820_p3, %p814_p0 }
  0x2b   : > { %824 = shalt.err (!%p821_p4)
}
  0x2c   : > { %s894_s18 = smov 128   ;;  %s895_s26 = smov 8  }
  0x2d   : > { %720 = dma.hbm_to_vmem [thread:$0]  (!%p1012_p10), %s1006_s28, 2048, %s1001_s17, %s1017_s30, %s894_s18, %s894_s18, %s895_s26  }
  0x2e   : > { %p219_p13 = scmp.lt.s32.totalorder %s891_s25, 5  ;;  %p1190_p1 = scmp.ge.s32.totalorder %s891_s25, 1 }
  0x30   : > { %p220_p5 = pnand %p1190_p1, %p219_p13 }
  0x31   : > { %s225_s8 = sand.u32 (!%p220_p5), 1, %s867_s19  }
  0x32   : > { %223 = sbr.rel (%p220_p5) target bundleno = 584 (0x248), region = 40  ;;  %s663_s27 = sshll.u32 (!%p220_p5), %s225_s8, 7 }
  0x33   : > { %s226_s6 = scalar_lea.sflag (!%p220_p5), [#allocation3], %s225_s8  ;;  %s1049_s9 = scalar_lea.vmem (!%p220_p5), [#allocation2], %s663_s27 }
  0x39   : > { %858 = dma.done.wait (%p988_p7), %s226_s6, 2048  }
  0x3a   : > { %860 = vsyncadd (%p988_p7), %s226_s6, 4294965248  ;;  %p256_p11 = scmp.lt.s32.totalorder %s879_s22, 1  ;;  %p665_p10 = scmp.ne.s32.totalorder %s875_s21, 0 }
  0x3b   : > { %vm264_vm0 = vcmask (!%p665_p10), 254976   ;;  %v896_v0 = vmov (!%p665_p10), 0.0  }
  0x3c   : > { %s1207_s22 = smov (!%p256_p11, %s879_s22), 1  ;;  %263 = sbr.rel (%p665_p10) target bundleno = 67 (0x43), region = 48 }
  0x3d   : > { %s664_s28 = sshll.u32 %s1207_s22, 1 }
  0x3e   : > { %s1060_s30 = scalar_lea.vmem %s1182_s5, %s664_s28 }
  0x3f   : > { %265 = vst.msk [vmem:[%s1060_s30] sm:$0x3] (!%p665_p10), %vm264_vm0, %v896_v0 }
  0x43 PF: > { %v266_v1 = vld [vmem:[%s1049_s9] sm:$0xff]  ;;  %v267_v2 = vld [vmem:[%s1049_s9 + $0x8] sm:$0xff]  ;;  %v268_v3 = vld [vmem:[%s1049_s9 + $0x10] sm:$0xff]  ;;  %vm282_vm1 = vcmask 261120   ;;  %vm373_vm2 = vcmask 1040384   ;;  %vm377_vm3 = vcmask 254976  }
  0x44   : > { %v283_v4 = vsel %vm282_vm1, %v266_v1, 0.0  ;;  %v284_v5 = vsel %vm282_vm1, %v267_v2, 0.0  ;;  %v286_v6 = vsel %vm282_vm1, %v268_v3, 0.0  ;;  %v269_v7 = vld [vmem:[%s1049_s9 + $0x18] sm:$0xff]  ;;  %v270_v10 = vld [vmem:[%s1049_s9 + $0x20] sm:$0xff]  ;;  %v271_v13 = vld [vmem:[%s1049_s9 + $0x28] sm:$0xff]  ;;  %v320_v15 = vmul.f32 %v266_v1, %v266_v1 }
  0x45   : > { %v285_v8 = vadd.f32 %v284_v5, %v283_v4  ;;  %v288_v9 = vsel %vm282_vm1, %v269_v7, 0.0  ;;  %v290_v12 = vsel %vm282_vm1, %v270_v10, 0.0  ;;  %v321_v16 = vmul.f32 %v267_v2, %v267_v2  ;;  %v272_v19 = vld [vmem:[%s1049_s9 + $0x30] sm:$0xff]  ;;  %v273_v24 = vld [vmem:[%s1049_s9 + $0x38] sm:$0xff]  ;;  %v274_v31 = vld [vmem:[%s1049_s9 + $0x40] sm:$0xff]  ;;  %p666_p7 = scmp.ne.s32.totalorder %s875_s21, 1 }
  0x46   : > { %v322_v17 = vmul.f32 %v268_v3, %v268_v3  ;;  %v292_v18 = vsel %vm282_vm1, %v271_v13, 0.0  ;;  %v323_v21 = vmul.f32 %v269_v7, %v269_v7  ;;  %v294_v22 = vsel %vm282_vm1, %v272_v19, 0.0  ;;  %v275_v37 = vld [vmem:[%s1049_s9 + $0x48] sm:$0xff]  ;;  %v276_v43 = vld [vmem:[%s1049_s9 + $0x50] sm:$0xff]  ;;  %v277_v49 = vld [vmem:[%s1049_s9 + $0x58] sm:$0xff] }
  0x47   : > { %v287_v11 = vadd.f32 %v286_v6, %v285_v8  ;;  %v324_v23 = vmul.f32 %v270_v10, %v270_v10  ;;  %v336_v26 = vsel %vm282_vm1, %v320_v15, 0.0  ;;  %v337_v27 = vsel %vm282_vm1, %v321_v16, 0.0  ;;  %v278_v55 = vld [vmem:[%s1049_s9 + $0x60] sm:$0xff]  ;;  %v279_v61 = vld [vmem:[%s1049_s9 + $0x68] sm:$0xff]  ;;  %v280_v3 = vld [vmem:[%s1049_s9 + $0x70] sm:$0xff] }
  0x48   : > { %v339_v28 = vsel %vm282_vm1, %v322_v17, 0.0  ;;  %v296_v29 = vsel %vm282_vm1, %v273_v24, 0.0  ;;  %v338_v30 = vadd.f32 %v337_v27, %v336_v26  ;;  %v325_v33 = vmul.f32 %v271_v13, %v271_v13 }
  0x49   : > { %v289_v14 = vadd.f32 %v288_v9, %v287_v11  ;;  %v341_v34 = vsel %vm282_vm1, %v323_v21, 0.0  ;;  %v298_v35 = vsel %vm282_vm1, %v274_v31, 0.0  ;;  %v326_v39 = vmul.f32 %v272_v19, %v272_v19  ;;  %v281_v9 = vld [vmem:[%s1049_s9 + $0x78] sm:$0xff] }
  0x4a   : > { %v340_v36 = vadd.f32 %v339_v28, %v338_v30  ;;  %v343_v40 = vsel %vm282_vm1, %v324_v23, 0.0  ;;  %v300_v41 = vsel %vm282_vm1, %v275_v37, 0.0  ;;  %v327_v45 = vmul.f32 %v273_v24, %v273_v24 }
  0x4b   : > { %v291_v20 = vadd.f32 %v290_v12, %v289_v14  ;;  %v345_v46 = vsel %vm282_vm1, %v325_v33, 0.0  ;;  %v302_v47 = vsel %vm282_vm1, %v276_v43, 0.0  ;;  %v328_v51 = vmul.f32 %v274_v31, %v274_v31 }
  0x4c   : > { %v342_v42 = vadd.f32 %v341_v34, %v340_v36  ;;  %v347_v52 = vsel %vm282_vm1, %v326_v39, 0.0  ;;  %v304_v53 = vsel %vm282_vm1, %v277_v49, 0.0  ;;  %v329_v57 = vmul.f32 %v275_v37, %v275_v37 }
  0x4d   : > { %v293_v25 = vadd.f32 %v292_v18, %v291_v20  ;;  %v349_v58 = vsel %vm282_vm1, %v327_v45, 0.0  ;;  %v306_v59 = vsel %vm282_vm1, %v278_v55, 0.0  ;;  %v330_v63 = vmul.f32 %v276_v43, %v276_v43  ;;  %v375_v43 = vld [vmem:[%s1060_s30] sm:$0x3] }
  0x4e   : > { %v344_v48 = vadd.f32 %v343_v40, %v342_v42  ;;  %v351_v0 = vsel %vm282_vm1, %v328_v51, 0.0  ;;  %v308_v1 = vsel %vm282_vm1, %v279_v61, 0.0  ;;  %v331_v5 = vmul.f32 %v277_v49, %v277_v49  ;;  %v387_v51 = vld [vmem:[%s1180_s3 + $0x18] sm:$0xff] (!%p666_p7) }
  0x4f   : > { %v295_v32 = vadd.f32 %v294_v22, %v293_v25  ;;  %v353_v6 = vsel %vm282_vm1, %v329_v57, 0.0  ;;  %v310_v7 = vsel %vm282_vm1, %v280_v3, 0.0  ;;  %v332_v11 = vmul.f32 %v278_v55, %v278_v55  ;;  %v463_v55 = vld [vmem:[%s1181_s4 + $0x10] sm:$0xff] (!%p666_p7) }
  0x50   : > { %v346_v54 = vadd.f32 %v345_v46, %v344_v48  ;;  %v355_v12 = vsel %vm282_vm1, %v330_v63, 0.0  ;;  %v312_v13 = vsel %vm282_vm1, %v281_v9, 0.0  ;;  %v333_v16 = vmul.f32 %v279_v61, %v279_v61  ;;  %v384_v46 = vld [vmem:[%s1180_s3] sm:$0xff] (!%p666_p7)  ;;  %v386_v48 = vld [vmem:[%s1180_s3 + $0x10] sm:$0xff] (!%p666_p7) }
  0x51   : > { %v297_v38 = vadd.f32 %v296_v29, %v295_v32  ;;  %v357_v17 = vsel %vm282_vm1, %v331_v5, 0.0  ;;  %v334_v20 = vmul.f32 %v280_v3, %v280_v3  ;;  %v359_v21 = vsel %vm282_vm1, %v332_v11, 0.0 }
  0x52   : > { %v348_v60 = vadd.f32 %v347_v52, %v346_v54  ;;  %v335_v24 = vmul.f32 %v281_v9, %v281_v9  ;;  %v361_v25 = vsel %vm282_vm1, %v333_v16, 0.0  ;;  %v897_v49 = vmov (!%p666_p7), 0.0|0.0   ;;  %v462_v54 = vld [vmem:[%s1181_s4 + $0x8] sm:$0xff] (!%p666_p7) }
  0x53   : > { %v299_v44 = vadd.f32 %v298_v35, %v297_v38  ;;  %v363_v28 = vsel %vm282_vm1, %v334_v20, 0.0  ;;  %703 = vmatprep.subr.bf16.mxu0 (!%p666_p7), %v897_v49  ;;  %vm898_vm4 = vmmov (!%p666_p7), 0   ;;  %v899_v52 = vmov (!%p666_p7), 0.0   ;;  %709 = vmatprep.subr.bf16.mxu1 (!%p666_p7), %v897_v49 }
  0x54   : > { %v350_v2 = vadd.f32 %v349_v58, %v348_v60  ;;  %v365_v30 = vsel %vm282_vm1, %v335_v24, 0.0  ;;  %689 = vmatprep.mubr.msk.f32.mxu0 (!%p666_p7), %vm898_vm4, %v899_v52  ;;  %700 = vmatprep.mubr.msk.f32.mxu1 (!%p666_p7), %vm898_vm4, %v899_v52  ;;  %v707_v57 = vpack.c.bf16 (!%p666_p7), %v387_v51, %v386_v48  ;;  %v900_v5 = vmov (!%p666_p7), 1966171168  }
  0x55   : > { %v301_v50 = vadd.f32 %v300_v41, %v299_v44 }
  0x56   : > { %v352_v8 = vadd.f32 %v351_v0, %v350_v2 }
  0x57   : > { %v303_v56 = vadd.f32 %v302_v47, %v301_v50  ;;  %v385_v47 = vld [vmem:[%s1180_s3 + $0x8] sm:$0xff] (!%p666_p7) }
  0x58   : > { %v354_v14 = vadd.f32 %v353_v6, %v352_v8  ;;  %v704_v50 = vpack.c.bf16 (!%p666_p7), %v385_v47, %v384_v46  ;;  %v548_v6 = vunpack.c.l.s4 (!%p666_p7), %v900_v5 }
  0x59   : > { %v305_v62 = vadd.f32 %v304_v53, %v303_v56  ;;  %v461_v53 = vld [vmem:[%s1181_s4] sm:$0xff] (!%p666_p7)  ;;  %v464_v56 = vld [vmem:[%s1181_s4 + $0x18] sm:$0xff] (!%p666_p7) }
  0x5a   : > { %v356_v18 = vadd.f32 %v355_v12, %v354_v14  ;;  %705 = vmatpush3.bf16.msra.mxu0 (!%p666_p7), %v704_v50  ;;  %v710_v58 = vpack.c.bf16 (!%p666_p7), %v462_v54, %v461_v53  ;;  %v549_v8 = vunpack.c.0.s8 (!%p666_p7), %v548_v6  ;;  %v543_v14 = vld [vmem:[%s1178_s1] sm:$0x1] (!%p666_p7) }
  0x5b   : > { %v307_v4 = vadd.f32 %v306_v59, %v305_v62  ;;  %706 = vmatprep.subr.bf16.mxu0 (!%p666_p7), %v897_v49  ;;  %v713_v59 = vpack.c.bf16 (!%p666_p7), %v464_v56, %v463_v55 }
  0x5c   : > { %v358_v22 = vadd.f32 %v357_v17, %v356_v18  ;;  %711 = vmatpush3.bf16.msra.mxu1 (!%p666_p7), %v710_v58  ;;  %v564_v17 = vld [vmem:[%s1179_s2] sm:$0x1] (!%p666_p7) }
  0x5d   : > { %v309_v10 = vadd.f32 %v308_v1, %v307_v4  ;;  %712 = vmatprep.subr.bf16.mxu1 (!%p666_p7), %v897_v49 }
  0x5e   : > { %v360_v26 = vadd.f32 %v359_v21, %v358_v22  ;;  %708 = vmatpush3.bf16.msra.mxu0 (!%p666_p7), %v707_v57 }
  0x5f   : > { %v311_v15 = vadd.f32 %v310_v7, %v309_v10  ;;  %v550_v7 = vlaneseq (!%p666_p7) }
  0x60   : > { %v362_v29 = vadd.f32 %v361_v25, %v360_v26  ;;  %714 = vmatpush3.bf16.msra.mxu1 (!%p666_p7), %v713_v59 }
  0x61   : > { %v313_v19 = vadd.f32 %v312_v13, %v311_v15  ;;  %v551_v9 = vshrl.u32 (!%p666_p7), %v550_v7, 7 }
  0x62   : > { %v364_v32 = vadd.f32 %v363_v28, %v362_v29 }
  0x63   : > { %v314_v23 = vrot.slane %v313_v19, 4  ;;  %v552_v10 = vsub.s32 (!%p666_p7), %v549_v8, %v551_v9 }
  0x64   : > { %v366_v33 = vadd.f32 %v365_v30, %v364_v32 }
  0x65   : > { %v315_v27 = vadd.f32 %v314_v23, %v313_v19  ;;  %v570_v19 = vsub.s32 (!%p666_p7), 0, %v551_v9 }
  0x66   : > { %v367_v35 = vrot.slane %v366_v33, 4 }
  0x67   : > { %v316_v31 = vrot.slane %v315_v27, 2 }
  0x68   : > { %v368_v36 = vadd.f32 %v367_v35, %v366_v33 }
  0x69   : > { %v317_v34 = vadd.f32 %v316_v31, %v315_v27 }
  0x6a   : > { %v369_v38 = vrot.slane %v368_v36, 2 }
  0x6b   : > { %v318_v37 = vrot.slane %v317_v34, 1 }
  0x6c   : > { %v370_v39 = vadd.f32 %v369_v38, %v368_v36 }
  0x6d   : > { %v319_v40 = vadd.f32 %v318_v37, %v317_v34 }
  0x6e   : > { %v371_v41 = vrot.slane %v370_v39, 1 }
  0x6f   : > { %382 = sbr.rel (%p666_p7) target bundleno = 584 (0x248), region = 52 }
  0x70   : > { %v372_v42 = vadd.f32 %v371_v41, %v370_v39 }
  0x72   : > { %v374_v44 = vsel %vm373_vm2, %v319_v40, %v372_v42 }
  0x73   : > { %v376_v45 = vadd.f32 %v375_v43, %v374_v44 }
  0x75   : > { %378 = vst.msk [vmem:[%s1060_s30] sm:$0x3] %vm377_vm3, %v376_v45 }
  0x7c   : > { %v383_v60 = vld [vmem:[%s1060_s30] sm:$0x3] }
  0x7d   : > { %690 = vmatmul.mubr.msk.f32.vlgmr.msra.gmra.mrb[0].mxu0 %vm282_vm1, %v383_v60 }
 0x150   : > { %v457_v61 = vpop.f32.mrb[0].mxu0 }
 0x151   : > { %v691_v62 = vpop.f32.mrb[1].mxu0  ;;  %701 = vmatmul.mubr.msk.f32.vlgmr.msra.gmra.mrb[0].mxu1 %vm282_vm1, %v457_v61 }
 0x224   : > { %v534_v63 = vpop.f32.mrb[0].mxu1 }
 0x225   : > { %v538_v0 = vmul.f32 %v534_v63, %v534_v63  ;;  %v702_v1 = vpop.f32.mrb[1].mxu1 }
 0x227   : > { %v540_v2 = vrot.slane %v538_v0, 7 }
 0x229   : > { %v542_v3 = vsub.f32 %v534_v63, %v540_v2 }
 0x22b   : > { %v544_v4 = vadd.f32 1e-06, %v542_v3 }
 0x22d   : > { %793 = vrsqrt.f32 %v544_v4 }
 0x237   : > { %v794_v11 = vpop.eup %793 }
 0x238   : > { %v553_v12 = vrot.slane %v794_v11, %v552_v10 }
 0x23a   : > { %v554_v13 = vcombine.high %v553_v12, %v553_v12 }
 0x23c   : > { %v561_v15 = vrot.slane %v554_v13, %v552_v10 }
 0x23e   : > { %v563_v16 = vmul.f32 %v561_v15, %v543_v14 }
 0x240   : > { %v565_v18 = vmul.f32 %v563_v16, %v534_v63 }
 0x242   : > { %v566_v20 = vsub.f32 %v564_v17, %v565_v18 }
 0x244   : > { %v571_v21 = vrot.slane %v566_v20, %v570_v19 }
 0x246   : > { %v573_v22 = vsel %vm373_vm2, %v563_v16, %v571_v21 }
 0x247   : > { %574 = vst.msk [vmem:[%s1060_s30] sm:$0x3] %vm377_vm3, %v573_v22 }
 0x248 PF: > { %s18_s25 = sadd.s32 1, %s891_s25   ;;  %s1191_s11 = sld [smem:[#allocation5_spill]] }
 0x249   : > { %p15_p6 = scmp.ge.s32.totalorder %s18_s25, 6   ;;  %s1192_s12 = sld [smem:[#allocation6_spill]] }
 0x24a   : > { %s1193_s18 = smov %s867_s19  ;;  %s1194_s19 = smov %s871_s20 }
 0x24b   : > { %s1195_s20 = smov %s998_s13  ;;  %s1196_s21 = smov %s883_s23 }
 0x24c   : > { %s1197_s22 = smov %s887_s24  ;;  %17 = sbr.rel (!%p15_p6) target bundleno = 5 (0x5), region = 88 }
 0x24e   : > { %s1198_s23 = smov %s1191_s11 }
 0x24f   : > { %s1199_s24 = smov %s1192_s12 }
 0x253   :  { %594 = vsyncpa [#allocation3], 1 }
 0x254   :  { %596 = vsyncpa [#allocation3 + $0x1], 1 }

// kernel: unet_attention_block.3
= control target key start
LH: loop header
LB: loop body
LE: loop exit
PB: predicated region body
PF: predicated region fallthrough
CT: control target
= control target key end

     0   :  { %s4579_s0 = inlined_call_operand.vmem [shape: f32[2,256,32], index: 0, kind: input, shape index: {}]   ;;  %s4580_s1 = inlined_call_operand.vmem [shape: f32[2,2,32], index: 1, kind: input, shape index: {}]   ;;  %s4581_s2 = inlined_call_operand.vmem [shape: f32[9,32], index: 2, kind: input, shape index: {}]   ;;  %s4582_s3 = inlined_call_operand.vmem [shape: f32[1,256], index: 3, kind: input, shape index: {}]   ;;  %s4583_s4 = inlined_call_operand.vmem [shape: bf16[32,32], index: 4, kind: input, shape index: {}]   ;;  %s4584_s5 = inlined_call_operand.vmem [shape: bf16[32,256], index: 5, kind: input, shape index: {}]   ;;  %s4585_s6 = inlined_call_operand.vmem [shape: bf16[128,32], index: 6, kind: input, shape index: {}]   ;;  %s4586_s7 = inlined_call_operand.vmem [shape: bf16[32,32], index: 7, kind: input, shape index: {}]   ;;  %s4587_s8 = inlined_call_operand.hbm [shape: f32[2,256,32], index: 8, kind: output, shape index: {}]  }
   0x1   :  { %4606 = sst [smem:[#allocation27_spill]] %s4583_s4 }
   0x2   :  { %13 = vsyncpa [#allocation3], 0 }
   0x3   :  { %15 = vsyncpa [#allocation3 + $0x1], 0  ;;  %s3060_s27 = smov 0   ;;  %s3062_s28 = smov 0  }
   0x4   :  { %s3064_s29 = smov 0   ;;  %s3066_s30 = smov 0  }
   0x5   :  { %s3068_s9 = smov 0   ;;  %s3070_s10 = smov 0  }
   0x6   :  { %s3072_s11 = smov 0   ;;  %s3074_s12 = smov 0  }
   0x7 LB: > { %s2456_s13 = sadd.s32 4294967295, %s3009_s12   ;;  %s2457_s14 = sadd.s32 4294967294, %s3009_s12   ;;  %s3009_s12 = sphi %s3074_s12, %s21_s12   ;;  %s3005_s11 = sphi %s3072_s11, %s4662_s11   ;;  %s3001_s10 = sphi %s3070_s10, %s4661_s10   ;;  %s2997_s9 = sphi %s3068_s9, %s4660_s9   ;;  %s2993_s30 = sphi %s3066_s30, %s4659_s30   ;;  %s2989_s29 = sphi %s3064_s29, %s4658_s29   ;;  %s2985_s28 = sphi %s3062_s28, %s4657_s28   ;;  %s2981_s27 = sphi %s3060_s27, %s4656_s27  }
   0x8   : > { %s30_s15 = sadd.s32 1, %s3001_s10  ;;  %s33_s16 = sadd.s32 1, %s3005_s11 }
   0x9   : > { %p31_p0 = scmp.ge.s32.totalorder %s30_s15, 2  ;;  %p232_p1 = scmp.ne.s32.totalorder %s2989_s29, %s2985_s28 }
   0xa   : > { %p233_p2 = scmp.eq.s32.totalorder %s2456_s13, 3  ;;  %p238_p5 = scmp.ne.s32.totalorder %s2985_s28, %s2981_s27 }
   0xb   : > { %s4664_s15 = smov (%p31_p0, %s30_s15), 0  ;;  %s4666_s16 = smov (!%p31_p0, %s33_s16), %s3005_s11 }
   0xc   : > { %4607 = sst [smem:[#allocation5_spill]] %s4664_s15  ;;  %s218_s17 = ssub.s32 %s3001_s10, %s4664_s15 }
   0xd   : > { %p3111_p3 = por %p233_p2, %p232_p1  ;;  %p35_p4 = scmp.ge.s32.totalorder %s4666_s16, 2 }
   0xe   : > { %p239_p6 = scmp.eq.s32.totalorder %s2457_s14, 3  ;;  %p2460_p7 = scmp.ge.s32.totalorder %s3009_s12, 1 }
   0xf   : > { %s4668_s16 = smov (%p35_p4, %s4666_s16), 0  ;;  %p295_p9 = scmp.lt.s32.totalorder %s3009_s12, 5 }
  0x10   : > { %4609 = sst [smem:[#allocation6_spill]] %s4668_s16  ;;  %p3120_p8 = por %p239_p6, %p238_p5 }
  0x11   : > { %s217_s20 = ssub.s32 %s3005_s11, %s4668_s16  ;;  %s222_s21 = sadd.s32 1, %s2989_s29 }
  0x12   : > { %s219_s22 = sor.u32 %s218_s17, %s217_s20  ;;  %p296_p10 = pnand %p2460_p7, %p295_p9 }
  0x13   : > { %p220_p11 = scmp.eq.s32.totalorder %s219_s22, 0 }
  0x14   : > { %299 = sbr.rel (%p296_p10) target bundleno = 2024 (0x7e8), region = 52 }
  0x15   : > { %s3129_s23 = scalar_select %p220_p11, %s2989_s29, %s222_s21  }
  0x1b   : > { %s4611_s4 = sld [smem:[#allocation27_spill]]  ;;  %s3135_s26 = sshll.u32 %s2993_s30, 4  ;;  %vm448_vm0 = vcmask 261120   ;;  %v2468_v60 = vld [vmem:[%s4581_s2] ss:$0 sm:$0xff] }
  0x1c   : > { %p338_p12 = scmp.lt.s32.totalorder %s2997_s9, 1  ;;  %p340_p13 = scmp.lt.s32.totalorder %s3135_s26, 31 }
  0x1d   : > { %s2519_s25 = sshll.u32 %s2997_s9, 5 }
  0x1e   : > { %s339_s17 = scalar_select %p338_p12, %s2997_s9, 1 }
  0x1f   : > { %s341_s20 = scalar_select %p340_p13, %s3135_s26, 31 }
  0x20   : > { %s2463_s21 = sshll.u32 %s339_s17, 5  ;;  %s2465_s22 = sshll.u32 %s339_s17, 1 }
  0x21   : > { %v2721_v0 = vld [vmem:[%s4611_s4] sm:$0xff]   ;;  %v2722_v1 = vld [vmem:[%s4611_s4 + $0x8] sm:$0xff]   ;;  %s343_s24 = sadd.s32 %s2463_s21, %s341_s20  ;;  %s350_s30 = scalar_lea.vmem %s4580_s1, %s2465_s22 }
  0x22   : > { %2559 = vmatprep.subr.bf16.mxu0 %v2721_v0  ;;  %s2464_s15 = sshll.u32 %s343_s24, 3  ;;  %v2466_v2 = vld [vmem:[%s350_s30] ss:$0 sm:$0xff]  ;;  %v2467_v3 = vld [vmem:[%s350_s30 + $0x1] ss:$0 sm:$0xff]  ;;  %s334_s17 = sand.u32 1, %s2985_s28  }
  0x23   : > { %2560 = vmatpush3.bf16.msra.mxu0 %v2721_v0  ;;  %s3150_s4 = scalar_lea.vmem %s4579_s0, %s2464_s15  ;;  %s2461_s22 = sshll.u32 %s334_s17, 7 }
  0x24   : > { %2561 = vmatprep.subr.bf16.mxu0 %v2722_v1  ;;  %v353_v4 = vld [vmem:[%s3150_s4] sm:$0xff]  ;;  %v354_v5 = vld [vmem:[%s3150_s4 + $0x8] sm:$0xff]  ;;  %v355_v6 = vld [vmem:[%s3150_s4 + $0x10] sm:$0xff]  ;;  %s4455_s24 = scalar_lea.vmem [#allocation2], %s2461_s22  ;;  %s2359_s30 = sadd.s32 %s2519_s25, %s3135_s26 }
  0x25   : > { %v375_v7 = vmul.f32 %v2466_v2, %v353_v4  ;;  %v376_v8 = vmul.f32 %v2466_v2, %v354_v5  ;;  %v356_v9 = vld [vmem:[%s3150_s4 + $0x18] sm:$0xff]  ;;  %v377_v10 = vmul.f32 %v2466_v2, %v355_v6  ;;  %v357_v11 = vld [vmem:[%s3150_s4 + $0x20] sm:$0xff]  ;;  %v358_v12 = vld [vmem:[%s3150_s4 + $0x28] sm:$0xff]  ;;  %s2520_s13 = sshll.u32 %s2359_s30, 7  ;;  %s2362_s9 = sshll.u32 %s4455_s24, 4  ;;  %s4519_s9 = int_to_ptr.vmem [resolvable:$true] %s2362_s9 }
  0x26   : > { %v378_v13 = vmul.f32 %v2466_v2, %v356_v9  ;;  %v379_v14 = vmul.f32 %v2466_v2, %v357_v11  ;;  %v380_v15 = vmul.f32 %v2466_v2, %v358_v12  ;;  %v359_v16 = vld [vmem:[%s3150_s4 + $0x30] sm:$0xff]  ;;  %v360_v17 = vld [vmem:[%s3150_s4 + $0x38] sm:$0xff]  ;;  %v361_v18 = vld [vmem:[%s3150_s4 + $0x40] sm:$0xff]  ;;  %s4509_s15 = scalar_lea.hbm %s4587_s8, %s2520_s13  ;;  %s4527_s16 = scalar_lea.sflag [#allocation3], %s334_s17 }
  0x27   : > { %2562 = vmatpush3.bf16.msra.mxu0 %v2722_v1  ;;  %v395_v19 = vadd.f32 %v2467_v3, %v375_v7  ;;  %v396_v20 = vadd.f32 %v2467_v3, %v376_v8  ;;  %v397_v21 = vadd.f32 %v2467_v3, %v377_v10  ;;  %v381_v22 = vmul.f32 %v2466_v2, %v359_v16  ;;  %v362_v23 = vld [vmem:[%s3150_s4 + $0x48] sm:$0xff]  ;;  %v363_v37 = vld [vmem:[%s3150_s4 + $0x50] sm:$0xff]  ;;  %v364_v38 = vld [vmem:[%s3150_s4 + $0x58] sm:$0xff]  ;;  %s2915_s20 = scalar_lea.vmem %s4519_s9, 2048  ;;  %s3012_s21 = smov [#allocation2]  }
  0x28   : > { %v398_v24 = vadd.f32 %v2467_v3, %v378_v13  ;;  %v399_v25 = vadd.f32 %v2467_v3, %v379_v14  ;;  %v400_v26 = vadd.f32 %v2467_v3, %v380_v15  ;;  %v382_v27 = vmul.f32 %v2466_v2, %v360_v17  ;;  %v365_v39 = vld [vmem:[%s3150_s4 + $0x60] sm:$0xff]  ;;  %v366_v40 = vld [vmem:[%s3150_s4 + $0x68] sm:$0xff]  ;;  %v367_v51 = vld [vmem:[%s3150_s4 + $0x70] sm:$0xff]  ;;  %p2916_p0 = scmp.ne.s32.totalorder %s4519_s9, %s2915_s20 }
  0x29   : > { %v420_v28 = vpack.c.bf16 %v396_v20, %v395_v19  ;;  %v383_v29 = vmul.f32 %v2466_v2, %v361_v18  ;;  %v384_v30 = vmul.f32 %v2466_v2, %v362_v23  ;;  %v401_v33 = vadd.f32 %v2467_v3, %v381_v22  ;;  %v368_v52 = vld [vmem:[%s3150_s4 + $0x78] sm:$0xff] }
  0x2a   : > { %v421_v31 = vpack.c.bf16 %v398_v24, %v397_v21  ;;  %v422_v32 = vpack.c.bf16 %v400_v26, %v399_v25  ;;  %v402_v34 = vadd.f32 %v2467_v3, %v382_v27  ;;  %v385_v42 = vmul.f32 %v2466_v2, %v363_v37  ;;  %p2917_p1 = pnand %p2916_p0, %p3111_p3 }
  0x2b   : > { %2563 = vmatprep.mubr.msk.bf16.mxu0 %vm448_vm0, %v420_v28  ;;  %v403_v35 = vadd.f32 %v2467_v3, %v383_v29  ;;  %v404_v36 = vadd.f32 %v2467_v3, %v384_v30  ;;  %v386_v43 = vmul.f32 %v2466_v2, %v364_v38  ;;  %v387_v45 = vmul.f32 %v2466_v2, %v365_v39 }
  0x2c   : > { %2564 = vmatmul.mubr.msk.bf16.vlgmr.msra.gmra.mrb[0].mxu0 %vm448_vm0, %v421_v31  ;;  %v423_v41 = vpack.c.bf16 %v402_v34, %v401_v33  ;;  %v388_v46 = vmul.f32 %v2466_v2, %v366_v40  ;;  %v405_v47 = vadd.f32 %v2467_v3, %v385_v42  ;;  %v389_v54 = vmul.f32 %v2466_v2, %v367_v51  ;;  %p2918_p2 = pneg %p2917_p1 }
  0x2d   : > { %2567 = vmatprep.mubr.msk.bf16.mxu0 %vm448_vm0, %v422_v32  ;;  %v424_v44 = vpack.c.bf16 %v404_v36, %v403_v35  ;;  %v406_v48 = vadd.f32 %v2467_v3, %v386_v43  ;;  %v407_v49 = vadd.f32 %v2467_v3, %v387_v45  ;;  %v390_v55 = vmul.f32 %v2466_v2, %v368_v52 }
  0x2e   : > { %v408_v50 = vadd.f32 %v2467_v3, %v388_v46  ;;  %v409_v57 = vadd.f32 %v2467_v3, %v389_v54 }
  0x2f   : > { %v425_v53 = vpack.c.bf16 %v406_v48, %v405_v47  ;;  %v410_v58 = vadd.f32 %v2467_v3, %v390_v55 }
  0x30   : > { %v426_v56 = vpack.c.bf16 %v408_v50, %v407_v49 }
  0x31   : > { %v427_v59 = vpack.c.bf16 %v410_v58, %v409_v57 }
  0x34   : > { %2568 = vmatmul.mubr.msk.bf16.gmra.mrb[4].mxu0 %vm448_vm0, %v423_v41 }
  0x35   : > { %2571 = vmatprep.mubr.msk.bf16.mxu0 %vm448_vm0, %v424_v44 }
  0x3c   : > { %2572 = vmatmul.mubr.msk.bf16.gmra.mrb[8].mxu0 %vm448_vm0, %v425_v53 }
  0x3d   : > { %2575 = vmatprep.mubr.msk.bf16.mxu0 %vm448_vm0, %v426_v56 }
  0x44   : > { %2576 = vmatmul.mubr.msk.bf16.gmra.mrb[12].mxu0 %vm448_vm0, %v427_v59 }
  0xff   : > { %v2565_v61 = vpop.f32.mrb[0].mxu0 }
 0x100   : > { %v3179_v62 = vadd.f32 %v2565_v61, %v2468_v60  ;;  %v507_v63 = vpop.f32.mrb[1].mxu0 }
 0x101   : > { %v3181_v0 = vadd.f32 %v2468_v60, %v507_v63  ;;  %v2566_v1 = vpop.f32.mrb[2].mxu0 }
 0x102   : > { %v3183_v2 = vadd.f32 %v2566_v1, %v2468_v60  ;;  %v510_v4 = vpop.f32.mrb[3].mxu0  ;;  %v576_v3 = vsel %vm448_vm0, %v3179_v62, 0.0 }
 0x103   : > { %v3187_v5 = vadd.f32 %v2468_v60, %v510_v4  ;;  %577 = vadd.xlane.f32.xlu1 %v576_v3  ;;  %v570_v6 = vsel %vm448_vm0, %v3181_v0, 0.0 }
 0x104   : > { %571 = vadd.xlane.f32.xlu0 %v570_v6  ;;  %v579_v7 = vsel %vm448_vm0, %v3183_v2, 0.0 }
 0x105   : > { %v573_v9 = vsel %vm448_vm0, %v3187_v5, 0.0 }
 0x107   : > { %580 = vadd.xlane.f32.xlu1 %v579_v7  ;;  %v2569_v8 = vpop.f32.mrb[4].mxu0 }
 0x108   : > { %v523_v10 = vpop.f32.mrb[5].mxu0  ;;  %574 = vadd.xlane.f32.xlu0 %v573_v9  ;;  %v3195_v11 = vadd.f32 %v2569_v8, %v2468_v60 }
 0x109   : > { %v3197_v12 = vadd.f32 %v2468_v60, %v523_v10  ;;  %v2570_v13 = vpop.f32.mrb[6].mxu0 }
 0x10a   : > { %v526_v14 = vpop.f32.mrb[7].mxu0  ;;  %v3199_v15 = vadd.f32 %v2570_v13, %v2468_v60  ;;  %v588_v19 = vsel %vm448_vm0, %v3195_v11, 0.0 }
 0x10b   : > { %v3201_v16 = vadd.f32 %v2468_v60, %v526_v14  ;;  %v582_v17 = vsel %vm448_vm0, %v3197_v12, 0.0 }
 0x10c   : > { %583 = vadd.xlane.f32.xlu0 %v582_v17  ;;  %v591_v21 = vsel %vm448_vm0, %v3199_v15, 0.0 }
 0x10d   : > { %v585_v18 = vsel %vm448_vm0, %v3201_v16, 0.0 }
 0x10e   : > { %586 = vadd.xlane.f32.xlu1 %v585_v18 }
 0x10f   : > { %v2573_v20 = vpop.f32.mrb[8].mxu0 }
 0x110   : > { %v539_v22 = vpop.f32.mrb[9].mxu0  ;;  %589 = vadd.xlane.f32.xlu0 %v588_v19  ;;  %v3211_v23 = vadd.f32 %v2573_v20, %v2468_v60 }
 0x111   : > { %v3213_v24 = vadd.f32 %v2468_v60, %v539_v22  ;;  %v2574_v25 = vpop.f32.mrb[10].mxu0 }
 0x112   : > { %v542_v26 = vpop.f32.mrb[11].mxu0  ;;  %592 = vadd.xlane.f32.xlu1 %v591_v21  ;;  %v3215_v27 = vadd.f32 %v2574_v25, %v2468_v60  ;;  %v600_v31 = vsel %vm448_vm0, %v3211_v23, 0.0 }
 0x113   : > { %v3217_v28 = vadd.f32 %v2468_v60, %v542_v26  ;;  %v594_v29 = vsel %vm448_vm0, %v3213_v24, 0.0 }
 0x114   : > { %595 = vadd.xlane.f32.xlu0 %v594_v29  ;;  %v603_v33 = vsel %vm448_vm0, %v3215_v27, 0.0 }
 0x115   : > { %v597_v30 = vsel %vm448_vm0, %v3217_v28, 0.0 }
 0x116   : > { %598 = vadd.xlane.f32.xlu1 %v597_v30 }
 0x117   : > { %v2577_v32 = vpop.f32.mrb[12].mxu0 }
 0x118   : > { %v555_v34 = vpop.f32.mrb[13].mxu0  ;;  %601 = vadd.xlane.f32.xlu0 %v600_v31  ;;  %v3227_v35 = vadd.f32 %v2577_v32, %v2468_v60 }
 0x119   : > { %v3229_v36 = vadd.f32 %v2468_v60, %v555_v34  ;;  %v2578_v37 = vpop.f32.mrb[14].mxu0 }
 0x11a   : > { %v558_v38 = vpop.f32.mrb[15].mxu0  ;;  %604 = vadd.xlane.f32.xlu1 %v603_v33  ;;  %v3231_v39 = vadd.f32 %v2578_v37, %v2468_v60  ;;  %v612_v43 = vsel %vm448_vm0, %v3227_v35, 0.0 }
 0x11b   : > { %v3233_v40 = vadd.f32 %v2468_v60, %v558_v38  ;;  %v606_v41 = vsel %vm448_vm0, %v3229_v36, 0.0 }
 0x11c   : > { %607 = vadd.xlane.f32.xlu0 %v606_v41  ;;  %v615_v44 = vsel %vm448_vm0, %v3231_v39, 0.0 }
 0x11d   : > { %v609_v42 = vsel %vm448_vm0, %v3233_v40, 0.0 }
 0x11e   : > { %610 = vadd.xlane.f32.xlu1 %v609_v42 }
 0x120   : > { %613 = vadd.xlane.f32.xlu0 %v612_v43 }
 0x122   : > { %616 = vadd.xlane.f32.xlu1 %v615_v44 }
 0x190   : > { %v578_v45 = vpop.xlane.xlu1 %577 }
 0x191   : > { %v621_v46 = vmul.f32 0.03125, %v578_v45  ;;  %v572_v47 = vpop.xlane.xlu0 %571 }
 0x192   : > { %v619_v48 = vmul.f32 0.03125, %v572_v47 }
 0x193   : > { %v3244_v49 = vsub.f32 %v3179_v62, %v621_v46 }
 0x194   : > { %v3247_v50 = vsub.f32 %v3181_v0, %v619_v48  ;;  %v581_v51 = vpop.xlane.xlu1 %580 }
 0x195   : > { %v622_v52 = vmul.f32 0.03125, %v581_v51  ;;  %v575_v53 = vpop.xlane.xlu0 %574  ;;  %v653_v59 = vmul.f32 %v3244_v49, %v3244_v49 }
 0x196   : > { %v620_v54 = vmul.f32 0.03125, %v575_v53  ;;  %v651_v55 = vmul.f32 %v3247_v50, %v3247_v50 }
 0x197   : > { %v3252_v56 = vsub.f32 %v3183_v2, %v622_v52  ;;  %v673_v7 = vsel %vm448_vm0, %v653_v59, 0.0 }
 0x198   : > { %v3255_v57 = vsub.f32 %v3187_v5, %v620_v54  ;;  %v667_v58 = vsel %vm448_vm0, %v651_v55, 0.0 }
 0x199   : > { %668 = vadd.xlane.f32.xlu0 %v667_v58  ;;  %v584_v60 = vpop.xlane.xlu0 %583  ;;  %v654_v4 = vmul.f32 %v3252_v56, %v3252_v56 }
 0x19a   : > { %v623_v61 = vmul.f32 0.03125, %v584_v60  ;;  %v652_v63 = vmul.f32 %v3255_v57, %v3255_v57 }
 0x19b   : > { %v587_v1 = vpop.xlane.xlu1 %586  ;;  %v676_v18 = vsel %vm448_vm0, %v654_v4, 0.0 }
 0x19c   : > { %v3265_v3 = vsub.f32 %v3197_v12, %v623_v61  ;;  %v624_v6 = vmul.f32 0.03125, %v587_v1  ;;  %v670_v8 = vsel %vm448_vm0, %v652_v63, 0.0 }
 0x19d   : > { %674 = vadd.xlane.f32.xlu0 %v673_v7  ;;  %671 = vadd.xlane.f32.xlu1 %v670_v8  ;;  %v590_v9 = vpop.xlane.xlu0 %589 }
 0x19e   : > { %v3270_v10 = vsub.f32 %v3201_v16, %v624_v6  ;;  %v625_v13 = vmul.f32 0.03125, %v590_v9  ;;  %v655_v14 = vmul.f32 %v3265_v3, %v3265_v3 }
 0x19f   : > { %v593_v17 = vpop.xlane.xlu1 %592 }
 0x1a0   : > { %v3276_v19 = vsub.f32 %v3195_v11, %v625_v13  ;;  %v626_v20 = vmul.f32 0.03125, %v593_v17  ;;  %v679_v21 = vsel %vm448_vm0, %v655_v14, 0.0  ;;  %v656_v22 = vmul.f32 %v3270_v10, %v3270_v10 }
 0x1a1   : > { %677 = vadd.xlane.f32.xlu1 %v676_v18  ;;  %680 = vadd.xlane.f32.xlu0 %v679_v21  ;;  %v596_v25 = vpop.xlane.xlu0 %595 }
 0x1a2   : > { %v3282_v26 = vsub.f32 %v3199_v15, %v626_v20  ;;  %v627_v29 = vmul.f32 0.03125, %v596_v25  ;;  %v657_v30 = vmul.f32 %v3276_v19, %v3276_v19  ;;  %v682_v32 = vsel %vm448_vm0, %v656_v22, 0.0 }
 0x1a3   : > { %v599_v31 = vpop.xlane.xlu1 %598 }
 0x1a4   : > { %v3288_v33 = vsub.f32 %v3213_v24, %v627_v29  ;;  %v628_v34 = vmul.f32 0.03125, %v599_v31  ;;  %v685_v37 = vsel %vm448_vm0, %v657_v30, 0.0  ;;  %v658_v38 = vmul.f32 %v3282_v26, %v3282_v26 }
 0x1a5   : > { %683 = vadd.xlane.f32.xlu1 %v682_v32  ;;  %686 = vadd.xlane.f32.xlu0 %v685_v37  ;;  %v602_v41 = vpop.xlane.xlu0 %601 }
 0x1a6   : > { %v3294_v42 = vsub.f32 %v3217_v28, %v628_v34  ;;  %v629_v43 = vmul.f32 0.03125, %v602_v41  ;;  %v659_v44 = vmul.f32 %v3288_v33, %v3288_v33  ;;  %v688_v46 = vsel %vm448_vm0, %v658_v38, 0.0 }
 0x1a7   : > { %v605_v45 = vpop.xlane.xlu1 %604 }
 0x1a8   : > { %v3300_v47 = vsub.f32 %v3211_v23, %v629_v43  ;;  %v630_v48 = vmul.f32 0.03125, %v605_v45  ;;  %v691_v51 = vsel %vm448_vm0, %v659_v44, 0.0  ;;  %v660_v52 = vmul.f32 %v3294_v42, %v3294_v42 }
 0x1a9   : > { %689 = vadd.xlane.f32.xlu1 %v688_v46  ;;  %692 = vadd.xlane.f32.xlu0 %v691_v51  ;;  %v608_v53 = vpop.xlane.xlu0 %607 }
 0x1aa   : > { %v3306_v54 = vsub.f32 %v3215_v27, %v630_v48  ;;  %v631_v55 = vmul.f32 0.03125, %v608_v53  ;;  %v661_v58 = vmul.f32 %v3300_v47, %v3300_v47  ;;  %v694_v60 = vsel %vm448_vm0, %v660_v52, 0.0 }
 0x1ab   : > { %v611_v59 = vpop.xlane.xlu1 %610 }
 0x1ac   : > { %v3312_v61 = vsub.f32 %v3229_v36, %v631_v55  ;;  %v632_v63 = vmul.f32 0.03125, %v611_v59  ;;  %v697_v1 = vsel %vm448_vm0, %v661_v58, 0.0  ;;  %v662_v4 = vmul.f32 %v3306_v54, %v3306_v54 }
 0x1ad   : > { %695 = vadd.xlane.f32.xlu1 %v694_v60  ;;  %698 = vadd.xlane.f32.xlu0 %v697_v1  ;;  %v614_v6 = vpop.xlane.xlu0 %613 }
 0x1ae   : > { %v3318_v7 = vsub.f32 %v3233_v40, %v632_v63  ;;  %v633_v8 = vmul.f32 0.03125, %v614_v6  ;;  %v663_v9 = vmul.f32 %v3312_v61, %v3312_v61  ;;  %v700_v14 = vsel %vm448_vm0, %v662_v4, 0.0 }
 0x1af   : > { %v617_v13 = vpop.xlane.xlu1 %616 }
 0x1b0   : > { %v3324_v17 = vsub.f32 %v3227_v35, %v633_v8  ;;  %v634_v18 = vmul.f32 0.03125, %v617_v13  ;;  %v703_v20 = vsel %vm448_vm0, %v663_v9, 0.0  ;;  %v664_v21 = vmul.f32 %v3318_v7, %v3318_v7  ;;  %v3342_v13 = vld [vmem:[%s4581_s2 + $0x1] ss:$0 sm:$0xff] }
 0x1b1   : > { %701 = vadd.xlane.f32.xlu1 %v700_v14  ;;  %704 = vadd.xlane.f32.xlu0 %v703_v20 }
 0x1b2   : > { %v3330_v22 = vsub.f32 %v3231_v39, %v634_v18  ;;  %v665_v25 = vmul.f32 %v3324_v17, %v3324_v17  ;;  %v706_v29 = vsel %vm448_vm0, %v664_v21, 0.0 }
 0x1b4   : > { %v709_v30 = vsel %vm448_vm0, %v665_v25, 0.0  ;;  %v666_v31 = vmul.f32 %v3330_v22, %v3330_v22 }
 0x1b5   : > { %707 = vadd.xlane.f32.xlu1 %v706_v29  ;;  %710 = vadd.xlane.f32.xlu0 %v709_v30  ;;  %v3348_v29 = vld [vmem:[%s4581_s2 + $0x2] ss:$0 sm:$0xff] }
 0x1b6   : > { %v712_v32 = vsel %vm448_vm0, %v666_v31, 0.0 }
 0x1b9   : > { %713 = vadd.xlane.f32.xlu1 %v712_v32 }
 0x226   : > { %v669_v34 = vpop.xlane.xlu0 %668 }
 0x227   : > { %v715_v37 = vmul.f32 0.03125, %v669_v34 }
 0x229   : > { %v731_v38 = vadd.f32 1e-05, %v715_v37 }
 0x22a   : > { %v672_v41 = vpop.xlane.xlu1 %671  ;;  %v675_v43 = vpop.xlane.xlu0 %674 }
 0x22b   : > { %2739 = vrsqrt.f32 %v731_v38  ;;  %v716_v44 = vmul.f32 0.03125, %v672_v41  ;;  %v717_v45 = vmul.f32 0.03125, %v675_v43 }
 0x22d   : > { %v732_v46 = vadd.f32 1e-05, %v716_v44  ;;  %v733_v48 = vadd.f32 1e-05, %v717_v45 }
 0x22e   : > { %v678_v51 = vpop.xlane.xlu1 %677  ;;  %v681_v52 = vpop.xlane.xlu0 %680 }
 0x22f   : > { %2741 = vrsqrt.f32 %v732_v46  ;;  %v718_v53 = vmul.f32 0.03125, %v678_v51  ;;  %v719_v55 = vmul.f32 0.03125, %v681_v52 }
 0x230   : > { %2743 = vrsqrt.f32 %v733_v48 }
 0x231   : > { %v734_v58 = vadd.f32 1e-05, %v718_v53  ;;  %v735_v59 = vadd.f32 1e-05, %v719_v55 }
 0x232   : > { %v684_v60 = vpop.xlane.xlu1 %683  ;;  %v687_v63 = vpop.xlane.xlu0 %686 }
 0x233   : > { %2745 = vrsqrt.f32 %v734_v58  ;;  %v720_v1 = vmul.f32 0.03125, %v684_v60  ;;  %v721_v4 = vmul.f32 0.03125, %v687_v63 }
 0x234   : > { %2747 = vrsqrt.f32 %v735_v59 }
 0x235   : > { %v2740_v6 = vpop.eup %2739  ;;  %v736_v8 = vadd.f32 1e-05, %v720_v1  ;;  %v737_v9 = vadd.f32 1e-05, %v721_v4 }
 0x236   : > { %v690_v14 = vpop.xlane.xlu1 %689  ;;  %v693_v18 = vpop.xlane.xlu0 %692  ;;  %v763_v20 = vmul.f32 %v2740_v6, %v3247_v50 }
 0x237   : > { %2749 = vrsqrt.f32 %v736_v8  ;;  %v722_v21 = vmul.f32 0.03125, %v690_v14  ;;  %v723_v25 = vmul.f32 0.03125, %v693_v18 }
 0x238   : > { %2751 = vrsqrt.f32 %v737_v9  ;;  %v783_v30 = vmul.f32 %v3342_v13, %v763_v20 }
 0x239   : > { %v2742_v31 = vpop.eup %2741  ;;  %v738_v32 = vadd.f32 1e-05, %v722_v21  ;;  %v739_v34 = vadd.f32 1e-05, %v723_v25 }
 0x23a   : > { %v2744_v37 = vpop.eup %2743  ;;  %v696_v38 = vpop.xlane.xlu1 %695  ;;  %v803_v43 = vadd.f32 %v3348_v29, %v783_v30  ;;  %v764_v50 = vmul.f32 %v2742_v31, %v3255_v57 }
 0x23b   : > { %v699_v41 = vpop.xlane.xlu0 %698  ;;  %2753 = vrsqrt.f32 %v738_v32  ;;  %v724_v44 = vmul.f32 0.03125, %v696_v38  ;;  %v765_v46 = vmul.f32 %v2744_v37, %v3244_v49 }
 0x23c   : > { %v725_v45 = vmul.f32 0.03125, %v699_v41  ;;  %2755 = vrsqrt.f32 %v739_v34  ;;  %v3355_v48 = vadd.f32 %v803_v43, %v3181_v0  ;;  %v784_v51 = vmul.f32 %v3342_v13, %v764_v50 }
 0x23d   : > { %v2746_v52 = vpop.eup %2745  ;;  %v740_v53 = vadd.f32 1e-05, %v724_v44  ;;  %v785_v58 = vmul.f32 %v3342_v13, %v765_v46 }
 0x23e   : > { %v741_v55 = vadd.f32 1e-05, %v725_v45  ;;  %v2748_v59 = vpop.eup %2747  ;;  %v702_v60 = vpop.xlane.xlu1 %701  ;;  %v835_v57 = vsel %vm448_vm0, %v3355_v48, 0.0  ;;  %v804_v1 = vadd.f32 %v3348_v29, %v784_v51  ;;  %v766_v49 = vmul.f32 %v2746_v52, %v3252_v56 }
 0x23f   : > { %v705_v63 = vpop.xlane.xlu0 %704  ;;  %2757 = vrsqrt.f32 %v740_v53  ;;  %v726_v4 = vmul.f32 0.03125, %v702_v60  ;;  %836 = vadd.xlane.f32.xlu0 %v835_v57  ;;  %v805_v8 = vadd.f32 %v3348_v29, %v785_v58  ;;  %v767_v18 = vmul.f32 %v2748_v59, %v3265_v3 }
 0x240   : > { %v727_v6 = vmul.f32 0.03125, %v705_v63  ;;  %2759 = vrsqrt.f32 %v741_v55  ;;  %v3365_v9 = vadd.f32 %v804_v1, %v3187_v5  ;;  %v786_v14 = vmul.f32 %v3342_v13, %v766_v49 }
 0x241   : > { %v2750_v20 = vpop.eup %2749  ;;  %v742_v21 = vadd.f32 1e-05, %v726_v4  ;;  %v3370_v30 = vadd.f32 %v805_v8, %v3179_v62  ;;  %v787_v38 = vmul.f32 %v3342_v13, %v767_v18 }
 0x242   : > { %v743_v25 = vadd.f32 1e-05, %v727_v6  ;;  %v2752_v56 = vpop.eup %2751  ;;  %v708_v31 = vpop.xlane.xlu1 %707  ;;  %v838_v34 = vsel %vm448_vm0, %v3365_v9, 0.0  ;;  %v806_v37 = vadd.f32 %v3348_v29, %v786_v14  ;;  %v768_v41 = vmul.f32 %v2750_v20, %v3270_v10 }
 0x243   : > { %v711_v32 = vpop.xlane.xlu0 %710  ;;  %2761 = vrsqrt.f32 %v742_v21  ;;  %v728_v3 = vmul.f32 0.03125, %v708_v31  ;;  %839 = vadd.xlane.f32.xlu1 %v838_v34  ;;  %v841_v50 = vsel %vm448_vm0, %v3370_v30, 0.0  ;;  %v807_v45 = vadd.f32 %v3348_v29, %v787_v38 }
 0x244   : > { %v729_v43 = vmul.f32 0.03125, %v711_v32  ;;  %2763 = vrsqrt.f32 %v743_v25  ;;  %842 = vadd.xlane.f32.xlu0 %v841_v50  ;;  %v3380_v44 = vadd.f32 %v806_v37, %v3183_v2  ;;  %v788_v46 = vmul.f32 %v3342_v13, %v768_v41 }
 0x245   : > { %v2754_v51 = vpop.eup %2753  ;;  %v744_v52 = vadd.f32 1e-05, %v728_v3  ;;  %v769_v10 = vmul.f32 %v2752_v56, %v3276_v19  ;;  %v3388_v60 = vadd.f32 %v807_v45, %v3197_v12 }
 0x246   : > { %v745_v53 = vadd.f32 1e-05, %v729_v43  ;;  %v2756_v55 = vpop.eup %2755  ;;  %v714_v58 = vpop.xlane.xlu1 %713  ;;  %v844_v59 = vsel %vm448_vm0, %v3380_v44, 0.0  ;;  %v808_v63 = vadd.f32 %v3348_v29, %v788_v46  ;;  %v770_v57 = vmul.f32 %v2754_v51, %v3282_v26 }
 0x247   : > { %2765 = vrsqrt.f32 %v744_v52  ;;  %v730_v1 = vmul.f32 0.03125, %v714_v58  ;;  %845 = vadd.xlane.f32.xlu1 %v844_v59  ;;  %v789_v49 = vmul.f32 %v3342_v13, %v769_v10  ;;  %v771_v4 = vmul.f32 %v2756_v55, %v3288_v33 }
 0x248   : > { %2767 = vrsqrt.f32 %v745_v53  ;;  %v847_v19 = vsel %vm448_vm0, %v3388_v60, 0.0  ;;  %v3397_v6 = vadd.f32 %v808_v63, %v3201_v16  ;;  %v790_v8 = vmul.f32 %v3342_v13, %v770_v57 }
 0x249   : > { %v2758_v14 = vpop.eup %2757  ;;  %v746_v18 = vadd.f32 1e-05, %v730_v1  ;;  %848 = vadd.xlane.f32.xlu0 %v847_v19  ;;  %v809_v26 = vadd.f32 %v3348_v29, %v789_v49  ;;  %v791_v20 = vmul.f32 %v3342_v13, %v771_v4 }
 0x24a   : > { %v2760_v21 = vpop.eup %2759  ;;  %v850_v33 = vsel %vm448_vm0, %v3397_v6, 0.0  ;;  %v810_v25 = vadd.f32 %v3348_v29, %v790_v8  ;;  %v772_v56 = vmul.f32 %v2758_v14, %v3294_v42 }
 0x24b   : > { %2769 = vrsqrt.f32 %v746_v18  ;;  %851 = vadd.xlane.f32.xlu1 %v850_v33  ;;  %v3407_v31 = vadd.f32 %v809_v26, %v3195_v11  ;;  %v811_v32 = vadd.f32 %v3348_v29, %v791_v20  ;;  %v773_v34 = vmul.f32 %v2760_v21, %v3300_v47 }
 0x24c   : > { %v3412_v37 = vadd.f32 %v810_v25, %v3199_v15  ;;  %v792_v38 = vmul.f32 %v3342_v13, %v772_v56 }
 0x24d   : > { %v2762_v41 = vpop.eup %2761  ;;  %v853_v3 = vsel %vm448_vm0, %v3407_v31, 0.0  ;;  %v3418_v42 = vadd.f32 %v811_v32, %v3213_v24  ;;  %v793_v43 = vmul.f32 %v3342_v13, %v773_v34 }
 0x24e   : > { %v2764_v50 = vpop.eup %2763  ;;  %854 = vadd.xlane.f32.xlu0 %v853_v3  ;;  %v856_v45 = vsel %vm448_vm0, %v3412_v37, 0.0  ;;  %v812_v47 = vadd.f32 %v3348_v29, %v792_v38  ;;  %v774_v46 = vmul.f32 %v2762_v41, %v3306_v54 }
 0x24f   : > { %857 = vadd.xlane.f32.xlu1 %v856_v45  ;;  %v859_v51 = vsel %vm448_vm0, %v3418_v42, 0.0  ;;  %v813_v52 = vadd.f32 %v3348_v29, %v793_v43  ;;  %v775_v53 = vmul.f32 %v2764_v50, %v3312_v61 }
 0x250   : > { %v3430_v10 = vadd.f32 %v812_v47, %v3217_v28  ;;  %v794_v55 = vmul.f32 %v3342_v13, %v774_v46 }
 0x251   : > { %v2766_v58 = vpop.eup %2765  ;;  %v3434_v59 = vadd.f32 %v813_v52, %v3211_v23  ;;  %v795_v63 = vmul.f32 %v3342_v13, %v775_v53 }
 0x252   : > { %v2768_v54 = vpop.eup %2767  ;;  %860 = vadd.xlane.f32.xlu0 %v859_v51  ;;  %v862_v57 = vsel %vm448_vm0, %v3430_v10, 0.0  ;;  %v814_v1 = vadd.f32 %v3348_v29, %v794_v55  ;;  %v776_v61 = vmul.f32 %v2766_v58, %v3318_v7 }
 0x253   : > { %863 = vadd.xlane.f32.xlu1 %v862_v57  ;;  %v865_v49 = vsel %vm448_vm0, %v3434_v59, 0.0  ;;  %v815_v4 = vadd.f32 %v3348_v29, %v795_v63  ;;  %v777_v19 = vmul.f32 %v2768_v54, %v3324_v17 }
 0x254   : > { %v3446_v8 = vadd.f32 %v814_v1, %v3215_v27  ;;  %v796_v14 = vmul.f32 %v3342_v13, %v776_v61 }
 0x255   : > { %v2770_v18 = vpop.eup %2769  ;;  %v3450_v26 = vadd.f32 %v815_v4, %v3229_v36  ;;  %v797_v20 = vmul.f32 %v3342_v13, %v777_v19 }
 0x256   : > { %866 = vadd.xlane.f32.xlu0 %v865_v49  ;;  %v868_v7 = vsel %vm448_vm0, %v3446_v8, 0.0  ;;  %v816_v21 = vadd.f32 %v3348_v29, %v796_v14  ;;  %v778_v33 = vmul.f32 %v2770_v18, %v3330_v22 }
 0x257   : > { %869 = vadd.xlane.f32.xlu1 %v868_v7  ;;  %v871_v17 = vsel %vm448_vm0, %v3450_v26, 0.0  ;;  %v817_v25 = vadd.f32 %v3348_v29, %v797_v20 }
 0x258   : > { %v3461_v56 = vadd.f32 %v816_v21, %v3233_v40  ;;  %v798_v32 = vmul.f32 %v3342_v13, %v778_v33 }
 0x259   : > { %v3465_v34 = vadd.f32 %v817_v25, %v3227_v35 }
 0x25a   : > { %872 = vadd.xlane.f32.xlu0 %v871_v17  ;;  %v874_v38 = vsel %vm448_vm0, %v3461_v56, 0.0  ;;  %v818_v22 = vadd.f32 %v3348_v29, %v798_v32 }
 0x25b   : > { %875 = vadd.xlane.f32.xlu1 %v874_v38  ;;  %v877_v41 = vsel %vm448_vm0, %v3465_v34, 0.0 }
 0x25c   : > { %v3473_v3 = vadd.f32 %v818_v22, %v3231_v39 }
 0x25e   : > { %878 = vadd.xlane.f32.xlu0 %v877_v41  ;;  %v880_v13 = vsel %vm448_vm0, %v3473_v3, 0.0 }
 0x25f   : > { %881 = vadd.xlane.f32.xlu1 %v880_v13 }
 0x2cc   : > { %v837_v43 = vpop.xlane.xlu0 %836 }
 0x2cd   : > { %v883_v50 = vmul.f32 0.03125, %v837_v43 }
 0x2cf   : > { %v3478_v45 = vsub.f32 %v3355_v48, %v883_v50 }
 0x2d0   : > { %v840_v47 = vpop.xlane.xlu1 %839 }
 0x2d1   : > { %v884_v46 = vmul.f32 0.03125, %v840_v47  ;;  %v843_v29 = vpop.xlane.xlu0 %842  ;;  %v915_v51 = vmul.f32 %v3478_v45, %v3478_v45 }
 0x2d2   : > { %v885_v52 = vmul.f32 0.03125, %v843_v29 }
 0x2d3   : > { %v3483_v53 = vsub.f32 %v3365_v9, %v884_v46  ;;  %v931_v55 = vsel %vm448_vm0, %v915_v51, 0.0 }
 0x2d4   : > { %v3487_v58 = vsub.f32 %v3370_v30, %v885_v52  ;;  %v846_v63 = vpop.xlane.xlu1 %845  ;;  %932 = vadd.xlane.f32.xlu0 %v931_v55 }
 0x2d5   : > { %v886_v54 = vmul.f32 0.03125, %v846_v63  ;;  %v916_v48 = vmul.f32 %v3483_v53, %v3483_v53 }
 0x2d6   : > { %v849_v57 = vpop.xlane.xlu0 %848  ;;  %v917_v1 = vmul.f32 %v3487_v58, %v3487_v58 }
 0x2d7   : > { %v3494_v61 = vsub.f32 %v3380_v44, %v886_v54  ;;  %v887_v9 = vmul.f32 0.03125, %v849_v57  ;;  %v934_v49 = vsel %vm448_vm0, %v916_v48, 0.0 }
 0x2d8   : > { %935 = vadd.xlane.f32.xlu1 %v934_v49  ;;  %v852_v4 = vpop.xlane.xlu1 %851  ;;  %v937_v30 = vsel %vm448_vm0, %v917_v1, 0.0 }
 0x2d9   : > { %v3499_v19 = vsub.f32 %v3388_v60, %v887_v9  ;;  %v888_v14 = vmul.f32 0.03125, %v852_v4  ;;  %938 = vadd.xlane.f32.xlu0 %v937_v30  ;;  %v918_v18 = vmul.f32 %v3494_v61, %v3494_v61 }
 0x2db   : > { %v3504_v20 = vsub.f32 %v3397_v6, %v888_v14  ;;  %v855_v44 = vpop.xlane.xlu0 %854  ;;  %v940_v7 = vsel %vm448_vm0, %v918_v18, 0.0  ;;  %v919_v21 = vmul.f32 %v3499_v19, %v3499_v19 }
 0x2dc   : > { %v889_v33 = vmul.f32 0.03125, %v855_v44  ;;  %941 = vadd.xlane.f32.xlu1 %v940_v7  ;;  %v858_v17 = vpop.xlane.xlu1 %857 }
 0x2dd   : > { %v890_v25 = vmul.f32 0.03125, %v858_v17  ;;  %v943_v60 = vsel %vm448_vm0, %v919_v21, 0.0  ;;  %v920_v32 = vmul.f32 %v3504_v20, %v3504_v20 }
 0x2de   : > { %v3513_v38 = vsub.f32 %v3407_v31, %v889_v33  ;;  %944 = vadd.xlane.f32.xlu0 %v943_v60 }
 0x2df   : > { %v3516_v6 = vsub.f32 %v3412_v37, %v890_v25  ;;  %v861_v22 = vpop.xlane.xlu0 %860  ;;  %v946_v41 = vsel %vm448_vm0, %v920_v32, 0.0 }
 0x2e0   : > { %v891_v13 = vmul.f32 0.03125, %v861_v22  ;;  %947 = vadd.xlane.f32.xlu1 %v946_v41  ;;  %v864_v43 = vpop.xlane.xlu1 %863  ;;  %v921_v50 = vmul.f32 %v3513_v38, %v3513_v38 }
 0x2e1   : > { %v892_v47 = vmul.f32 0.03125, %v864_v43  ;;  %v922_v46 = vmul.f32 %v3516_v6, %v3516_v6 }
 0x2e2   : > { %v3524_v31 = vsub.f32 %v3418_v42, %v891_v13  ;;  %v949_v29 = vsel %vm448_vm0, %v921_v50, 0.0 }
 0x2e3   : > { %v3528_v37 = vsub.f32 %v3430_v10, %v892_v47  ;;  %950 = vadd.xlane.f32.xlu0 %v949_v29  ;;  %v867_v51 = vpop.xlane.xlu0 %866  ;;  %v952_v52 = vsel %vm448_vm0, %v922_v46, 0.0 }
 0x2e4   : > { %v893_v55 = vmul.f32 0.03125, %v867_v51  ;;  %953 = vadd.xlane.f32.xlu1 %v952_v52  ;;  %v870_v63 = vpop.xlane.xlu1 %869  ;;  %v923_v54 = vmul.f32 %v3524_v31, %v3524_v31 }
 0x2e5   : > { %v894_v48 = vmul.f32 0.03125, %v870_v63  ;;  %v924_v42 = vmul.f32 %v3528_v37, %v3528_v37 }
 0x2e6   : > { %v3536_v57 = vsub.f32 %v3434_v59, %v893_v55  ;;  %v955_v10 = vsel %vm448_vm0, %v923_v54, 0.0 }
 0x2e7   : > { %v3540_v1 = vsub.f32 %v3446_v8, %v894_v48  ;;  %956 = vadd.xlane.f32.xlu0 %v955_v10  ;;  %v873_v9 = vpop.xlane.xlu0 %872  ;;  %v958_v49 = vsel %vm448_vm0, %v924_v42, 0.0 }
 0x2e8   : > { %v895_v4 = vmul.f32 0.03125, %v873_v9  ;;  %959 = vadd.xlane.f32.xlu1 %v958_v49  ;;  %v876_v30 = vpop.xlane.xlu1 %875  ;;  %v925_v14 = vmul.f32 %v3536_v57, %v3536_v57 }
 0x2e9   : > { %v896_v18 = vmul.f32 0.03125, %v876_v30  ;;  %v926_v59 = vmul.f32 %v3540_v1, %v3540_v1 }
 0x2ea   : > { %v3548_v44 = vsub.f32 %v3450_v26, %v895_v4  ;;  %v961_v8 = vsel %vm448_vm0, %v925_v14, 0.0 }
 0x2eb   : > { %v3552_v7 = vsub.f32 %v3461_v56, %v896_v18  ;;  %962 = vadd.xlane.f32.xlu0 %v961_v8  ;;  %v879_v21 = vpop.xlane.xlu0 %878  ;;  %v964_v33 = vsel %vm448_vm0, %v926_v59, 0.0 }
 0x2ec   : > { %v897_v17 = vmul.f32 0.03125, %v879_v21  ;;  %965 = vadd.xlane.f32.xlu1 %v964_v33  ;;  %v882_v25 = vpop.xlane.xlu1 %881  ;;  %v927_v60 = vmul.f32 %v3548_v44, %v3548_v44  ;;  %v3576_v33 = vld [vmem:[%s4581_s2 + $0x3] ss:$0 sm:$0xff] }
 0x2ed   : > { %v898_v32 = vmul.f32 0.03125, %v882_v25  ;;  %v928_v26 = vmul.f32 %v3552_v7, %v3552_v7 }
 0x2ee   : > { %v3560_v22 = vsub.f32 %v3465_v34, %v897_v17  ;;  %v967_v56 = vsel %vm448_vm0, %v927_v60, 0.0 }
 0x2ef   : > { %v3564_v41 = vsub.f32 %v3473_v3, %v898_v32  ;;  %968 = vadd.xlane.f32.xlu0 %v967_v56  ;;  %v970_v13 = vsel %vm448_vm0, %v928_v26, 0.0  ;;  %v3582_v26 = vld [vmem:[%s4581_s2 + $0x4] ss:$0 sm:$0xff] }
 0x2f0   : > { %971 = vadd.xlane.f32.xlu1 %v970_v13  ;;  %v929_v43 = vmul.f32 %v3560_v22, %v3560_v22 }
 0x2f1   : > { %v930_v50 = vmul.f32 %v3564_v41, %v3564_v41 }
 0x2f2   : > { %v973_v47 = vsel %vm448_vm0, %v929_v43, 0.0 }
 0x2f3   : > { %974 = vadd.xlane.f32.xlu0 %v973_v47  ;;  %v976_v34 = vsel %vm448_vm0, %v930_v50, 0.0 }
 0x2f4   : > { %977 = vadd.xlane.f32.xlu1 %v976_v34 }
 0x361   : > { %v933_v46 = vpop.xlane.xlu0 %932 }
 0x362   : > { %v979_v29 = vmul.f32 0.03125, %v933_v46 }
 0x364   : > { %v995_v3 = vadd.f32 1e-05, %v979_v29 }
 0x365   : > { %v936_v51 = vpop.xlane.xlu1 %935 }
 0x366   : > { %2771 = vrsqrt.f32 %v995_v3  ;;  %v980_v52 = vmul.f32 0.03125, %v936_v51  ;;  %v939_v55 = vpop.xlane.xlu0 %938 }
 0x367   : > { %v981_v63 = vmul.f32 0.03125, %v939_v55 }
 0x368   : > { %v996_v54 = vadd.f32 1e-05, %v980_v52 }
 0x369   : > { %v997_v48 = vadd.f32 1e-05, %v981_v63  ;;  %v942_v42 = vpop.xlane.xlu1 %941 }
 0x36a   : > { %2773 = vrsqrt.f32 %v996_v54  ;;  %v982_v10 = vmul.f32 0.03125, %v942_v42 }
 0x36b   : > { %2775 = vrsqrt.f32 %v997_v48  ;;  %v945_v9 = vpop.xlane.xlu0 %944 }
 0x36c   : > { %v998_v49 = vadd.f32 1e-05, %v982_v10  ;;  %v983_v4 = vmul.f32 0.03125, %v945_v9 }
 0x36d   : > { %v948_v30 = vpop.xlane.xlu1 %947 }
 0x36e   : > { %2777 = vrsqrt.f32 %v998_v49  ;;  %v999_v14 = vadd.f32 1e-05, %v983_v4  ;;  %v984_v18 = vmul.f32 0.03125, %v948_v30 }
 0x370   : > { %v2772_v59 = vpop.eup %2771  ;;  %2779 = vrsqrt.f32 %v999_v14  ;;  %v1000_v8 = vadd.f32 1e-05, %v984_v18  ;;  %v951_v21 = vpop.xlane.xlu0 %950 }
 0x371   : > { %v985_v17 = vmul.f32 0.03125, %v951_v21  ;;  %v954_v25 = vpop.xlane.xlu1 %953  ;;  %v1027_v60 = vmul.f32 %v2772_v59, %v3478_v45 }
 0x372   : > { %2781 = vrsqrt.f32 %v1000_v8  ;;  %v986_v32 = vmul.f32 0.03125, %v954_v25 }
 0x373   : > { %v1001_v56 = vadd.f32 1e-05, %v985_v17  ;;  %v1047_v13 = vmul.f32 %v3576_v33, %v1027_v60 }
 0x374   : > { %v2774_v43 = vpop.eup %2773  ;;  %v1002_v50 = vadd.f32 1e-05, %v986_v32  ;;  %v957_v47 = vpop.xlane.xlu0 %956 }
 0x375   : > { %v2776_v34 = vpop.eup %2775  ;;  %2783 = vrsqrt.f32 %v1001_v56  ;;  %v987_v46 = vmul.f32 0.03125, %v957_v47  ;;  %v960_v29 = vpop.xlane.xlu1 %959  ;;  %v1067_v3 = vadd.f32 %v3582_v26, %v1047_v13  ;;  %v1028_v45 = vmul.f32 %v2774_v43, %v3483_v53 }
 0x376   : > { %2785 = vrsqrt.f32 %v1002_v50  ;;  %v988_v51 = vmul.f32 0.03125, %v960_v29  ;;  %v1029_v52 = vmul.f32 %v2776_v34, %v3487_v58 }
 0x377   : > { %v1003_v55 = vadd.f32 1e-05, %v987_v46  ;;  %v3589_v63 = vadd.f32 %v1067_v3, %v3181_v0  ;;  %v1048_v54 = vmul.f32 %v3576_v33, %v1028_v45 }
 0x378   : > { %v2778_v48 = vpop.eup %2777  ;;  %v1004_v42 = vadd.f32 1e-05, %v988_v51  ;;  %v963_v10 = vpop.xlane.xlu0 %962  ;;  %v1049_v9 = vmul.f32 %v3576_v33, %v1029_v52 }
 0x379   : > { %4612 = vst [vmem:[#allocation7_spill] sm:$0xff] %v3589_v63  ;;  %2787 = vrsqrt.f32 %v1003_v55  ;;  %v989_v49 = vmul.f32 0.03125, %v963_v10  ;;  %v966_v4 = vpop.xlane.xlu1 %965  ;;  %v1099_v53 = vsel %vm448_vm0, %v3589_v63, 0.0  ;;  %v1068_v30 = vadd.f32 %v3582_v26, %v1048_v54 }
 0x37a   : > { %v2780_v58 = vpop.eup %2779  ;;  %2789 = vrsqrt.f32 %v1004_v42  ;;  %v990_v14 = vmul.f32 0.03125, %v966_v4  ;;  %1100 = vadd.xlane.f32.xlu0 %v1099_v53  ;;  %v1069_v0 = vadd.f32 %v3582_v26, %v1049_v9  ;;  %v1030_v18 = vmul.f32 %v2778_v48, %v3494_v61 }
 0x37b   : > { %v1005_v59 = vadd.f32 1e-05, %v989_v49  ;;  %v3599_v8 = vadd.f32 %v1068_v30, %v3187_v5  ;;  %v1031_v21 = vmul.f32 %v2780_v58, %v3499_v19 }
 0x37c   : > { %v2782_v17 = vpop.eup %2781  ;;  %v1006_v25 = vadd.f32 1e-05, %v990_v14  ;;  %v969_v60 = vpop.xlane.xlu0 %968  ;;  %v3603_v32 = vadd.f32 %v1069_v0, %v3179_v62  ;;  %v1050_v56 = vmul.f32 %v3576_v33, %v1030_v18 }
 0x37d   : > { %4613 = vst [vmem:[#allocation8_spill] sm:$0xff] %v3599_v8  ;;  %2791 = vrsqrt.f32 %v1005_v59  ;;  %v991_v13 = vmul.f32 0.03125, %v969_v60  ;;  %v972_v43 = vpop.xlane.xlu1 %971  ;;  %v1102_v61 = vsel %vm448_vm0, %v3599_v8, 0.0  ;;  %v1051_v50 = vmul.f32 %v3576_v33, %v1031_v21 }
 0x37e   : > { %4614 = vst [vmem:[#allocation9_spill] sm:$0xff] %v3603_v32  ;;  %2793 = vrsqrt.f32 %v1006_v25  ;;  %v992_v5 = vmul.f32 0.03125, %v972_v43  ;;  %1103 = vadd.xlane.f32.xlu1 %v1102_v61  ;;  %v1105_v19 = vsel %vm448_vm0, %v3603_v32, 0.0  ;;  %v1070_v47 = vadd.f32 %v3582_v26, %v1050_v56 }
 0x37f   : > { %v2784_v62 = vpop.eup %2783  ;;  %v1007_v34 = vadd.f32 1e-05, %v991_v13  ;;  %1106 = vadd.xlane.f32.xlu0 %v1105_v19  ;;  %v1071_v46 = vadd.f32 %v3582_v26, %v1051_v50  ;;  %v1032_v29 = vmul.f32 %v2782_v17, %v3504_v20 }
 0x380   : > { %v2786_v3 = vpop.eup %2785  ;;  %v1008_v45 = vadd.f32 1e-05, %v992_v5  ;;  %v975_v51 = vpop.xlane.xlu0 %974  ;;  %v3615_v52 = vadd.f32 %v1070_v47, %v3183_v2  ;;  %v1033_v55 = vmul.f32 %v2784_v62, %v3513_v38 }
 0x381   : > { %2795 = vrsqrt.f32 %v1007_v34  ;;  %v993_v54 = vmul.f32 0.03125, %v975_v51  ;;  %v978_v48 = vpop.xlane.xlu1 %977  ;;  %v3619_v42 = vadd.f32 %v1071_v46, %v3197_v12  ;;  %v1052_v10 = vmul.f32 %v3576_v33, %v1032_v29 }
 0x382   : > { %4615 = vst [vmem:[#allocation10_spill] sm:$0xff] %v3615_v52  ;;  %2797 = vrsqrt.f32 %v1008_v45  ;;  %v994_v9 = vmul.f32 0.03125, %v978_v48  ;;  %v1108_v20 = vsel %vm448_vm0, %v3615_v52, 0.0  ;;  %v1053_v49 = vmul.f32 %v3576_v33, %v1033_v55 }
 0x383   : > { %4616 = vst [vmem:[#allocation11_spill] sm:$0xff] %v3619_v42  ;;  %v2788_v4 = vpop.eup %2787  ;;  %v1009_v2 = vadd.f32 1e-05, %v993_v54  ;;  %1109 = vadd.xlane.f32.xlu1 %v1108_v20  ;;  %v1111_v38 = vsel %vm448_vm0, %v3619_v42, 0.0  ;;  %v1072_v53 = vadd.f32 %v3582_v26, %v1052_v10  ;;  %v1034_v12 = vmul.f32 %v2786_v3, %v3516_v6 }
 0x384   : > { %v2790_v30 = vpop.eup %2789  ;;  %v1010_v58 = vadd.f32 1e-05, %v994_v9  ;;  %1112 = vadd.xlane.f32.xlu0 %v1111_v38  ;;  %v1073_v14 = vadd.f32 %v3582_v26, %v1053_v49  ;;  %v1035_v0 = vmul.f32 %v2788_v4, %v3524_v31 }
 0x385   : > { %2799 = vrsqrt.f32 %v1009_v2  ;;  %v3632_v18 = vadd.f32 %v1072_v53, %v3201_v16  ;;  %v1054_v59 = vmul.f32 %v3576_v33, %v1034_v12  ;;  %v1036_v21 = vmul.f32 %v2790_v30, %v3528_v37 }
 0x386   : > { %2801 = vrsqrt.f32 %v1010_v58  ;;  %v3637_v17 = vadd.f32 %v1073_v14, %v3195_v11  ;;  %v1055_v6 = vmul.f32 %v3576_v33, %v1035_v0 }
 0x387   : > { %4617 = vst [vmem:[#allocation12_spill] sm:$0xff] %v3632_v18  ;;  %v2792_v25 = vpop.eup %2791  ;;  %v1114_v60 = vsel %vm448_vm0, %v3632_v18, 0.0  ;;  %v1074_v31 = vadd.f32 %v3582_v26, %v1054_v59  ;;  %v1056_v56 = vmul.f32 %v3576_v33, %v1036_v21 }
 0x388   : > { %4618 = vst [vmem:[#allocation13_spill] sm:$0xff] %v3637_v17  ;;  %v2794_v16 = vpop.eup %2793  ;;  %1115 = vadd.xlane.f32.xlu1 %v1114_v60  ;;  %v1117_v13 = vsel %vm448_vm0, %v3637_v17, 0.0  ;;  %v1075_v37 = vadd.f32 %v3582_v26, %v1055_v6  ;;  %v1037_v11 = vmul.f32 %v2792_v25, %v3536_v57 }
 0x389   : > { %1118 = vadd.xlane.f32.xlu0 %v1117_v13  ;;  %v3649_v43 = vadd.f32 %v1074_v31, %v3199_v15  ;;  %v1076_v61 = vadd.f32 %v3582_v26, %v1056_v56  ;;  %v1038_v50 = vmul.f32 %v2794_v16, %v3540_v1 }
 0x38a   : > { %v3654_v5 = vadd.f32 %v1075_v37, %v3213_v24  ;;  %v1057_v19 = vmul.f32 %v3576_v33, %v1037_v11 }
 0x38b   : > { %4619 = vst [vmem:[#allocation14_spill] sm:$0xff] %v3649_v43  ;;  %v2796_v47 = vpop.eup %2795  ;;  %v1120_v62 = vsel %vm448_vm0, %v3649_v43, 0.0  ;;  %v3660_v34 = vadd.f32 %v1076_v61, %v3217_v28  ;;  %v1058_v57 = vmul.f32 %v3576_v33, %v1038_v50 }
 0x38c   : > { %4620 = vst [vmem:[#allocation15_spill] sm:$0xff] %v3654_v5  ;;  %v2798_v15 = vpop.eup %2797  ;;  %1121 = vadd.xlane.f32.xlu1 %v1120_v62  ;;  %v1123_v46 = vsel %vm448_vm0, %v3654_v5, 0.0  ;;  %v1077_v1 = vadd.f32 %v3582_v26, %v1057_v19  ;;  %v1039_v24 = vmul.f32 %v2796_v47, %v3548_v44 }
 0x38d   : > { %4621 = vst [vmem:[#allocation16_spill] sm:$0xff] %v3660_v34  ;;  %1124 = vadd.xlane.f32.xlu0 %v1123_v46  ;;  %v1126_v29 = vsel %vm448_vm0, %v3660_v34, 0.0  ;;  %v1078_v3 = vadd.f32 %v3582_v26, %v1058_v57  ;;  %v1040_v28 = vmul.f32 %v2798_v15, %v3552_v7 }
 0x38e   : > { %v3672_v45 = vadd.f32 %v1077_v1, %v3211_v23  ;;  %v1059_v51 = vmul.f32 %v3576_v33, %v1039_v24 }
 0x38f   : > { %v2800_v55 = vpop.eup %2799  ;;  %v3676_v54 = vadd.f32 %v1078_v3, %v3215_v27  ;;  %v1060_v48 = vmul.f32 %v3576_v33, %v1040_v28 }
 0x390   : > { %4622 = vst [vmem:[#allocation17_spill] sm:$0xff] %v3672_v45  ;;  %v2802_v44 = vpop.eup %2801  ;;  %1127 = vadd.xlane.f32.xlu1 %v1126_v29  ;;  %v1129_v10 = vsel %vm448_vm0, %v3672_v45, 0.0  ;;  %v1079_v9 = vadd.f32 %v3582_v26, %v1059_v51  ;;  %v1041_v7 = vmul.f32 %v2800_v55, %v3560_v22 }
 0x391   : > { %4623 = vst [vmem:[#allocation18_spill] sm:$0xff] %v3676_v54  ;;  %1130 = vadd.xlane.f32.xlu0 %v1129_v10  ;;  %v1132_v23 = vsel %vm448_vm0, %v3676_v54, 0.0  ;;  %v1080_v20 = vadd.f32 %v3582_v26, %v1060_v48  ;;  %v1042_v27 = vmul.f32 %v2802_v44, %v3564_v41 }
 0x392   : > { %v3688_v49 = vadd.f32 %v1079_v9, %v3229_v36  ;;  %v1061_v4 = vmul.f32 %v3576_v33, %v1041_v7 }
 0x393   : > { %v3692_v2 = vadd.f32 %v1080_v20, %v3233_v40  ;;  %v1062_v38 = vmul.f32 %v3576_v33, %v1042_v27 }
 0x394   : > { %4624 = vst [vmem:[#allocation19_spill] sm:$0xff] %v3688_v49  ;;  %1133 = vadd.xlane.f32.xlu1 %v1132_v23  ;;  %v1135_v22 = vsel %vm448_vm0, %v3688_v49, 0.0  ;;  %v1081_v53 = vadd.f32 %v3582_v26, %v1061_v4 }
 0x395   : > { %4625 = vst [vmem:[#allocation20_spill] sm:$0xff] %v3692_v2  ;;  %1136 = vadd.xlane.f32.xlu0 %v1135_v22  ;;  %v1138_v41 = vsel %vm448_vm0, %v3692_v2, 0.0  ;;  %v1082_v36 = vadd.f32 %v3582_v26, %v1062_v38 }
 0x396   : > { %v3702_v12 = vadd.f32 %v1081_v53, %v3227_v35 }
 0x397   : > { %v3705_v40 = vadd.f32 %v1082_v36, %v3231_v39 }
 0x398   : > { %4626 = vst [vmem:[#allocation21_spill] sm:$0xff] %v3702_v12  ;;  %1139 = vadd.xlane.f32.xlu1 %v1138_v41  ;;  %v1141_v33 = vsel %vm448_vm0, %v3702_v12, 0.0 }
 0x399   : > { %4627 = vst [vmem:[#allocation22_spill] sm:$0xff] %v3705_v40  ;;  %1142 = vadd.xlane.f32.xlu0 %v1141_v33  ;;  %v1144_v30 = vsel %vm448_vm0, %v3705_v40, 0.0 }
 0x39c   : > { %1145 = vadd.xlane.f32.xlu1 %v1144_v30 }
 0x407   : > { %v1101_v58 = vpop.xlane.xlu0 %1100 }
 0x408   : > { %v1147_v14 = vmul.f32 0.03125, %v1101_v58 }
 0x40a   : > { %v3712_v0 = vsub.f32 %v3589_v63, %v1147_v14 }
 0x40b   : > { %v1104_v26 = vpop.xlane.xlu1 %1103 }
 0x40c   : > { %v1148_v35 = vmul.f32 0.03125, %v1104_v26  ;;  %v1107_v59 = vpop.xlane.xlu0 %1106  ;;  %v1179_v39 = vmul.f32 %v3712_v0, %v3712_v0 }
 0x40d   : > { %v1149_v21 = vmul.f32 0.03125, %v1107_v59 }
 0x40e   : > { %v3717_v6 = vsub.f32 %v3599_v8, %v1148_v35  ;;  %v1195_v25 = vsel %vm448_vm0, %v1179_v39, 0.0 }
 0x40f   : > { %v3721_v60 = vsub.f32 %v3603_v32, %v1149_v21  ;;  %1196 = vadd.xlane.f32.xlu0 %v1195_v25 }
 0x410   : > { %v1110_v31 = vpop.xlane.xlu1 %1109  ;;  %v1180_v56 = vmul.f32 %v3717_v6, %v3717_v6 }
 0x411   : > { %v1150_v16 = vmul.f32 0.03125, %v1110_v31  ;;  %v1113_v13 = vpop.xlane.xlu0 %1112  ;;  %v1181_v37 = vmul.f32 %v3721_v60, %v3721_v60 }
 0x412   : > { %v1151_v11 = vmul.f32 0.03125, %v1113_v13  ;;  %v1198_v61 = vsel %vm448_vm0, %v1180_v56, 0.0 }
 0x413   : > { %v3729_v50 = vsub.f32 %v3615_v52, %v1150_v16  ;;  %1199 = vadd.xlane.f32.xlu1 %v1198_v61  ;;  %v1201_v19 = vsel %vm448_vm0, %v1181_v37, 0.0 }
 0x414   : > { %v3733_v47 = vsub.f32 %v3619_v42, %v1151_v11  ;;  %1202 = vadd.xlane.f32.xlu0 %v1201_v19 }
 0x415   : > { %v1116_v62 = vpop.xlane.xlu1 %1115  ;;  %v1182_v57 = vmul.f32 %v3729_v50, %v3729_v50 }
 0x416   : > { %v1152_v15 = vmul.f32 0.03125, %v1116_v62  ;;  %v1119_v46 = vpop.xlane.xlu0 %1118  ;;  %v1183_v1 = vmul.f32 %v3733_v47, %v3733_v47 }
 0x417   : > { %v1153_v24 = vmul.f32 0.03125, %v1119_v46  ;;  %v1204_v29 = vsel %vm448_vm0, %v1182_v57, 0.0 }
 0x418   : > { %v3741_v3 = vsub.f32 %v3632_v18, %v1152_v15  ;;  %1205 = vadd.xlane.f32.xlu1 %v1204_v29  ;;  %v1207_v28 = vsel %vm448_vm0, %v1183_v1, 0.0 }
 0x419   : > { %v3745_v51 = vsub.f32 %v3637_v17, %v1153_v24  ;;  %v1122_v55 = vpop.xlane.xlu1 %1121  ;;  %1208 = vadd.xlane.f32.xlu0 %v1207_v28 }
 0x41a   : > { %v1154_v48 = vmul.f32 0.03125, %v1122_v55  ;;  %v1125_v44 = vpop.xlane.xlu0 %1124  ;;  %v1184_v10 = vmul.f32 %v3741_v3, %v3741_v3 }
 0x41b   : > { %v1155_v9 = vmul.f32 0.03125, %v1125_v44  ;;  %v1185_v7 = vmul.f32 %v3745_v51, %v3745_v51 }
 0x41c   : > { %v3752_v23 = vsub.f32 %v3649_v43, %v1154_v48  ;;  %v1210_v20 = vsel %vm448_vm0, %v1184_v10, 0.0 }
 0x41d   : > { %v3756_v27 = vsub.f32 %v3654_v5, %v1155_v9  ;;  %1211 = vadd.xlane.f32.xlu1 %v1210_v20  ;;  %v1128_v4 = vpop.xlane.xlu1 %1127  ;;  %v1213_v38 = vsel %vm448_vm0, %v1185_v7, 0.0 }
 0x41e   : > { %v1156_v22 = vmul.f32 0.03125, %v1128_v4  ;;  %1214 = vadd.xlane.f32.xlu0 %v1213_v38  ;;  %v1131_v53 = vpop.xlane.xlu0 %1130  ;;  %v1186_v41 = vmul.f32 %v3752_v23, %v3752_v23  ;;  %v2723_v38 = vld [vmem:[%s4584_s5 + $0x4] ss:$8 sps:$4 sm:$0xff]  }
 0x41f   : > { %v1157_v36 = vmul.f32 0.03125, %v1131_v53  ;;  %v1187_v33 = vmul.f32 %v3756_v27, %v3756_v27  ;;  %1415 = vmatprep.subr.bf16.mxu1 %v2723_v38  ;;  %v2726_v53 = vld [vmem:[%s4584_s5 + $0x14] ss:$8 sps:$4 sm:$0xff]  }
 0x420   : > { %v3764_v30 = vsub.f32 %v3660_v34, %v1156_v22  ;;  %v1216_v58 = vsel %vm448_vm0, %v1186_v41, 0.0  ;;  %v2725_v22 = vld [vmem:[%s4584_s5] ss:$8 sps:$4 sm:$0xff]   ;;  %v2728_v41 = vld [vmem:[%s4584_s5 + $0x10] ss:$8 sps:$4 sm:$0xff]  }
 0x421   : > { %v3768_v14 = vsub.f32 %v3672_v45, %v1157_v36  ;;  %1217 = vadd.xlane.f32.xlu1 %v1216_v58  ;;  %v1134_v26 = vpop.xlane.xlu1 %1133  ;;  %v1219_v35 = vsel %vm448_vm0, %v1187_v33, 0.0  ;;  %1416 = vmatpush1.bf16.msra.mxu1 %v2725_v22  ;;  %v3011_v36 = vmov 0  }
 0x422   : > { %v1158_v59 = vmul.f32 0.03125, %v1134_v26  ;;  %1220 = vadd.xlane.f32.xlu0 %v1219_v35  ;;  %v1137_v39 = vpop.xlane.xlu0 %1136  ;;  %v1188_v21 = vmul.f32 %v3764_v30, %v3764_v30  ;;  %1417 = vmatprep.subr.bf16.mxu1 %v2726_v53 }
 0x423   : > { %v1159_v25 = vmul.f32 0.03125, %v1137_v39  ;;  %v1189_v31 = vmul.f32 %v3768_v14, %v3768_v14  ;;  %1447 = vmatprep.mubr.bf16.mxu1 %v3011_v36 }
 0x424   : > { %v3776_v56 = vsub.f32 %v3676_v54, %v1158_v59  ;;  %v1222_v16 = vsel %vm448_vm0, %v1188_v21, 0.0 }
 0x425   : > { %v3780_v13 = vsub.f32 %v3688_v49, %v1159_v25  ;;  %1223 = vadd.xlane.f32.xlu1 %v1222_v16  ;;  %v1140_v37 = vpop.xlane.xlu1 %1139  ;;  %v1225_v11 = vsel %vm448_vm0, %v1189_v31, 0.0  ;;  %1418 = vmatpush1.bf16.msra.mxu1 %v2728_v41 }
 0x426   : > { %v1160_v61 = vmul.f32 0.03125, %v1140_v37  ;;  %1226 = vadd.xlane.f32.xlu0 %v1225_v11  ;;  %v1143_v19 = vpop.xlane.xlu0 %1142  ;;  %v1190_v62 = vmul.f32 %v3776_v56, %v3776_v56 }
 0x427   : > { %v1161_v57 = vmul.f32 0.03125, %v1143_v19  ;;  %v1191_v15 = vmul.f32 %v3780_v13, %v3780_v13 }
 0x428   : > { %v3788_v46 = vsub.f32 %v3692_v2, %v1160_v61  ;;  %v1228_v1 = vsel %vm448_vm0, %v1190_v62, 0.0 }
 0x429   : > { %v3792_v24 = vsub.f32 %v3702_v12, %v1161_v57  ;;  %1229 = vadd.xlane.f32.xlu1 %v1228_v1  ;;  %v1146_v29 = vpop.xlane.xlu1 %1145  ;;  %v1231_v28 = vsel %vm448_vm0, %v1191_v15, 0.0 }
 0x42a   : > { %v1162_v55 = vmul.f32 0.03125, %v1146_v29  ;;  %1232 = vadd.xlane.f32.xlu0 %v1231_v28  ;;  %v1192_v48 = vmul.f32 %v3788_v46, %v3788_v46 }
 0x42b   : > { %v1193_v44 = vmul.f32 %v3792_v24, %v3792_v24 }
 0x42c   : > { %v3800_v10 = vsub.f32 %v3705_v40, %v1162_v55  ;;  %v1234_v9 = vsel %vm448_vm0, %v1192_v48, 0.0  ;;  %v3824_v48 = vld [vmem:[%s4581_s2 + $0x5] ss:$0 sm:$0xff] }
 0x42d   : > { %1235 = vadd.xlane.f32.xlu1 %v1234_v9  ;;  %v1237_v7 = vsel %vm448_vm0, %v1193_v44, 0.0 }
 0x42e   : > { %1238 = vadd.xlane.f32.xlu0 %v1237_v7  ;;  %v1194_v20 = vmul.f32 %v3800_v10, %v3800_v10 }
 0x430   : > { %v1240_v4 = vsel %vm448_vm0, %v1194_v20, 0.0 }
 0x431   : > { %1241 = vadd.xlane.f32.xlu1 %v1240_v4 }
 0x49c   : > { %v1197_v33 = vpop.xlane.xlu0 %1196 }
 0x49d   : > { %v1243_v58 = vmul.f32 0.03125, %v1197_v33 }
 0x49f   : > { %v1259_v26 = vadd.f32 1e-05, %v1243_v58 }
 0x4a0   : > { %v1200_v35 = vpop.xlane.xlu1 %1199 }
 0x4a1   : > { %2803 = vrsqrt.f32 %v1259_v26  ;;  %v1244_v59 = vmul.f32 0.03125, %v1200_v35  ;;  %v1203_v39 = vpop.xlane.xlu0 %1202 }
 0x4a2   : > { %v1245_v21 = vmul.f32 0.03125, %v1203_v39 }
 0x4a3   : > { %v1260_v25 = vadd.f32 1e-05, %v1244_v59 }
 0x4a4   : > { %v1261_v31 = vadd.f32 1e-05, %v1245_v21 }
 0x4a5   : > { %2805 = vrsqrt.f32 %v1260_v25  ;;  %v1206_v16 = vpop.xlane.xlu1 %1205 }
 0x4a6   : > { %v1246_v37 = vmul.f32 0.03125, %v1206_v16  ;;  %v1209_v11 = vpop.xlane.xlu0 %1208  ;;  %2807 = vrsqrt.f32 %v1261_v31 }
 0x4a7   : > { %v1247_v61 = vmul.f32 0.03125, %v1209_v11 }
 0x4a8   : > { %v1262_v19 = vadd.f32 1e-05, %v1246_v37 }
 0x4a9   : > { %v1263_v62 = vadd.f32 1e-05, %v1247_v61 }
 0x4aa   : > { %2809 = vrsqrt.f32 %v1262_v19  ;;  %v1212_v57 = vpop.xlane.xlu1 %1211 }
 0x4ab   : > { %v2804_v15 = vpop.eup %2803  ;;  %v1248_v1 = vmul.f32 0.03125, %v1212_v57  ;;  %v1215_v28 = vpop.xlane.xlu0 %1214  ;;  %2811 = vrsqrt.f32 %v1263_v62 }
 0x4ac   : > { %v1291_v29 = vmul.f32 %v2804_v15, %v3712_v0  ;;  %v1249_v7 = vmul.f32 0.03125, %v1215_v28  ;;  %v3831_v0 = vld [vmem:[%s4581_s2 + $0x6] ss:$0 sm:$0xff] }
 0x4ad   : > { %v1264_v55 = vadd.f32 1e-05, %v1248_v1 }
 0x4ae   : > { %v1218_v44 = vpop.xlane.xlu1 %1217  ;;  %v1311_v38 = vmul.f32 %v3824_v48, %v1291_v29  ;;  %v1265_v58 = vadd.f32 1e-05, %v1249_v7 }
 0x4af   : > { %v2806_v9 = vpop.eup %2805  ;;  %2813 = vrsqrt.f32 %v1264_v55  ;;  %v1250_v20 = vmul.f32 0.03125, %v1218_v44  ;;  %v1221_v59 = vpop.xlane.xlu0 %1220 }
 0x4b0   : > { %v1292_v4 = vmul.f32 %v2806_v9, %v3717_v6  ;;  %v2808_v22 = vpop.eup %2807  ;;  %v1331_v39 = vadd.f32 %v3831_v0, %v1311_v38  ;;  %v1251_v16 = vmul.f32 0.03125, %v1221_v59 }
 0x4b1   : > { %v1266_v53 = vadd.f32 1e-05, %v1250_v20  ;;  %v1293_v35 = vmul.f32 %v2808_v22, %v3721_v60 }
 0x4b2   : > { %v1224_v41 = vpop.xlane.xlu1 %1223  ;;  %v1312_v33 = vmul.f32 %v3824_v48, %v1292_v4  ;;  %v1267_v15 = vadd.f32 1e-05, %v1251_v16 }
 0x4b3   : > { %2815 = vrsqrt.f32 %v1266_v53  ;;  %v1252_v25 = vmul.f32 0.03125, %v1224_v41  ;;  %v1313_v61 = vmul.f32 %v3824_v48, %v1293_v35  ;;  %v1227_v29 = vpop.xlane.xlu0 %1226 }
 0x4b4   : > { %v2810_v26 = vpop.eup %2809  ;;  %v1332_v6 = vadd.f32 %v3831_v0, %v1312_v33  ;;  %2817 = vrsqrt.f32 %v1265_v58  ;;  %v1253_v20 = vmul.f32 0.03125, %v1227_v29 }
 0x4b5   : > { %v1294_v21 = vmul.f32 %v2810_v26, %v3729_v50  ;;  %v2812_v11 = vpop.eup %2811  ;;  %v1268_v19 = vadd.f32 1e-05, %v1252_v25  ;;  %v1333_v28 = vadd.f32 %v3831_v0, %v1313_v61 }
 0x4b6   : > { %v1347_v31 = vpack.c.bf16 %v1332_v6, %v1331_v39  ;;  %v1230_v57 = vpop.xlane.xlu1 %1229  ;;  %v1295_v1 = vmul.f32 %v2812_v11, %v3733_v47  ;;  %v1269_v41 = vadd.f32 1e-05, %v1253_v20 }
 0x4b7   : > { %v1314_v37 = vmul.f32 %v3824_v48, %v1294_v21  ;;  %2819 = vrsqrt.f32 %v1268_v19  ;;  %v1254_v55 = vmul.f32 0.03125, %v1230_v57  ;;  %v1233_v58 = vpop.xlane.xlu0 %1232 }
 0x4b8   : > { %2489 = vmatmul.mubr.msk.bf16.vlgmr.msra.gmra.mrb[0].mxu1 %vm448_vm0, %v1347_v31  ;;  %2821 = vrsqrt.f32 %v1267_v15  ;;  %v1255_v21 = vmul.f32 0.03125, %v1233_v58 }
 0x4b9   : > { %v2814_v60 = vpop.eup %2813  ;;  %1457 = vmatprep.mubr.bf16.mxu1 %v3011_v36  ;;  %v1334_v50 = vadd.f32 %v3831_v0, %v1314_v37  ;;  %v1270_v38 = vadd.f32 1e-05, %v1254_v55 }
 0x4ba   : > { %v1296_v62 = vmul.f32 %v2814_v60, %v3741_v3  ;;  %v1315_v3 = vmul.f32 %v3824_v48, %v1295_v1  ;;  %v1236_v22 = vpop.xlane.xlu1 %1235  ;;  %v1271_v11 = vadd.f32 1e-05, %v1255_v21 }
 0x4bb   : > { %v1348_v44 = vpack.c.bf16 %v1334_v50, %v1333_v28  ;;  %2823 = vrsqrt.f32 %v1270_v38  ;;  %v1256_v35 = vmul.f32 0.03125, %v1236_v22  ;;  %v1239_v60 = vpop.xlane.xlu0 %1238 }
 0x4bc   : > { %v1316_v9 = vmul.f32 %v3824_v48, %v1296_v62  ;;  %v1335_v26 = vadd.f32 %v3831_v0, %v1315_v3  ;;  %2825 = vrsqrt.f32 %v1269_v41  ;;  %v1257_v1 = vmul.f32 0.03125, %v1239_v60 }
 0x4bd   : > { %v2816_v7 = vpop.eup %2815  ;;  %v1272_v31 = vadd.f32 1e-05, %v1256_v35 }
 0x4be   : > { %v2818_v4 = vpop.eup %2817  ;;  %v1298_v47 = vmul.f32 %v2816_v7, %v3752_v23  ;;  %v1336_v53 = vadd.f32 %v3831_v0, %v1316_v9  ;;  %v1242_v16 = vpop.xlane.xlu1 %1241 }
 0x4bf   : > { %v1297_v33 = vmul.f32 %v2818_v4, %v3745_v51  ;;  %2827 = vrsqrt.f32 %v1272_v31  ;;  %v1258_v62 = vmul.f32 0.03125, %v1242_v16  ;;  %v2734_v16 = vld [vmem:[%s4585_s6 + $0x28] sm:$0xff]  }
 0x4c0   : > { %2490 = vmatmul.mubr.msk.bf16.gmra.mrb[4].mxu1 %vm448_vm0, %v1348_v44  ;;  %v1349_v59 = vpack.c.bf16 %v1336_v53, %v1335_v26  ;;  %v1318_v39 = vmul.f32 %v3824_v48, %v1298_v47  ;;  %2829 = vrsqrt.f32 %v1271_v11  ;;  %v1273_v44 = vadd.f32 1e-05, %v1257_v1  ;;  %v2736_v11 = vld [vmem:[%s4585_s6 + $0x38] sm:$0xff]  }
 0x4c1   : > { %1467 = vmatprep.mubr.bf16.mxu1 %v3011_v36  ;;  %v2820_v6 = vpop.eup %2819  ;;  %v1317_v23 = vmul.f32 %v3824_v48, %v1297_v33  ;;  %v1274_v28 = vadd.f32 1e-05, %v1258_v62  ;;  %v1359_v62 = vld [vmem:[%s4582_s3] sm:$0x3] }
 0x4c2   : > { %v2822_v25 = vpop.eup %2821  ;;  %v1300_v51 = vmul.f32 %v2820_v6, %v3764_v30  ;;  %v1338_v37 = vadd.f32 %v3831_v0, %v1318_v39 }
 0x4c3   : > { %v1299_v61 = vmul.f32 %v2822_v25, %v3756_v27  ;;  %v1337_v19 = vadd.f32 %v3831_v0, %v1317_v23  ;;  %2831 = vrsqrt.f32 %v1274_v28 }
 0x4c4   : > { %v1320_v50 = vmul.f32 %v3824_v48, %v1300_v51  ;;  %2833 = vrsqrt.f32 %v1273_v44  ;;  %v2733_v51 = vld [vmem:[%s4585_s6 + $0x20] sm:$0xff]  }
 0x4c5   : > { %v1350_v57 = vpack.c.bf16 %v1338_v37, %v1337_v19  ;;  %v2824_v15 = vpop.eup %2823  ;;  %v1319_v30 = vmul.f32 %v3824_v48, %v1299_v61  ;;  %v2735_v37 = vld [vmem:[%s4585_s6 + $0x30] sm:$0xff]   ;;  %v1361_v61 = vlaneseq }
 0x4c6   : > { %v2826_v29 = vpop.eup %2825  ;;  %v1302_v27 = vmul.f32 %v2824_v15, %v3776_v56  ;;  %v1340_v55 = vadd.f32 %v3831_v0, %v1320_v50 }
 0x4c7   : > { %v1301_v9 = vmul.f32 %v2826_v29, %v3768_v14  ;;  %v1339_v7 = vadd.f32 %v3831_v0, %v1319_v30  ;;  %v1362_v60 = vshrl.u32 %v1361_v61, 7 }
 0x4c8   : > { %2491 = vmatmul.mubr.msk.bf16.gmra.mrb[8].mxu1 %vm448_vm0, %v1349_v59  ;;  %v1322_v3 = vmul.f32 %v3824_v48, %v1302_v27 }
 0x4c9   : > { %1477 = vmatprep.mubr.bf16.mxu1 %v3011_v36  ;;  %v1351_v20 = vpack.c.bf16 %v1340_v55, %v1339_v7  ;;  %v2828_v4 = vpop.eup %2827  ;;  %v1321_v38 = vmul.f32 %v3824_v48, %v1301_v9  ;;  %v1367_v19 = vsub.s32 1, %v1362_v60 }
 0x4ca   : > { %v2830_v47 = vpop.eup %2829  ;;  %v1304_v56 = vmul.f32 %v2828_v4, %v3788_v46  ;;  %v1342_v22 = vadd.f32 %v3831_v0, %v1322_v3 }
 0x4cb   : > { %v1303_v14 = vmul.f32 %v2830_v47, %v3780_v13  ;;  %v1341_v53 = vadd.f32 %v3831_v0, %v1321_v38 }
 0x4cc   : > { %v1324_v33 = vmul.f32 %v3824_v48, %v1304_v56 }
 0x4cd   : > { %v1352_v41 = vpack.c.bf16 %v1342_v22, %v1341_v53  ;;  %v2832_v58 = vpop.eup %2831  ;;  %v1323_v26 = vmul.f32 %v3824_v48, %v1303_v14 }
 0x4ce   : > { %v2834_v35 = vpop.eup %2833  ;;  %v1306_v59 = vmul.f32 %v2832_v58, %v3800_v10  ;;  %v1344_v46 = vadd.f32 %v3831_v0, %v1324_v33 }
 0x4cf   : > { %v1305_v39 = vmul.f32 %v2834_v35, %v3792_v24  ;;  %v1343_v13 = vadd.f32 %v3831_v0, %v1323_v26  ;;  %v2729_v24 = vld [vmem:[%s4585_s6] sm:$0xff]  }
 0x4d0   : > { %2492 = vmatmul.mubr.msk.bf16.gmra.mrb[12].mxu1 %vm448_vm0, %v1350_v57  ;;  %v1326_v21 = vmul.f32 %v3824_v48, %v1306_v59  ;;  %2579 = vmatprep.subr.bf16.mxu0 %v2729_v24  ;;  %v3920_v57 = vrot.slane %v1359_v62, %v1367_v19 }
 0x4d1   : > { %1487 = vmatprep.mubr.bf16.mxu1 %v3011_v36  ;;  %v1353_v6 = vpack.c.bf16 %v1344_v46, %v1343_v13  ;;  %v1325_v23 = vmul.f32 %v3824_v48, %v1305_v39  ;;  %2631 = vmatprep.subr.bf16.mxu1 %v2729_v24  ;;  %v2730_v48 = vld [vmem:[%s4585_s6 + $0x8] sm:$0xff]  }
 0x4d2   : > { %v1346_v25 = vadd.f32 %v3831_v0, %v1326_v21  ;;  %2580 = vmatpush3.bf16.msra.mxu0 %v2729_v24  ;;  %2639 = vmatpush3.bf16.msra.mxu1 %v2729_v24 }
 0x4d3   : > { %v1345_v31 = vadd.f32 %v3831_v0, %v1325_v23  ;;  %2581 = vmatprep.subr.bf16.mxu0 %v2730_v48  ;;  %2632 = vmatprep.subr.bf16.mxu1 %v2730_v48  ;;  %v2732_v0 = vld [vmem:[%s4585_s6 + $0x18] sm:$0xff]  }
 0x4d5   : > { %v1354_v10 = vpack.c.bf16 %v1346_v25, %v1345_v31  ;;  %v1363_v31 = vsub.s32 0, %v1362_v60 }
 0x4d6   : > { %2582 = vmatpush3.bf16.msra.mxu0 %v2730_v48  ;;  %2640 = vmatpush3.bf16.msra.mxu1 %v2730_v48 }
 0x4d7   : > { %v3985_v19 = vrot.slane %v1359_v62, %v1363_v31 }
 0x4d8   : > { %2493 = vmatmul.mubr.msk.bf16.gmra.mrb[16].mxu1 %vm448_vm0, %v1351_v20 }
 0x4d9   : > { %1497 = vmatprep.mubr.bf16.mxu1 %v3011_v36 }
 0x4e0   : > { %2494 = vmatmul.mubr.msk.bf16.gmra.mrb[20].mxu1 %vm448_vm0, %v1352_v41 }
 0x4e1   : > { %1507 = vmatprep.mubr.bf16.mxu1 %v3011_v36 }
 0x4e8   : > { %2495 = vmatmul.mubr.msk.bf16.gmra.mrb[24].mxu1 %vm448_vm0, %v1353_v6 }
 0x4e9   : > { %1517 = vmatprep.mubr.bf16.mxu1 %v3011_v36  ;;  %v2731_v36 = vld [vmem:[%s4585_s6 + $0x10] sm:$0xff]  }
 0x4ea   : > { %2583 = vmatprep.subr.bf16.mxu0 %v2731_v36  ;;  %2633 = vmatprep.subr.bf16.mxu1 %v2731_v36 }
 0x4eb   : > { %2584 = vmatpush3.bf16.msra.mxu0 %v2731_v36  ;;  %2641 = vmatpush3.bf16.msra.mxu1 %v2731_v36 }
 0x4ec   : > { %2585 = vmatprep.subr.bf16.mxu0 %v2732_v0  ;;  %2634 = vmatprep.subr.bf16.mxu1 %v2732_v0 }
 0x4ef   : > { %2586 = vmatpush3.bf16.msra.mxu0 %v2732_v0  ;;  %2642 = vmatpush3.bf16.msra.mxu1 %v2732_v0 }
 0x4f0   : > { %2496 = vmatmul.mubr.msk.bf16.gmra.mrb[28].mxu1 %vm448_vm0, %v1354_v10  ;;  %2587 = vmatprep.subr.bf16.mxu0 %v2733_v51 }
 0x4f1   : > { %2635 = vmatprep.subr.bf16.mxu1 %v2733_v51 }
 0x4f3   : > { %2588 = vmatpush3.bf16.msra.mxu0 %v2733_v51  ;;  %2643 = vmatpush3.bf16.msra.mxu1 %v2733_v51 }
 0x4f4   : > { %2589 = vmatprep.subr.bf16.mxu0 %v2734_v16  ;;  %2636 = vmatprep.subr.bf16.mxu1 %v2734_v16 }
 0x4f7   : > { %2590 = vmatpush3.bf16.msra.mxu0 %v2734_v16  ;;  %2644 = vmatpush3.bf16.msra.mxu1 %v2734_v16 }
 0x4f8   : > { %2591 = vmatprep.subr.bf16.mxu0 %v2735_v37  ;;  %2637 = vmatprep.subr.bf16.mxu1 %v2735_v37 }
 0x4fb   : > { %2592 = vmatpush3.bf16.msra.mxu0 %v2735_v37  ;;  %2645 = vmatpush3.bf16.msra.mxu1 %v2735_v37 }
 0x4fc   : > { %2593 = vmatprep.subr.bf16.mxu0 %v2736_v11  ;;  %2638 = vmatprep.subr.bf16.mxu1 %v2736_v11 }
 0x4ff   : > { %2594 = vmatpush3.bf16.msra.mxu0 %v2736_v11  ;;  %2646 = vmatpush3.bf16.msra.mxu1 %v2736_v11 }
 0x58b   : > { %v3922_v50 = vpop.f32.mrb[0].mxu1 }
 0x58c   : > { %v1451_v15 = vpop.f32.mrb[1].mxu1 }
 0x58d   : > { %v3925_v1 = vadd.f32 %v1451_v15, %v3920_v57  ;;  %v3927_v30 = vpop.f32.mrb[2].mxu1 }
 0x58e   : > { %v1455_v29 = vpop.f32.mrb[3].mxu1 }
 0x58f   : > { %v3930_v28 = vmul.f32 0.70710677, %v3925_v1  ;;  %v3933_v27 = vadd.f32 %v1455_v29, %v3920_v57 }
 0x591   : > { %v1560_v55 = vand.u32 2147483647, %v3930_v28  ;;  %v3937_v44 = vmul.f32 0.70710677, %v3933_v27  ;;  %vm1880_vm3 = vcmp.ge.f32.partialorder %v3930_v28, 0.0 }
 0x593   : > { %v1576_v9 = vmul.f32 0.3275911, %v1560_v55  ;;  %v1561_v7 = vand.u32 2147483647, %v3937_v44  ;;  %v3940_v20 = vpop.f32.mrb[4].mxu1  ;;  %v1784_v48 = vsub.f32 0.0, %v1560_v55 }
 0x594   : > { %v1461_v38 = vpop.f32.mrb[5].mxu1  ;;  %vm1881_vm4 = vcmp.ge.f32.partialorder %v3937_v44, 0.0 }
 0x595   : > { %v1592_v3 = vadd.f32 1.0, %v1576_v9  ;;  %v1577_v4 = vmul.f32 0.3275911, %v1561_v7  ;;  %v3943_v47 = vadd.f32 %v1461_v38, %v3920_v57  ;;  %v3945_v56 = vpop.f32.mrb[6].mxu1  ;;  %v1785_v16 = vsub.f32 0.0, %v1561_v7 }
 0x596   : > { %v1465_v14 = vpop.f32.mrb[7].mxu1  ;;  %v4058_v5 = vadd.f32 %v3945_v56, %v3985_v19 }
 0x597   : > { %2835 = vrcp.f32 %v1592_v3  ;;  %v1593_v22 = vadd.f32 1.0, %v1577_v4  ;;  %v3948_v53 = vmul.f32 0.70710677, %v3943_v47  ;;  %v3951_v41 = vadd.f32 %v1465_v14, %v3920_v57 }
 0x598   : > { %v1800_v4 = vmul.f32 %v1784_v48, %v1560_v55  ;;  %v4000_v55 = vadd.f32 %v3922_v50, %v3985_v19 }
 0x599   : > { %2837 = vrcp.f32 %v1593_v22  ;;  %v1562_v33 = vand.u32 2147483647, %v3948_v53  ;;  %v3955_v58 = vmul.f32 0.70710677, %v3951_v41  ;;  %vm1882_vm1 = vcmp.ge.f32.partialorder %v3948_v53, 0.0 }
 0x59b   : > { %v3957_v26 = vpop.f32.mrb[8].mxu1  ;;  %v1578_v35 = vmul.f32 0.3275911, %v1562_v33  ;;  %v1563_v46 = vand.u32 2147483647, %v3955_v58  ;;  %v1786_v29 = vsub.f32 0.0, %v1562_v33 }
 0x59c   : > { %v1471_v59 = vpop.f32.mrb[9].mxu1  ;;  %vm1883_vm2 = vcmp.ge.f32.partialorder %v3955_v58, 0.0 }
 0x59d   : > { %v3961_v39 = vadd.f32 %v1471_v59, %v3920_v57  ;;  %v3963_v13 = vpop.f32.mrb[10].mxu1  ;;  %v1594_v6 = vadd.f32 1.0, %v1578_v35  ;;  %v1579_v23 = vmul.f32 0.3275911, %v1563_v46  ;;  %v1801_v59 = vmul.f32 %v1785_v16, %v1561_v7 }
 0x59e   : > { %v1475_v21 = vpop.f32.mrb[11].mxu1  ;;  %v1787_v31 = vsub.f32 0.0, %v1563_v46  ;;  %v1816_v7 = vmul.f32 1.442695, %v1800_v4 }
 0x59f   : > { %v3966_v25 = vmul.f32 0.70710677, %v3961_v39  ;;  %2839 = vrcp.f32 %v1594_v6  ;;  %v3969_v10 = vadd.f32 %v1475_v21, %v3920_v57  ;;  %v1595_v36 = vadd.f32 1.0, %v1579_v23 }
 0x5a1   : > { %v3971_v24 = vpop.eup %2835  ;;  %v3974_v0 = vand.u32 2147483647, %v3966_v25  ;;  %v3978_v37 = vmul.f32 0.70710677, %v3969_v10  ;;  %2841 = vrcp.f32 %v1595_v36  ;;  %v1802_v36 = vmul.f32 %v1786_v29, %v1562_v33 }
 0x5a2   : > { %v1640_v51 = vmul.f32 1.0614054, %v3971_v24  ;;  %vm1884_vm5 = vcmp.ge.f32.partialorder %v3966_v25, 0.0 }
 0x5a3   : > { %v1580_v11 = vmul.f32 0.3275911, %v3974_v0  ;;  %v3981_v61 = vpop.f32.mrb[12].mxu1  ;;  %v3983_v60 = vpop.eup %2837  ;;  %v3988_v9 = vand.u32 2147483647, %v3978_v37  ;;  %vm1885_vm6 = vcmp.ge.f32.partialorder %v3978_v37, 0.0 }
 0x5a4   : > { %v1656_v15 = vadd.f32 -1.4531521, %v1640_v51  ;;  %v1481_v3 = vpop.f32.mrb[13].mxu1  ;;  %v1641_v38 = vmul.f32 1.0614054, %v3983_v60 }
 0x5a5   : > { %v1596_v22 = vadd.f32 1.0, %v1580_v11  ;;  %v3991_v14 = vpop.f32.mrb[14].mxu1  ;;  %v1581_v6 = vmul.f32 0.3275911, %v3988_v9  ;;  %v3996_v62 = vadd.f32 %v1481_v3, %v3920_v57  ;;  %v4003_v11 = vmul.f32 0.5, %v3925_v1 }
 0x5a6   : > { %v1672_v35 = vmul.f32 %v3971_v24, %v1656_v15  ;;  %v1485_v21 = vpop.f32.mrb[15].mxu1  ;;  %v1657_v23 = vadd.f32 -1.4531521, %v1641_v38  ;;  %v1803_v1 = vmul.f32 %v1787_v31, %v1563_v46  ;;  %v4032_v46 = vadd.f32 %v3940_v20, %v3985_v19 }
 0x5a7   : > { %2843 = vrcp.f32 %v1596_v22  ;;  %v1597_v51 = vadd.f32 1.0, %v1581_v6  ;;  %v4007_v15 = vmul.f32 0.70710677, %v3996_v62  ;;  %v1818_v22 = vmul.f32 1.442695, %v1801_v59 }
 0x5a8   : > { %v1688_v48 = vadd.f32 1.4214138, %v1672_v35  ;;  %v1673_v16 = vmul.f32 %v3983_v60, %v1657_v23  ;;  %v4013_v50 = vadd.f32 %v1485_v21, %v3920_v57  ;;  %v4021_v6 = vadd.f32 %v3927_v30, %v3985_v19 }
 0x5a9   : > { %v4009_v3 = vpop.eup %2839  ;;  %2845 = vrcp.f32 %v1597_v51  ;;  %v4017_v4 = vand.u32 2147483647, %v4007_v15  ;;  %v4024_v23 = vmul.f32 0.5, %v3933_v27  ;;  %v1820_v59 = vmul.f32 1.442695, %v1802_v36 }
 0x5aa   : > { %v1704_v38 = vmul.f32 %v3971_v24, %v1688_v48  ;;  %v1689_v33 = vadd.f32 1.4214138, %v1673_v16  ;;  %v1642_v29 = vmul.f32 1.0614054, %v4009_v3  ;;  %2847 = vpow2.f32 %v1816_v7 }
 0x5ab   : > { %v4026_v48 = vpop.f32.mrb[16].mxu1  ;;  %v4028_v21 = vpop.eup %2841  ;;  %v1582_v51 = vmul.f32 0.3275911, %v4017_v4  ;;  %2849 = vpow2.f32 %v1818_v22  ;;  %v4038_v30 = vmul.f32 0.5, %v3943_v47  ;;  %v4042_v36 = vmul.f32 0.70710677, %v4013_v50 }
 0x5ac   : > { %v1720_v35 = vadd.f32 -0.28449672, %v1704_v38  ;;  %v1658_v31 = vadd.f32 -1.4531521, %v1642_v29  ;;  %v4035_v16 = vpop.f32.mrb[17].mxu1  ;;  %v1705_v7 = vmul.f32 %v3983_v60, %v1689_v33  ;;  %2851 = vpow2.f32 %v1820_v59 }
 0x5ad   : > { %v1643_v27 = vmul.f32 1.0614054, %v4028_v21  ;;  %v4044_v38 = vpop.f32.mrb[18].mxu1  ;;  %v1822_v29 = vmul.f32 1.442695, %v1803_v1  ;;  %v1598_v2 = vadd.f32 1.0, %v1582_v51 }
 0x5ae   : > { %v1674_v20 = vmul.f32 %v4009_v3, %v1658_v31  ;;  %v4048_v49 = vpop.f32.mrb[19].mxu1  ;;  %v1788_v47 = vsub.f32 0.0, %v3974_v0  ;;  %v4052_v40 = vand.u32 2147483647, %v4042_v36  ;;  %v1789_v33 = vsub.f32 0.0, %v3988_v9 }
 0x5af   : > { %v1659_v22 = vadd.f32 -1.4531521, %v1643_v27  ;;  %2853 = vrcp.f32 %v1598_v2  ;;  %v1736_v1 = vmul.f32 %v3971_v24, %v1720_v35  ;;  %v1721_v27 = vadd.f32 -0.28449672, %v1705_v7 }
 0x5b0   : > { %v1690_v34 = vadd.f32 1.4214138, %v1674_v20  ;;  %v1583_v51 = vmul.f32 0.3275911, %v4052_v40  ;;  %v4067_v20 = vmul.f32 0.5, %v3951_v41  ;;  %2855 = vpow2.f32 %v1822_v29 }
 0x5b1   : > { %v4054_v12 = vpop.eup %2843  ;;  %v1675_v59 = vmul.f32 %v4028_v21, %v1659_v22  ;;  %v1804_v35 = vmul.f32 %v1788_v47, %v3974_v0  ;;  %v1790_v41 = vsub.f32 0.0, %v4017_v4  ;;  %v1752_v29 = vadd.f32 0.2548296, %v1736_v1 }
 0x5b2   : > { %v1644_v31 = vmul.f32 1.0614054, %v4054_v12  ;;  %v1706_v54 = vmul.f32 %v4009_v3, %v1690_v34  ;;  %v1599_v22 = vadd.f32 1.0, %v1583_v51  ;;  %v1805_v34 = vmul.f32 %v1789_v33, %v3988_v9 }
 0x5b3   : > { %v4069_v56 = vpop.f32.mrb[20].mxu1  ;;  %v4071_v45 = vpop.eup %2845  ;;  %v1691_v2 = vadd.f32 1.4214138, %v1675_v59  ;;  %v1737_v47 = vmul.f32 %v3983_v60, %v1721_v27  ;;  %v4089_v9 = vadd.f32 %v3957_v26, %v3985_v19  ;;  %v1768_v26 = vmul.f32 %v3971_v24, %v1752_v29 }
 0x5b4   : > { %v1660_v18 = vadd.f32 -1.4531521, %v1644_v31  ;;  %v4074_v42 = vpop.f32.mrb[21].mxu1  ;;  %v1722_v43 = vadd.f32 -0.28449672, %v1706_v54  ;;  %2857 = vrcp.f32 %v1599_v22  ;;  %v2848_v0 = vpop.eup %2847  ;;  %vm1886_vm7 = vcmp.ge.f32.partialorder %v4007_v15, 0.0 }
 0x5b5   : > { %v1645_v7 = vmul.f32 1.0614054, %v4071_v45  ;;  %v4079_v17 = vpop.f32.mrb[22].mxu1  ;;  %v1707_v8 = vmul.f32 %v4028_v21, %v1691_v2  ;;  %v4091_v51 = vpop.eup %2849  ;;  %v1824_v2 = vmul.f32 1.442695, %v1804_v35  ;;  %v4105_v35 = vadd.f32 %v4035_v16, %v3920_v57 }
 0x5b6   : > { %4628 = vst [vmem:[#allocation23_spill] sm:$0xff] %v4079_v17  ;;  %v1676_v59 = vmul.f32 %v4054_v12, %v1660_v18  ;;  %v4083_v31 = vpop.f32.mrb[23].mxu1  ;;  %v1738_v54 = vmul.f32 %v4009_v3, %v1722_v43  ;;  %v4095_v18 = vadd.f32 %v3963_v13, %v3985_v19  ;;  %v1826_v27 = vmul.f32 1.442695, %v1805_v34  ;;  %v2852_v32 = vpop.eup %2851 }
 0x5b7   : > { %v1661_v33 = vadd.f32 -1.4531521, %v1645_v7  ;;  %v1723_v1 = vadd.f32 -0.28449672, %v1707_v8  ;;  %v1806_v43 = vmul.f32 %v1790_v41, %v4017_v4  ;;  %v1791_v4 = vsub.f32 0.0, %v4052_v40 }
 0x5b8   : > { %v1692_v63 = vadd.f32 1.4214138, %v1676_v59  ;;  %4629 = vst [vmem:[#allocation24_spill] sm:$0xff] %v4095_v18  ;;  %v1754_v22 = vadd.f32 0.2548296, %v1738_v54  ;;  %2859 = vpow2.f32 %v1824_v2  ;;  %vm1887_vm8 = vcmp.ge.f32.partialorder %v4042_v36, 0.0 }
 0x5b9   : > { %v1677_v52 = vmul.f32 %v4071_v45, %v1661_v33  ;;  %v1739_v7 = vmul.f32 %v4028_v21, %v1723_v1  ;;  %v4107_v13 = vpop.eup %2853  ;;  %v1753_v59 = vadd.f32 0.2548296, %v1737_v47  ;;  %2861 = vpow2.f32 %v1826_v27 }
 0x5ba   : > { %v1708_v8 = vmul.f32 %v4054_v12, %v1692_v63  ;;  %v1770_v34 = vmul.f32 %v4009_v3, %v1754_v22  ;;  %v1646_v33 = vmul.f32 1.0614054, %v4107_v13  ;;  %v2856_v63 = vpop.eup %2855  ;;  %v1828_v47 = vmul.f32 1.442695, %v1806_v43 }
 0x5bb   : > { %v1693_v54 = vadd.f32 1.4214138, %v1677_v52  ;;  %v4111_v41 = vpop.f32.mrb[24].mxu1  ;;  %v1755_v24 = vadd.f32 0.2548296, %v1739_v7  ;;  %v4118_v52 = vmul.f32 %v2848_v0, %v1768_v26 }
 0x5bc   : > { %4630 = vst [vmem:[#allocation25_spill] sm:$0xff] %v4111_v41  ;;  %v1724_v29 = vadd.f32 -0.28449672, %v1708_v8  ;;  %v1850_v1 = vmul.f32 %v2852_v32, %v1770_v34  ;;  %v4116_v17 = vpop.f32.mrb[25].mxu1  ;;  %v1662_v7 = vadd.f32 -1.4531521, %v1646_v33  ;;  %v1769_v8 = vmul.f32 %v3983_v60, %v1753_v59 }
 0x5bd   : > { %v1709_v16 = vmul.f32 %v4071_v45, %v1693_v54  ;;  %v1771_v3 = vmul.f32 %v4028_v21, %v1755_v24  ;;  %v4122_v2 = vpop.f32.mrb[26].mxu1  ;;  %v4126_v41 = vmul.f32 0.70710677, %v4105_v35  ;;  %v1807_v54 = vmul.f32 %v1791_v4, %v4052_v40 }
 0x5be   : > { %v1740_v22 = vmul.f32 %v4054_v12, %v1724_v29  ;;  %4631 = vst [vmem:[#allocation26_spill] sm:$0xff] %v4122_v2  ;;  %v1866_v32 = vsub.f32 1.0, %v1850_v1  ;;  %v4128_v27 = vpop.f32.mrb[27].mxu1  ;;  %v4130_v43 = vpop.eup %2857  ;;  %v1678_v21 = vmul.f32 %v4107_v13, %v1662_v7  ;;  %2863 = vpow2.f32 %v1828_v47 }
 0x5bf   : > { %v1725_v34 = vadd.f32 -0.28449672, %v1709_v16  ;;  %v1851_v0 = vmul.f32 %v2856_v63, %v1771_v3  ;;  %v1647_v60 = vmul.f32 1.0614054, %v4130_v43  ;;  %v4137_v59 = vand.u32 2147483647, %v4126_v41 }
 0x5c0   : > { %v1756_v26 = vadd.f32 0.2548296, %v1740_v22  ;;  %v1898_v24 = vsub.f32 0.0, %v1866_v32  ;;  %v1694_v16 = vadd.f32 1.4214138, %v1678_v21  ;;  %v4148_v33 = vmul.f32 %v4091_v51, %v1769_v8 }
 0x5c1   : > { %v1741_v29 = vmul.f32 %v4071_v45, %v1725_v34  ;;  %v1867_v1 = vsub.f32 1.0, %v1851_v0  ;;  %v1663_v22 = vadd.f32 -1.4531521, %v1647_v60  ;;  %v1584_v40 = vmul.f32 0.3275911, %v4137_v59 }
 0x5c2   : > { %v1914_v63 = vsel %vm1882_vm1, %v1866_v32, %v1898_v24  ;;  %v1772_v34 = vmul.f32 %v4054_v12, %v1756_v26  ;;  %v1710_v2 = vmul.f32 %v4107_v13, %v1694_v16  ;;  %v1830_v0 = vmul.f32 1.442695, %v1807_v54  ;;  %v2860_v21 = vpop.eup %2859 }
 0x5c3   : > { %v1757_v3 = vadd.f32 0.2548296, %v1741_v29  ;;  %v1930_v4 = vadd.f32 1.0, %v1914_v63  ;;  %v1899_v7 = vsub.f32 0.0, %v1867_v1  ;;  %v4145_v18 = vpop.f32.mrb[28].mxu1  ;;  %v1679_v47 = vmul.f32 %v4130_v43, %v1663_v22  ;;  %v2862_v51 = vpop.eup %2861 }
 0x5c4   : > { %v1600_v53 = vadd.f32 1.0, %v1584_v40  ;;  %v4151_v32 = vpop.f32.mrb[29].mxu1  ;;  %v1726_v12 = vadd.f32 -0.28449672, %v1710_v2  ;;  %v4158_v26 = vadd.f32 %v4048_v49, %v3920_v57  ;;  %v1852_v49 = vmul.f32 %v2860_v21, %v1772_v34 }
 0x5c5   : > { %v1946_v24 = vmul.f32 %v1930_v4, %v4038_v30  ;;  %v1915_v29 = vsel %vm1883_vm2, %v1867_v1, %v1899_v7  ;;  %v4160_v60 = vpop.f32.mrb[30].mxu1  ;;  %v1773_v54 = vmul.f32 %v4071_v45, %v1757_v3  ;;  %v1695_v16 = vadd.f32 1.4214138, %v1679_v47 }
 0x5c6   : > { %v1931_v8 = vadd.f32 1.0, %v1915_v29  ;;  %2865 = vrcp.f32 %v1600_v53  ;;  %v4164_v63 = vpop.f32.mrb[31].mxu1  ;;  %v4170_v30 = vmul.f32 0.5, %v3961_v39  ;;  %v1742_v2 = vmul.f32 %v4107_v13, %v1726_v12 }
 0x5c7   : > { %v4167_v58 = vmul.f32 %v1946_v24, %v4032_v46  ;;  %v4176_v22 = vmul.f32 0.5, %v3969_v10  ;;  %v4180_v45 = vadd.f32 %v3981_v61, %v3985_v19  ;;  %v1711_v46 = vmul.f32 %v4130_v43, %v1695_v16 }
 0x5c8   : > { %v1947_v1 = vmul.f32 %v1931_v8, %v4067_v20  ;;  %v1865_v3 = vsub.f32 1.0, %v4148_v33  ;;  %v1758_v39 = vadd.f32 0.2548296, %v1742_v2  ;;  %2867 = vpow2.f32 %v1830_v0  ;;  %v2864_v34 = vpop.eup %2863 }
 0x5c9   : > { %v4185_v40 = vmul.f32 0.70710677, %v4158_v26  ;;  %v4632_v4 = vsub.f32 1.0, %v4118_v52  ;;  %v1853_v10 = vmul.f32 %v2862_v51, %v1773_v54  ;;  %v1727_v61 = vadd.f32 -0.28449672, %v1711_v46 }
 0x5ca   : > { %v4190_v20 = vmul.f32 %v1947_v1, %v4058_v5  ;;  %v1868_v47 = vsub.f32 1.0, %v1852_v49  ;;  %v1774_v53 = vmul.f32 %v4107_v13, %v1758_v39  ;;  %v1792_v33 = vsub.f32 0.0, %v4137_v59 }
 0x5cb   : > { %v1896_v7 = vsub.f32 0.0, %v4632_v4  ;;  %v1569_v0 = vand.u32 2147483647, %v4185_v40  ;;  %v4199_v24 = vmul.f32 0.5, %v3996_v62  ;;  %v4203_v5 = vadd.f32 %v3991_v14, %v3985_v19 }
 0x5cc   : > { %v1977_v21 = vpack.c.bf16 %v4190_v20, %v4167_v58  ;;  %v1743_v29 = vmul.f32 %v4130_v43, %v1727_v61  ;;  %v1897_v12 = vsub.f32 0.0, %v1865_v3  ;;  %v1854_v13 = vmul.f32 %v2864_v34, %v1774_v53 }
 0x5cd   : > { %v4208_v51 = vmul.f32 0.5, %v4013_v50  ;;  %v1585_v8 = vmul.f32 0.3275911, %v1569_v0  ;;  %v1869_v54 = vsub.f32 1.0, %v1853_v10  ;;  %v4212_v62 = vadd.f32 %v4026_v48, %v3985_v19 }
 0x5ce   : > { %v1759_v16 = vadd.f32 0.2548296, %v1743_v29  ;;  %v4216_v14 = vadd.f32 %v4074_v42, %v3920_v57  ;;  %v4633_v49 = vmov %v4632_v4  ;;  %v1900_v1 = vsub.f32 0.0, %v1868_v47 }
 0x5cf   : > { %v1912_v2 = vsel %vm1880_vm3, %v4633_v49, %v1896_v7  ;;  %v1808_v50 = vmul.f32 %v1792_v33, %v4137_v59  ;;  %v1601_v46 = vadd.f32 1.0, %v1585_v8  ;;  %v1870_v4 = vsub.f32 1.0, %v1854_v13 }
 0x5d0   : > { %v4224_v39 = vpop.eup %2865  ;;  %v1775_v48 = vmul.f32 %v4130_v43, %v1759_v16  ;;  %v4228_v10 = vmul.f32 0.70710677, %v4216_v14  ;;  %v4232_v42 = vadd.f32 %v4083_v31, %v3920_v57  ;;  %v1913_v28 = vsel %vm1881_vm4, %v1865_v3, %v1897_v12 }
 0x5d1   : > { %v1648_v52 = vmul.f32 1.0614054, %v4224_v39  ;;  %2869 = vrcp.f32 %v1601_v46  ;;  %v1793_v59 = vsub.f32 0.0, %v1569_v0  ;;  %v1928_v7 = vadd.f32 1.0, %v1912_v2 }
 0x5d2   : > { %v1901_v61 = vsub.f32 0.0, %v1869_v54  ;;  %v4238_v34 = vmul.f32 0.5, %v4105_v35  ;;  %v1570_v43 = vand.u32 2147483647, %v4228_v10  ;;  %v2868_v53 = vpop.eup %2867  ;;  %v1916_v33 = vsel %vm1884_vm5, %v1868_v47, %v1900_v1 }
 0x5d3   : > { %v1664_v31 = vadd.f32 -1.4531521, %v1648_v52  ;;  %v1832_v29 = vmul.f32 1.442695, %v1808_v50  ;;  %v4244_v44 = vmul.f32 0.70710677, %v4232_v42  ;;  %v1855_v13 = vmul.f32 %v2868_v53, %v1775_v48 }
 0x5d4   : > { %v1929_v3 = vadd.f32 1.0, %v1913_v28  ;;  %v1902_v12 = vsub.f32 0.0, %v1870_v4  ;;  %v1586_v8 = vmul.f32 0.3275911, %v1570_v43  ;;  %v4249_v35 = vadd.f32 %v4044_v38, %v3985_v19 }
 0x5d5   : > { %v1680_v16 = vmul.f32 %v4224_v39, %v1664_v31  ;;  %v1809_v49 = vmul.f32 %v1793_v59, %v1569_v0  ;;  %v1571_v2 = vand.u32 2147483647, %v4244_v44  ;;  %v1944_v25 = vmul.f32 %v1928_v7, %v4003_v11 }
 0x5d6   : > { %v1932_v47 = vadd.f32 1.0, %v1916_v33  ;;  %v1917_v1 = vsel %vm1885_vm6, %v1869_v54, %v1901_v61  ;;  %v1602_v50 = vadd.f32 1.0, %v1586_v8  ;;  %2871 = vpow2.f32 %v1832_v29 }
 0x5d7   : > { %v1696_v46 = vadd.f32 1.4214138, %v1680_v16  ;;  %v1587_v48 = vmul.f32 0.3275911, %v1571_v2  ;;  %v4258_v28 = vadd.f32 %v4116_v17, %v3920_v57  ;;  %v4261_v38 = vmul.f32 %v1929_v3, %v4024_v23 }
 0x5d8   : > { %v1918_v11 = vsel %vm1886_vm7, %v1870_v4, %v1902_v12  ;;  %v1871_v0 = vsub.f32 1.0, %v1855_v13  ;;  %2873 = vrcp.f32 %v1602_v50  ;;  %v1933_v37 = vadd.f32 1.0, %v1917_v1 }
 0x5d9   : > { %v1712_v54 = vmul.f32 %v4224_v39, %v1696_v46  ;;  %v1834_v52 = vmul.f32 1.442695, %v1809_v49  ;;  %v1603_v59 = vadd.f32 1.0, %v1587_v48  ;;  %v4267_v7 = vmul.f32 0.5, %v4158_v26 }
 0x5da   : > { %v1794_v61 = vsub.f32 0.0, %v1570_v43  ;;  %v4270_v17 = vmul.f32 0.70710677, %v4258_v28  ;;  %v4274_v23 = vadd.f32 %v4128_v27, %v3920_v57  ;;  %v4279_v4 = vmul.f32 %v1932_v47, %v4170_v30 }
 0x5db   : > { %v4276_v15 = vpop.eup %2869  ;;  %v1934_v53 = vadd.f32 1.0, %v1918_v11  ;;  %v1728_v33 = vadd.f32 -0.28449672, %v1712_v54  ;;  %2875 = vrcp.f32 %v1603_v59  ;;  %v1903_v31 = vsub.f32 0.0, %v1871_v0 }
 0x5dc   : > { %v1649_v26 = vmul.f32 1.0614054, %v4276_v15  ;;  %v4284_v29 = vadd.f32 %v4069_v56, %v3985_v19  ;;  %v1572_v3 = vand.u32 2147483647, %v4270_v17  ;;  %v4288_v27 = vmul.f32 %v1933_v37, %v4176_v22 }
 0x5dd   : > { %v1744_v12 = vmul.f32 %v4224_v39, %v1728_v33  ;;  %2877 = vpow2.f32 %v1834_v52  ;;  %v4292_v30 = vmul.f32 0.70710677, %v4274_v23  ;;  %v1810_v8 = vmul.f32 %v1794_v61, %v1570_v43 }
 0x5de   : > { %v1665_v13 = vadd.f32 -1.4531521, %v1649_v26  ;;  %v1588_v16 = vmul.f32 0.3275911, %v1572_v3  ;;  %v4296_v49 = vadd.f32 %v4151_v32, %v3920_v57  ;;  %v4299_v56 = vmul.f32 %v1934_v53, %v4199_v24 }
 0x5df   : > { %v1760_v47 = vadd.f32 0.2548296, %v1744_v12  ;;  %v1795_v1 = vsub.f32 0.0, %v1571_v2  ;;  %v1573_v22 = vand.u32 2147483647, %v4292_v30  ;;  %v1919_v50 = vsel %vm1887_vm8, %v1871_v0, %v1903_v31 }
 0x5e0   : > { %v1681_v46 = vmul.f32 %v4276_v15, %v1665_v13  ;;  %v1604_v48 = vadd.f32 1.0, %v1588_v16  ;;  %v1796_v11 = vsub.f32 0.0, %v1572_v3  ;;  %v2872_v43 = vpop.eup %2871  ;;  %v4307_v52 = vmul.f32 0.70710677, %v4296_v49 }
 0x5e1   : > { %v1776_v37 = vmul.f32 %v4224_v39, %v1760_v47  ;;  %v1589_v54 = vmul.f32 0.3275911, %v1573_v22  ;;  %v1797_v32 = vsub.f32 0.0, %v1573_v22  ;;  %v1836_v61 = vmul.f32 1.442695, %v1810_v8 }
 0x5e2   : > { %v4309_v24 = vpop.eup %2873  ;;  %v1697_v59 = vadd.f32 1.4214138, %v1681_v46  ;;  %2879 = vrcp.f32 %v1604_v48  ;;  %v1960_v36 = vmul.f32 %v1944_v25, %v4000_v55  ;;  %vm1888_vm9 = vcmp.ge.f32.partialorder %v4126_v41, 0.0 }
 0x5e3   : > { %v1856_v0 = vmul.f32 %v2872_v43, %v1776_v37  ;;  %v1650_v53 = vmul.f32 1.0614054, %v4309_v24  ;;  %v1811_v33 = vmul.f32 %v1795_v1, %v1571_v2  ;;  %v1605_v31 = vadd.f32 1.0, %v1589_v54 }
 0x5e4   : > { %v1935_v39 = vadd.f32 1.0, %v1919_v50  ;;  %v1713_v26 = vmul.f32 %v4276_v15, %v1697_v59  ;;  %v1812_v12 = vmul.f32 %v1796_v11, %v1572_v3  ;;  %v1574_v13 = vand.u32 2147483647, %v4307_v52 }
 0x5e5   : > { %v4316_v16 = vpop.eup %2875  ;;  %v1872_v47 = vsub.f32 1.0, %v1856_v0  ;;  %v1666_v8 = vadd.f32 -1.4531521, %v1650_v53  ;;  %2881 = vrcp.f32 %v1605_v31  ;;  %v1813_v46 = vmul.f32 %v1797_v32, %v1573_v22 }
 0x5e6   : > { %v1729_v55 = vadd.f32 -0.28449672, %v1713_v26  ;;  %v1651_v25 = vmul.f32 1.0614054, %v4316_v16  ;;  %v1590_v48 = vmul.f32 0.3275911, %v1574_v13  ;;  %v1961_v2 = vmul.f32 %v4261_v38, %v4021_v6 }
 0x5e7   : > { %v2878_v1 = vpop.eup %2877  ;;  %v1904_v50 = vsub.f32 0.0, %v1872_v47  ;;  %v1682_v43 = vmul.f32 %v4309_v24, %v1666_v8  ;;  %2883 = vpow2.f32 %v1836_v61  ;;  %v1838_v3 = vmul.f32 1.442695, %v1811_v33 }
 0x5e8   : > { %v1745_v11 = vmul.f32 %v4276_v15, %v1729_v55  ;;  %v1667_v37 = vadd.f32 -1.4531521, %v1651_v25  ;;  %v1606_v54 = vadd.f32 1.0, %v1590_v48  ;;  %v1976_v59 = vpack.c.bf16 %v1961_v2, %v1960_v36 }
 0x5e9   : > { %v1951_v22 = vmul.f32 %v1935_v39, %v4208_v51  ;;  %v1698_v32 = vadd.f32 1.4214138, %v1682_v43  ;;  %v1840_v0 = vmul.f32 1.442695, %v1812_v12  ;;  %v4326_v53 = vadd.f32 %v4164_v63, %v3920_v57 }
 0x5ea   : > { %v1761_v6 = vadd.f32 0.2548296, %v1745_v11  ;;  %v1683_v38 = vmul.f32 %v4316_v16, %v1667_v37  ;;  %v1842_v31 = vmul.f32 1.442695, %v1813_v46  ;;  %2885 = vrcp.f32 %v1606_v54  ;;  %2595 = vmatprep.mubr.bf16.mxu0 %v1976_v59 }
 0x5eb   : > { %vm1889_vm10 = vcmp.ge.f32.partialorder %v4185_v40, 0.0  ;;  %v1714_v61 = vmul.f32 %v4309_v24, %v1698_v32  ;;  %2887 = vpow2.f32 %v1838_v3  ;;  %v1798_v36 = vsub.f32 0.0, %v1574_v13  ;;  %2596 = vmatmul.mubr.bf16.vlgmr.msra.gmra.mrb[16].mxu0 %v1977_v21  ;;  %v4634_v21 = vld [vmem:[#allocation24_spill] sm:$0xff] }
 0x5ec   : > { %v4332_v51 = vmul.f32 0.70710677, %v4326_v53  ;;  %v4337_v57 = vpop.eup %2879  ;;  %v1920_v63 = vsel %vm1888_vm9, %v1872_v47, %v1904_v50  ;;  %v1777_v33 = vmul.f32 %v4276_v15, %v1761_v6  ;;  %v1699_v39 = vadd.f32 1.4214138, %v1683_v38 }
 0x5ed   : > { %v1964_v26 = vmul.f32 %v4279_v4, %v4089_v9  ;;  %v1730_v12 = vadd.f32 -0.28449672, %v1714_v61  ;;  %v1652_v8 = vmul.f32 1.0614054, %v4337_v57  ;;  %2889 = vpow2.f32 %v1840_v0 }
 0x5ee   : > { %v4346_v46 = vand.u32 2147483647, %v4332_v51  ;;  %v1857_v58 = vmul.f32 %v2878_v1, %v1777_v33  ;;  %v1715_v20 = vmul.f32 %v4316_v16, %v1699_v39  ;;  %2891 = vpow2.f32 %v1842_v31 }
 0x5ef   : > { %v1965_v41 = vmul.f32 %v4288_v27, %v4634_v21  ;;  %v4351_v47 = vpop.eup %2881  ;;  %v1936_v15 = vadd.f32 1.0, %v1920_v63  ;;  %v1746_v55 = vmul.f32 %v4309_v24, %v1730_v12  ;;  %v1668_v9 = vadd.f32 -1.4531521, %v1652_v8 }
 0x5f0   : > { %v1591_v4 = vmul.f32 0.3275911, %v4346_v46  ;;  %v1873_v25 = vsub.f32 1.0, %v1857_v58  ;;  %v1731_v48 = vadd.f32 -0.28449672, %v1715_v20  ;;  %v1814_v11 = vmul.f32 %v1798_v36, %v1574_v13 }
 0x5f1   : > { %v1653_v2 = vmul.f32 1.0614054, %v4351_v47  ;;  %v1978_v50 = vpack.c.bf16 %v1965_v41, %v1964_v26  ;;  %v2884_v1 = vpop.eup %2883  ;;  %v1762_v43 = vadd.f32 0.2548296, %v1746_v55  ;;  %v1684_v3 = vmul.f32 %v4337_v57, %v1668_v9 }
 0x5f2   : > { %v1607_v37 = vadd.f32 1.0, %v1591_v4  ;;  %v1905_v27 = vsub.f32 0.0, %v1873_v25  ;;  %v1747_v54 = vmul.f32 %v4316_v16, %v1731_v48  ;;  %v1966_v32 = vmul.f32 %v4299_v56, %v4180_v45 }
 0x5f3   : > { %v1669_v59 = vadd.f32 -1.4531521, %v1653_v2  ;;  %2599 = vmatprep.mubr.bf16.mxu0 %v1978_v50  ;;  %v1952_v0 = vmul.f32 %v1936_v15, %v4238_v34  ;;  %v1778_v6 = vmul.f32 %v4309_v24, %v1762_v43  ;;  %v1700_v38 = vadd.f32 1.4214138, %v1684_v3 }
 0x5f4   : > { %2893 = vrcp.f32 %v1607_v37  ;;  %v4362_v31 = vpop.eup %2885  ;;  %v1921_v13 = vsel %vm1889_vm10, %v1873_v25, %v1905_v27  ;;  %v1763_v61 = vadd.f32 0.2548296, %v1747_v54  ;;  %v1967_v63 = vmul.f32 %v1951_v22, %v4203_v5 }
 0x5f5   : > { %v1685_v36 = vmul.f32 %v4351_v47, %v1669_v59  ;;  %v2888_v33 = vpop.eup %2887  ;;  %v1937_v39 = vadd.f32 1.0, %v1921_v13  ;;  %v1858_v26 = vmul.f32 %v2884_v1, %v1778_v6  ;;  %v1716_v45 = vmul.f32 %v4337_v57, %v1700_v38 }
 0x5f6   : > { %v1654_v34 = vmul.f32 1.0614054, %v4362_v31  ;;  %v1779_v56 = vmul.f32 %v4316_v16, %v1763_v61  ;;  %v1844_v12 = vmul.f32 1.442695, %v1814_v11  ;;  %v1979_v8 = vpack.c.bf16 %v1967_v63, %v1966_v32 }
 0x5f7   : > { %v1701_v24 = vadd.f32 1.4214138, %v1685_v36  ;;  %v2890_v58 = vpop.eup %2889  ;;  %v1953_v40 = vmul.f32 %v1937_v39, %v4267_v7  ;;  %v1874_v20 = vsub.f32 1.0, %v1858_v26  ;;  %v1732_v21 = vadd.f32 -0.28449672, %v1716_v45 }
 0x5f8   : > { %v1670_v41 = vadd.f32 -1.4531521, %v1654_v34  ;;  %v2892_v15 = vpop.eup %2891  ;;  %v1859_v5 = vmul.f32 %v2888_v33, %v1779_v56  ;;  %v1799_v55 = vsub.f32 0.0, %v4346_v46  ;;  %2600 = vmatmul.mubr.bf16.gmra.mrb[20].mxu0 %v1979_v8  ;;  %v1968_v9 = vmul.f32 %v1952_v0, %v4212_v62 }
 0x5f9   : > { %v1717_v22 = vmul.f32 %v4351_v47, %v1701_v24  ;;  %v1906_v4 = vsub.f32 0.0, %v1874_v20  ;;  %v1748_v16 = vmul.f32 %v4337_v57, %v1732_v21  ;;  %v1969_v48 = vmul.f32 %v1953_v40, %v4249_v35 }
 0x5fa   : > { %v1686_v25 = vmul.f32 %v4362_v31, %v1670_v41  ;;  %v1538_v7 = vmul.f32 0.5, %v4216_v14  ;;  %vm1890_vm11 = vcmp.ge.f32.partialorder %v4228_v10, 0.0  ;;  %v1875_v2 = vsub.f32 1.0, %v1859_v5 }
 0x5fb   : > { %v1733_v50 = vadd.f32 -0.28449672, %v1717_v22  ;;  %v1922_v1 = vsel %vm1890_vm11, %v1874_v20, %v1906_v4  ;;  %v1764_v43 = vadd.f32 0.2548296, %v1748_v16  ;;  %v1980_v11 = vpack.c.bf16 %v1969_v48, %v1968_v9  ;;  %v4636_v9 = vld [vmem:[#allocation25_spill] sm:$0xff] }
 0x5fc   : > { %v1702_v3 = vadd.f32 1.4214138, %v1686_v25  ;;  %v1938_v37 = vadd.f32 1.0, %v1922_v1  ;;  %v1907_v27 = vsub.f32 0.0, %v1875_v2  ;;  %2895 = vpow2.f32 %v1844_v12 }
 0x5fd   : > { %v1749_v62 = vmul.f32 %v4351_v47, %v1733_v50  ;;  %vm1891_vm12 = vcmp.ge.f32.partialorder %v4244_v44, 0.0  ;;  %v1780_v35 = vmul.f32 %v4337_v57, %v1764_v43  ;;  %v1815_v10 = vmul.f32 %v1799_v55, %v4346_v46  ;;  %2603 = vmatprep.mubr.bf16.mxu1 %v1980_v11  ;;  %v4635_v44 = vld [vmem:[#allocation23_spill] sm:$0xff] }
 0x5fe   : > { %v2894_v54 = vpop.eup %2893  ;;  %v1718_v14 = vmul.f32 %v4362_v31, %v1702_v3  ;;  %v1954_v59 = vmul.f32 %v1938_v37, %v1538_v7  ;;  %v1923_v32 = vsel %vm1891_vm12, %v1875_v2, %v1907_v27  ;;  %v1539_v38 = vmul.f32 0.5, %v4232_v42 }
 0x5ff   : > { %v1765_v0 = vadd.f32 0.2548296, %v1749_v62  ;;  %v1655_v6 = vmul.f32 1.0614054, %v2894_v54  ;;  %v1939_v13 = vadd.f32 1.0, %v1923_v32  ;;  %v1860_v61 = vmul.f32 %v2890_v58, %v1780_v35 }
 0x600   : > { %v1734_v36 = vadd.f32 -0.28449672, %v1718_v14  ;;  %v1970_v63 = vmul.f32 %v1954_v59, %v4284_v29  ;;  %v1504_v33 = vadd.f32 %v4635_v44, %v3985_v19  ;;  %v1846_v34 = vmul.f32 1.442695, %v1815_v10  ;;  %v2738_v44 = vld [vmem:[%s4586_s7 + $0x8] sm:$0xff]  }
 0x601   : > { %v1781_v57 = vmul.f32 %v4351_v47, %v1765_v0  ;;  %v1671_v39 = vadd.f32 -1.4531521, %v1655_v6  ;;  %v1955_v26 = vmul.f32 %v1939_v13, %v1539_v38  ;;  %v1876_v46 = vsub.f32 1.0, %v1860_v61 }
 0x602   : > { %v1750_v45 = vmul.f32 %v4362_v31, %v1734_v36  ;;  %vm1892_vm13 = vcmp.ge.f32.partialorder %v4270_v17, 0.0  ;;  %2897 = vpow2.f32 %v1846_v34  ;;  %v1540_v41 = vmul.f32 0.5, %v4258_v28  ;;  %v4637_v28 = vld [vmem:[#allocation26_spill] sm:$0xff] }
 0x603   : > { %v1861_v56 = vmul.f32 %v2892_v15, %v1781_v57  ;;  %v1687_v24 = vmul.f32 %v2894_v54, %v1671_v39  ;;  %v1971_v12 = vmul.f32 %v1955_v26, %v1504_v33  ;;  %v1908_v42 = vsub.f32 0.0, %v1876_v46 }
 0x604   : > { %v1766_v8 = vadd.f32 0.2548296, %v1750_v45  ;;  %vm1893_vm14 = vcmp.ge.f32.partialorder %v4292_v30, 0.0  ;;  %v1510_v17 = vadd.f32 %v4636_v9, %v3985_v19  ;;  %v1541_v48 = vmul.f32 0.5, %v4274_v23  ;;  %v4638_v45 = vld [vmem:[#allocation9_spill] sm:$0xff] }
 0x605   : > { %v1877_v58 = vsub.f32 1.0, %v1861_v56  ;;  %v1703_v29 = vadd.f32 1.4214138, %v1687_v24  ;;  %v1981_v40 = vpack.c.bf16 %v1971_v12, %v1970_v63  ;;  %v1924_v20 = vsel %vm1892_vm13, %v1876_v46, %v1908_v42  ;;  %v4639_v56 = vld [vmem:[#allocation10_spill] sm:$0xff]  ;;  %v4640_v12 = vld [vmem:[#allocation7_spill] sm:$0xff]  ;;  %v4642_v9 = vld [vmem:[#allocation13_spill] sm:$0xff] }
 0x606   : > { %v1782_v21 = vmul.f32 %v4362_v31, %v1766_v8  ;;  %v2896_v47 = vpop.eup %2895  ;;  %v1940_v5 = vadd.f32 1.0, %v1924_v20  ;;  %v1514_v1 = vadd.f32 %v4637_v28, %v3985_v19  ;;  %vm1894_vm15 = vcmp.ge.f32.partialorder %v4307_v52, 0.0  ;;  %v4641_v8 = vld [vmem:[#allocation8_spill] sm:$0xff] }
 0x607   : > { %v1909_v22 = vsub.f32 0.0, %v1877_v58  ;;  %v1719_v55 = vmul.f32 %v2894_v54, %v1703_v29  ;;  %2604 = vmatmul.mubr.bf16.vlgmr.msra.gmra.mrb[32].mxu1 %v1981_v40  ;;  %v1542_v27 = vmul.f32 0.5, %v4296_v49  ;;  %v1520_v10 = vadd.f32 %v4145_v18, %v3985_v19  ;;  %v2737_v18 = vld [vmem:[%s4586_s7] sm:$0xff]  }
 0x608   : > { %v1862_v15 = vmul.f32 %v2896_v47, %v1782_v21  ;;  %v1956_v4 = vmul.f32 %v1940_v5, %v1540_v41  ;;  %vm1895_vm1 = vcmp.ge.f32.partialorder %v4332_v51, 0.0  ;;  %v1543_v13 = vmul.f32 0.5, %v4326_v53  ;;  %2611 = vmatprep.subr.bf16.mxu0 %v2737_v18 }
 0x609   : > { %v1925_v16 = vsel %vm1893_vm14, %v1877_v58, %v1909_v22  ;;  %v1735_v25 = vadd.f32 -0.28449672, %v1719_v55  ;;  %v1524_v49 = vadd.f32 %v4160_v60, %v3985_v19  ;;  %2612 = vmatpush3.bf16.msra.mxu0 %v2737_v18  ;;  %v2497_v19 = vld [vmem:[%s4581_s2 + $0x7] ss:$0 sm:$0xff] }
 0x60a   : > { %v1941_v31 = vadd.f32 1.0, %v1925_v16  ;;  %v1878_v7 = vsub.f32 1.0, %v1862_v15  ;;  %v1972_v50 = vmul.f32 %v1956_v4, %v1510_v17  ;;  %2613 = vmatprep.subr.bf16.mxu0 %v2738_v44  ;;  %v4643_v4 = vld [vmem:[#allocation14_spill] sm:$0xff] }
 0x60b   : > { %v1751_v2 = vmul.f32 %v2894_v54, %v1735_v25  ;;  %v4644_v25 = vld [vmem:[#allocation11_spill] sm:$0xff] }
 0x60c   : > { %v1957_v43 = vmul.f32 %v1941_v31, %v1541_v48  ;;  %v1910_v3 = vsub.f32 0.0, %v1878_v7  ;;  %v2898_v14 = vpop.eup %2897  ;;  %v4645_v31 = vld [vmem:[#allocation12_spill] sm:$0xff] }
 0x60d   : > { %v1767_v30 = vadd.f32 0.2548296, %v1751_v2  ;;  %2614 = vmatpush3.bf16.msra.mxu0 %v2738_v44  ;;  %v4650_v44 = vld [vmem:[#allocation21_spill] sm:$0xff] }
 0x60e   : > { %v1926_v11 = vsel %vm1894_vm15, %v1878_v7, %v1910_v3  ;;  %v1973_v37 = vmul.f32 %v1957_v43, %v1514_v1 }
 0x60f   : > { %v1942_v62 = vadd.f32 1.0, %v1926_v11  ;;  %v1783_v35 = vmul.f32 %v2894_v54, %v1767_v30 }
 0x610   : > { %v1982_v23 = vpack.c.bf16 %v1973_v37, %v1972_v50 }
 0x611   : > { %v1958_v59 = vmul.f32 %v1942_v62, %v1542_v27  ;;  %v1863_v32 = vmul.f32 %v2898_v14, %v1783_v35  ;;  %v4646_v62 = vld [vmem:[#allocation17_spill] sm:$0xff]  ;;  %v4647_v14 = vld [vmem:[#allocation18_spill] sm:$0xff] }
 0x612   : > { %2607 = vmatprep.mubr.bf16.mxu1 %v1982_v23 }
 0x613   : > { %v1879_v0 = vsub.f32 1.0, %v1863_v32  ;;  %v1974_v6 = vmul.f32 %v1958_v59, %v1520_v10  ;;  %v4648_v10 = vld [vmem:[#allocation15_spill] sm:$0xff]  ;;  %v4649_v32 = vld [vmem:[#allocation16_spill] sm:$0xff] }
 0x615   : > { %v1911_v38 = vsub.f32 0.0, %v1879_v0 }
 0x617   : > { %v1927_v52 = vsel %vm1895_vm1, %v1879_v0, %v1911_v38 }
 0x618   : > { %v1943_v61 = vadd.f32 1.0, %v1927_v52 }
 0x61a   : > { %v1959_v54 = vmul.f32 %v1943_v61, %v1543_v13 }
 0x61c   : > { %v1975_v36 = vmul.f32 %v1959_v54, %v1524_v49 }
 0x61e   : > { %v1983_v63 = vpack.c.bf16 %v1975_v36, %v1974_v6 }
 0x620   : > { %2608 = vmatmul.mubr.bf16.gmra.mrb[36].mxu1 %v1983_v63 }
 0x6be   : > { %v2597_v60 = vpop.f32.mrb[16].mxu0 }
 0x6bf   : > { %v2095_v53 = vadd.f32 %v2597_v60, %v2497_v19  ;;  %v2086_v51 = vpop.f32.mrb[17].mxu0 }
 0x6c0   : > { %v2087_v33 = vadd.f32 %v2497_v19, %v2086_v51  ;;  %v2598_v57 = vpop.f32.mrb[18].mxu0 }
 0x6c1   : > { %v2098_v39 = vadd.f32 %v2598_v57, %v2497_v19  ;;  %v2089_v26 = vpop.f32.mrb[19].mxu0  ;;  %v2151_v34 = vadd.f32 %v2095_v53, %v4638_v45  ;;  %v4651_v53 = vld [vmem:[#allocation22_spill] sm:$0xff] }
 0x6c2   : > { %v2090_v46 = vadd.f32 %v2497_v19, %v2089_v26  ;;  %v2149_v42 = vadd.f32 %v2087_v33, %v4640_v12  ;;  %v4652_v33 = vld [vmem:[#allocation19_spill] sm:$0xff] }
 0x6c3   : > { %v2152_v24 = vadd.f32 %v2098_v39, %v4639_v56  ;;  %v4653_v39 = vld [vmem:[#allocation20_spill] sm:$0xff] }
 0x6c4   : > { %v2150_v58 = vadd.f32 %v2090_v46, %v4641_v8  ;;  %v2899_v8 = vld [vmem:[%s3150_s4 + $0x10] sm:$0xff] }
 0x6c5   : > { %v2166_v29 = vpack.c.bf16 %v2152_v24, %v2151_v34 }
 0x6c6   : > { %v2165_v40 = vpack.c.bf16 %v2150_v58, %v2149_v42 }
 0x6c8   : > { %2615 = vmatprep.mubr.msk.bf16.mxu0 %vm448_vm0, %v2165_v40 }
 0x6c9   : > { %2616 = vmatmul.mubr.msk.bf16.vlgmr.msra.gmra.mrb[24].mxu0 %vm448_vm0, %v2166_v29 }
 0x6cb   : > { %v2601_v20 = vpop.f32.mrb[20].mxu0 }
 0x6cc   : > { %v2111_v21 = vadd.f32 %v2601_v20, %v2497_v19  ;;  %v2102_v47 = vpop.f32.mrb[21].mxu0  ;;  %v2900_v20 = vld [vmem:[%s3150_s4] sm:$0xff] }
 0x6cd   : > { %v2103_v41 = vadd.f32 %v2497_v19, %v2102_v47  ;;  %v2602_v5 = vpop.f32.mrb[22].mxu0 }
 0x6ce   : > { %v2114_v22 = vadd.f32 %v2602_v5, %v2497_v19  ;;  %v2105_v55 = vpop.f32.mrb[23].mxu0  ;;  %v2155_v17 = vadd.f32 %v2111_v21, %v4642_v9 }
 0x6cf   : > { %v2106_v15 = vadd.f32 %v2497_v19, %v2105_v55  ;;  %v2153_v48 = vadd.f32 %v2103_v41, %v4644_v25  ;;  %v2901_v41 = vld [vmem:[%s3150_s4 + $0x18] sm:$0xff]  ;;  %v2903_v25 = vld [vmem:[%s3150_s4 + $0x30] sm:$0xff] }
 0x6d0   : > { %v2156_v16 = vadd.f32 %v2114_v22, %v4643_v4  ;;  %v2902_v22 = vld [vmem:[%s3150_s4 + $0x8] sm:$0xff] }
 0x6d1   : > { %v2154_v7 = vadd.f32 %v2106_v15, %v4645_v31 }
 0x6d2   : > { %v2168_v2 = vpack.c.bf16 %v2156_v16, %v2155_v17 }
 0x6d3   : > { %v2167_v50 = vpack.c.bf16 %v2154_v7, %v2153_v48 }
 0x6d5   : > { %2619 = vmatprep.mubr.msk.bf16.mxu0 %vm448_vm0, %v2167_v50 }
 0x6d6   : > { %2620 = vmatmul.mubr.msk.bf16.gmra.mrb[28].mxu0 %vm448_vm0, %v2168_v2  ;;  %v2904_v2 = vld [vmem:[%s3150_s4 + $0x20] sm:$0xff] }
 0x6da   : > { %v2605_v28 = vpop.f32.mrb[32].mxu1 }
 0x6db   : > { %v2127_v1 = vadd.f32 %v2605_v28, %v2497_v19  ;;  %v2118_v43 = vpop.f32.mrb[33].mxu1 }
 0x6dc   : > { %v2119_v3 = vadd.f32 %v2497_v19, %v2118_v43  ;;  %v2606_v30 = vpop.f32.mrb[34].mxu1 }
 0x6dd   : > { %v2130_v11 = vadd.f32 %v2606_v30, %v2497_v19  ;;  %v2121_v37 = vpop.f32.mrb[35].mxu1  ;;  %v2159_v35 = vadd.f32 %v2127_v1, %v4646_v62  ;;  %v2905_v1 = vld [vmem:[%s3150_s4 + $0x38] sm:$0xff] }
 0x6de   : > { %v2122_v27 = vadd.f32 %v2497_v19, %v2121_v37  ;;  %v2157_v59 = vadd.f32 %v2119_v3, %v4648_v10  ;;  %v2906_v3 = vld [vmem:[%s3150_s4 + $0x28] sm:$0xff] }
 0x6df   : > { %v2160_v23 = vadd.f32 %v2130_v11, %v4647_v14  ;;  %v2907_v14 = vld [vmem:[%s3150_s4 + $0x50] sm:$0xff] }
 0x6e0   : > { %v2158_v0 = vadd.f32 %v2122_v27, %v4649_v32  ;;  %v2908_v32 = vld [vmem:[%s3150_s4 + $0x40] sm:$0xff] }
 0x6e1   : > { %v2170_v6 = vpack.c.bf16 %v2160_v23, %v2159_v35 }
 0x6e2   : > { %v2169_v38 = vpack.c.bf16 %v2158_v0, %v2157_v59 }
 0x6e4   : > { %2623 = vmatprep.mubr.msk.bf16.mxu0 %vm448_vm0, %v2169_v38  ;;  %v2909_v38 = vld [vmem:[%s3150_s4 + $0x58] sm:$0xff] }
 0x6e5   : > { %2624 = vmatmul.mubr.msk.bf16.gmra.mrb[32].mxu0 %vm448_vm0, %v2170_v6 }
 0x6f3   : > { %v2609_v52 = vpop.f32.mrb[36].mxu1 }
 0x6f4   : > { %v2143_v13 = vadd.f32 %v2609_v52, %v2497_v19  ;;  %v2134_v61 = vpop.f32.mrb[37].mxu1 }
 0x6f5   : > { %v2135_v49 = vadd.f32 %v2497_v19, %v2134_v61  ;;  %v2610_v54 = vpop.f32.mrb[38].mxu1 }
 0x6f6   : > { %v2146_v36 = vadd.f32 %v2610_v54, %v2497_v19  ;;  %v2137_v63 = vpop.f32.mrb[39].mxu1  ;;  %v2163_v60 = vadd.f32 %v2143_v13, %v4650_v44  ;;  %v2910_v13 = vld [vmem:[%s3150_s4 + $0x48] sm:$0xff]  ;;  %v2911_v44 = vld [vmem:[%s3150_s4 + $0x70] sm:$0xff] }
 0x6f7   : > { %v2138_v18 = vadd.f32 %v2497_v19, %v2137_v63  ;;  %v2161_v57 = vadd.f32 %v2135_v49, %v4652_v33  ;;  %v4445_v19 = vld [vmem:[%s4581_s2 + $0x8] ss:$0 sm:$0xff]  ;;  %v2912_v33 = vld [vmem:[%s3150_s4 + $0x60] sm:$0xff] }
 0x6f8   : > { %v2164_v51 = vadd.f32 %v2146_v36, %v4651_v53 }
 0x6f9   : > { %v2162_v26 = vadd.f32 %v2138_v18, %v4653_v39 }
 0x6fa   : > { %v2172_v46 = vpack.c.bf16 %v2164_v51, %v2163_v60 }
 0x6fb   : > { %v2171_v45 = vpack.c.bf16 %v2162_v26, %v2161_v57  ;;  %v2913_v26 = vld [vmem:[%s3150_s4 + $0x78] sm:$0xff] }
 0x6fd   : > { %2627 = vmatprep.mubr.msk.bf16.mxu0 %vm448_vm0, %v2171_v45  ;;  %v2914_v45 = vld [vmem:[%s3150_s4 + $0x68] sm:$0xff]  ;;  %s2919_s4 = sshll.u32 %s3012_s21, 4  ;;  %s2920_s4 = int_to_ptr.vmem [resolvable:$false] %s2919_s4 }
 0x6fe   : > { %2628 = vmatmul.mubr.msk.bf16.gmra.mrb[36].mxu0 %vm448_vm0, %v2172_v46  ;;  %s2921_s22 = scalar_lea.vmem %s2920_s4, 4096  ;;  %p2922_p4 = scmp.lt.s32.totalorder %s4519_s9, %s2920_s4 }
 0x6ff   : > { %p2923_p5 = scmp.lt.s32.totalorder %s2921_s22, %s2915_s20 }
 0x701   : > { %p2924_p6 = por %p2923_p5, %p2922_p4 }
 0x703   : > { %p2925_p7 = pnand %p2924_p6, %p2918_p2 }
 0x79c   : > { %v2617_v34 = vpop.f32.mrb[24].mxu0 }
 0x79d   : > { %v2260_v56 = vadd.f32 %v2617_v34, %v4445_v19  ;;  %v2251_v24 = vpop.f32.mrb[25].mxu0 }
 0x79e   : > { %v2252_v12 = vadd.f32 %v4445_v19, %v2251_v24  ;;  %v2618_v42 = vpop.f32.mrb[26].mxu0 }
 0x79f   : > { %v2316_v58 = vadd.f32 %v2899_v8, %v2260_v56  ;;  %v2263_v29 = vadd.f32 %v2618_v42, %v4445_v19  ;;  %v2254_v40 = vpop.f32.mrb[27].mxu0 }
 0x7a0   : > { %v2314_v21 = vadd.f32 %v2900_v20, %v2252_v12  ;;  %v2255_v47 = vadd.f32 %v4445_v19, %v2254_v40 }
 0x7a1   : > { %2332 = vst.msk [vmem:[%s4455_s24 + $0x10] sm:$0xff] %vm448_vm0, %v2316_v58  ;;  %v2317_v5 = vadd.f32 %v2901_v41, %v2263_v29 }
 0x7a2   : > { %2330 = vst.msk [vmem:[%s4455_s24] sm:$0xff] %vm448_vm0, %v2314_v21  ;;  %v2315_v55 = vadd.f32 %v2902_v22, %v2255_v47 }
 0x7a3   : > { %2333 = vst.msk [vmem:[%s4455_s24 + $0x18] sm:$0xff] %vm448_vm0, %v2317_v5 }
 0x7a4   : > { %2331 = vst.msk [vmem:[%s4455_s24 + $0x8] sm:$0xff] %vm448_vm0, %v2315_v55 }
 0x7a9   : > { %v2621_v15 = vpop.f32.mrb[28].mxu0 }
 0x7aa   : > { %v2276_v9 = vadd.f32 %v2621_v15, %v4445_v19  ;;  %v2267_v17 = vpop.f32.mrb[29].mxu0 }
 0x7ab   : > { %v2268_v4 = vadd.f32 %v4445_v19, %v2267_v17  ;;  %v2622_v16 = vpop.f32.mrb[30].mxu0 }
 0x7ac   : > { %v2320_v48 = vadd.f32 %v2903_v25, %v2276_v9  ;;  %v2279_v31 = vadd.f32 %v2622_v16, %v4445_v19  ;;  %v2270_v7 = vpop.f32.mrb[31].mxu0 }
 0x7ad   : > { %v2318_v50 = vadd.f32 %v2904_v2, %v2268_v4  ;;  %v2271_v28 = vadd.f32 %v4445_v19, %v2270_v7 }
 0x7ae   : > { %2336 = vst.msk [vmem:[%s4455_s24 + $0x30] sm:$0xff] %vm448_vm0, %v2320_v48  ;;  %v2321_v43 = vadd.f32 %v2905_v1, %v2279_v31 }
 0x7af   : > { %2334 = vst.msk [vmem:[%s4455_s24 + $0x20] sm:$0xff] %vm448_vm0, %v2318_v50  ;;  %v2319_v30 = vadd.f32 %v2906_v3, %v2271_v28 }
 0x7b0   : > { %2337 = vst.msk [vmem:[%s4455_s24 + $0x38] sm:$0xff] %vm448_vm0, %v2321_v43 }
 0x7b1   : > { %2335 = vst.msk [vmem:[%s4455_s24 + $0x28] sm:$0xff] %vm448_vm0, %v2319_v30 }
 0x7b8   : > { %v2625_v11 = vpop.f32.mrb[32].mxu0 }
 0x7b9   : > { %v2292_v37 = vadd.f32 %v2625_v11, %v4445_v19  ;;  %v2283_v27 = vpop.f32.mrb[33].mxu0 }
 0x7ba   : > { %v2284_v62 = vadd.f32 %v4445_v19, %v2283_v27  ;;  %v2626_v35 = vpop.f32.mrb[34].mxu0 }
 0x7bb   : > { %v2324_v23 = vadd.f32 %v2907_v14, %v2292_v37  ;;  %v2295_v10 = vadd.f32 %v2626_v35, %v4445_v19  ;;  %v2286_v59 = vpop.f32.mrb[35].mxu0 }
 0x7bc   : > { %v2322_v0 = vadd.f32 %v2908_v32, %v2284_v62  ;;  %v2287_v6 = vadd.f32 %v4445_v19, %v2286_v59 }
 0x7bd   : > { %2340 = vst.msk [vmem:[%s4455_s24 + $0x50] sm:$0xff] %vm448_vm0, %v2324_v23  ;;  %v2325_v52 = vadd.f32 %v2909_v38, %v2295_v10 }
 0x7be   : > { %2338 = vst.msk [vmem:[%s4455_s24 + $0x40] sm:$0xff] %vm448_vm0, %v2322_v0  ;;  %v2323_v61 = vadd.f32 %v2910_v13, %v2287_v6 }
 0x7bf   : > { %2341 = vst.msk [vmem:[%s4455_s24 + $0x58] sm:$0xff] %vm448_vm0, %v2325_v52 }
 0x7c0   : > { %2339 = vst.msk [vmem:[%s4455_s24 + $0x48] sm:$0xff] %vm448_vm0, %v2323_v61 }
 0x7d1   : > { %v2629_v49 = vpop.f32.mrb[36].mxu0 }
 0x7d2   : > { %v2308_v54 = vadd.f32 %v2629_v49, %v4445_v19  ;;  %v2299_v36 = vpop.f32.mrb[37].mxu0 }
 0x7d3   : > { %v2300_v63 = vadd.f32 %v4445_v19, %v2299_v36  ;;  %v2630_v18 = vpop.f32.mrb[38].mxu0 }
 0x7d4   : > { %v2328_v60 = vadd.f32 %v2911_v44, %v2308_v54  ;;  %v2311_v53 = vadd.f32 %v2630_v18, %v4445_v19  ;;  %v2302_v51 = vpop.f32.mrb[39].mxu0 }
 0x7d5   : > { %v2326_v57 = vadd.f32 %v2912_v33, %v2300_v63  ;;  %v2303_v39 = vadd.f32 %v4445_v19, %v2302_v51 }
 0x7d6   : > { %2344 = vst.msk [vmem:[%s4455_s24 + $0x70] sm:$0xff] %vm448_vm0, %v2328_v60  ;;  %v2329_v46 = vadd.f32 %v2913_v26, %v2311_v53 }
 0x7d7   : > { %2342 = vst.msk [vmem:[%s4455_s24 + $0x60] sm:$0xff] %vm448_vm0, %v2326_v57  ;;  %v2327_v34 = vadd.f32 %v2914_v45, %v2303_v39 }
 0x7d8   : > { %2345 = vst.msk [vmem:[%s4455_s24 + $0x78] sm:$0xff] %vm448_vm0, %v2329_v46 }
 0x7d9   : > { %2343 = vst.msk [vmem:[%s4455_s24 + $0x68] sm:$0xff] %vm448_vm0, %v2327_v34 }
 0x7da   : > { %2928 = shalt.err (!%p2925_p7)
}
 0x7db   : > { %s2929_s17 = scalar_lea.hbm %s4509_s15, 2048  ;;  %s2933_s30 = scalar_lea.hbm %s4587_s8, 8192 }
 0x7dc   : > { %p2930_p9 = scmp.ne.s32.totalorder %s4509_s15, %s2929_s17  ;;  %p2934_p12 = scmp.lt.u32.totalorder %s4509_s15, %s4587_s8 }
 0x7dd   : > { %p2935_p13 = scmp.lt.u32.totalorder %s2933_s30, %s2929_s17  ;;  %p2937_p1 = scmp.lt.u32.totalorder %s2929_s17, %s4509_s15 }
 0x7de   : > { %p2931_p10 = pnand %p2930_p9, %p3111_p3 }
 0x7df   : > { %p2936_p0 = por %p2935_p13, %p2934_p12 }
 0x7e0   : > { %p2932_p11 = pneg %p2931_p10 }
 0x7e1   : > { %p2938_p2 = por %p2937_p1, %p2936_p0 }
 0x7e3   : > { %p2939_p4 = pnand %p2938_p2, %p2932_p11 }
 0x7e5   : > { %2942 = shalt.err (!%p2939_p4)
}
 0x7e6   : > { %s3013_s14 = smov 128   ;;  %s3014_s20 = smov 8  }
 0x7e7   : > { %2647 = dma.vmem_to_hbm [thread:$0]  (%p3111_p3), %s4519_s9, 2048, %s4509_s15, %s4527_s16, %s3013_s14, %s3013_s14, %s3014_s20  }
 0x7e8 PF: > { %p2653_p5 = scmp.ge.s32.totalorder %s3009_s12, 2  ;;  %s2377_s21 = sand.u32 1, %s2981_s27  }
 0x7e9   : > { %s2378_s4 = scalar_lea.sflag [#allocation3], %s2377_s21 }
 0x7ea   : > { %p2650_p6 = pnand %p2653_p5, %p3120_p8 }
 0x7ec   : > { %2976 = dma.done.wait (!%p2650_p6), %s2378_s4, 2048  }
 0x7ed   : > { %2978 = vsyncadd (!%p2650_p6), %s2378_s4, 4294965248  ;;  %s21_s12 = sadd.s32 1, %s3009_s12   ;;  %s4654_s18 = sld [smem:[#allocation5_spill]] }
 0x7ee   : > { %p18_p7 = scmp.ge.s32.totalorder %s21_s12, 6   ;;  %s4655_s15 = sld [smem:[#allocation6_spill]] }
 0x7ef   : > { %s4656_s27 = smov %s2985_s28  ;;  %s4657_s28 = smov %s2989_s29 }
 0x7f0   : > { %s4658_s29 = smov %s3129_s23  ;;  %s4659_s30 = smov %s3001_s10 }
 0x7f1   : > { %s4660_s9 = smov %s3005_s11  ;;  %20 = sbr.rel (!%p18_p7) target bundleno = 7 (0x7), region = 90 }
 0x7f3   : > { %s4661_s10 = smov %s4654_s18 }
 0x7f4   : > { %s4662_s11 = smov %s4655_s15 }
 0x7f8   :  { %2383 = vsyncpa [#allocation3], 1 }
 0x7f9   :  { %2385 = vsyncpa [#allocation3 + $0x1], 1 }

</bundles_post_ra>
